<compile_context>
chip_gen: v7x
topology: tpu7x:2x2x1
jax: 0.10.0
libtpu: 0.0.40
codegen_flags: <defaults>
</compile_context>

<pallas_src>
import jax
import jax.numpy as jnp
from jax.experimental import pallas as pl
from jax.experimental.pallas import tpu as pltpu

FILTER_SIZES = (3, 4, 5)
F_PAD = 128      # num_filters (100) padded to lane width
C_PAD = 128      # num_classes (2) padded to lane width


def textcnn_kernel(x_ref,
                   w3_ref, b3_ref, fw3_ref,
                   w4_ref, b4_ref, fw4_ref,
                   w5_ref, b5_ref, fw5_ref,
                   fcb_ref, out_ref):
    x = x_ref[...]                            # (TB, L, D) f32 tile
    TB, L, D = x.shape
    xb = x.astype(jnp.bfloat16)               # bf16 operands for the MXU

    acc_out = None
    for w_ref, b_ref, fw_ref in ((w3_ref, b3_ref, fw3_ref),
                                 (w4_ref, b4_ref, fw4_ref),
                                 (w5_ref, b5_ref, fw5_ref)):
        kD = w_ref.shape[0]                   # k * D (static)
        k = kD // D
        Lout = L - k + 1

        # im2col: concatenate the k shifted D-slices along the lane axis.
        cols = [xb[:, s:s + Lout, :] for s in range(k)]          # k x (TB, Lout, D)
        xs = jnp.concatenate(cols, axis=-1).reshape(TB * Lout, kD)

        # Single deep matmul per filter size (contraction depth k*D).
        conv = jnp.dot(xs, w_ref[...], preferred_element_type=jnp.float32)
        conv = conv.reshape(TB, Lout, F_PAD) + b_ref[...][None, :, :]   # bias (f32)
        conv = jnp.maximum(conv, 0.0)                                   # ReLU (f32)
        pooled = jnp.max(conv, axis=1)                                  # (TB, F_PAD)

        # Partial FC matmul (replaces concat + one big matmul).
        part = jnp.dot(pooled.astype(jnp.bfloat16), fw_ref[...],
                       preferred_element_type=jnp.float32)              # (TB, C_PAD)
        acc_out = part if acc_out is None else acc_out + part

    # Dropout is identity at inference time (eval mode).
    out_ref[...] = acc_out + fcb_ref[...]


def _prep_params(conv_ws, conv_bs, fc_w, fc_b):
    """Pad filters to F_PAD / classes to C_PAD, flatten conv weights for im2col,
    split fc_w into per-filter slabs, cast matmul operands to bf16."""
    ws, bs, fws = [], [], []
    C = fc_w.shape[1]
    off = 0
    for W, b in zip(conv_ws, conv_bs):
        k, D, F_ = W.shape
        W2 = W.reshape(k * D, F_)
        W2 = jnp.pad(W2, ((0, 0), (0, F_PAD - F_))).astype(jnp.bfloat16)
        b2 = jnp.pad(b, ((0, 0), (0, F_PAD - F_))).astype(jnp.float32)
        fw = fc_w[off:off + F_, :]
        fw = jnp.pad(fw, ((0, F_PAD - F_), (0, C_PAD - C))).astype(jnp.bfloat16)
        ws.append(W2)
        bs.append(b2)
        fws.append(fw)
        off += F_
    fcb = jnp.pad(fc_b, ((0, 0), (0, C_PAD - C))).astype(jnp.float32)
    return ws, bs, fws, fcb


def textcnn_forward(x, conv_ws, conv_bs, fc_w, fc_b, *, tb=8):
    """tb = batch tile (rows per grid step). For production shapes size it
    against VMEM per generation: ~2x double-buffered (tb*L*D*4B) + weights must
    fit the scoped VMEM limit (64 MiB physical on v7x, 128 MiB on v5e/v6e)."""
    B, L, D = x.shape
    C = fc_w.shape[1]
    ws, bs, fws, fcb = _prep_params(conv_ws, conv_bs, fc_w, fc_b)

    # Pad batch to a multiple of the tile.
    B_pad = pl.cdiv(B, tb) * tb
    if B_pad != B:
        x = jnp.pad(x, ((0, B_pad - B), (0, 0), (0, 0)))
    grid = (B_pad // tb,)

    # Cost hint: conv matmuls + partial FC matmuls; bytes = streamed x + params + out.
    flops = 0
    for W in conv_ws:
        k = W.shape[0]
        flops += 2 * B_pad * (L - k + 1) * k * D * F_PAD
    flops += 2 * B_pad * len(conv_ws) * F_PAD * C_PAD
    bytes_accessed = (B_pad * L * D * 4
                      + sum(w.size * 2 for w in ws)
                      + sum(b.size * 4 for b in bs)
                      + sum(f.size * 2 for f in fws)
                      + fcb.size * 4
                      + B_pad * C_PAD * 4)

    in_specs = [pl.BlockSpec((tb, L, D), lambda i: (i, 0, 0))]
    args = [x]
    for W2, b2, fw in zip(ws, bs, fws):
        in_specs += [pl.BlockSpec(W2.shape, lambda i: (0, 0)),
                     pl.BlockSpec(b2.shape, lambda i: (0, 0)),
                     pl.BlockSpec(fw.shape, lambda i: (0, 0))]
        args += [W2, b2, fw]
    in_specs.append(pl.BlockSpec(fcb.shape, lambda i: (0, 0)))
    args.append(fcb)

    out = pl.pallas_call(
        textcnn_kernel,
        out_shape=jax.ShapeDtypeStruct((B_pad, C_PAD), jnp.float32),
        grid_spec=pltpu.PrefetchScalarGridSpec(
            num_scalar_prefetch=0,
            grid=grid,
            in_specs=in_specs,
            out_specs=pl.BlockSpec((tb, C_PAD), lambda i: (i, 0)),
        ),
        compiler_params=pltpu.CompilerParams(
            dimension_semantics=("parallel",)),
        cost_estimate=pl.CostEstimate(flops=int(flops), transcendentals=0,
                                      bytes_accessed=int(bytes_accessed)),
    )(*args)

    return out[:B, :C]


def ref_forward(x, conv_ws, conv_bs, fc_w, fc_b):
    """Pure-JAX f32 reference mirroring the PyTorch module (eval mode)."""
    B, L, D = x.shape
    pooled = []
    for W, b in zip(conv_ws, conv_bs):
        k = W.shape[0]
        Lout = L - k + 1
        acc = jnp.zeros((B, Lout, W.shape[-1]), jnp.float32)
        for s in range(k):
            acc = acc + jnp.einsum('bld,df->blf', x[:, s:s + Lout, :], W[s])
        acc = jnp.maximum(acc + b[None, :, :], 0.0)
        pooled.append(jnp.max(acc, axis=1))
    feat = jnp.concatenate(pooled, axis=1)
    return feat @ fc_w + fc_b


if __name__ == "__main__":
    # Small shapes consistent with the module's forward (grid of 2 batch tiles).
    B, L, D = 16, 16, 32         # batch, seq_len, input_dim (embedding dim)
    NUM_FILTERS = 100
    NUM_CLASSES = 2

    key = jax.random.PRNGKey(0)
    kx, *kws = jax.random.split(key, 1 + 2 * len(FILTER_SIZES) + 2)

    x = jax.random.normal(kx, (B, L, D), dtype=jnp.float32)

    conv_ws, conv_bs = [], []
    for i, k in enumerate(FILTER_SIZES):
        # torch Conv2d weight (F, 1, k, D) -> stored here as (k, D, F)
        conv_ws.append(0.1 * jax.random.normal(kws[2 * i], (k, D, NUM_FILTERS),
                                               dtype=jnp.float32))
        conv_bs.append(0.1 * jax.random.normal(kws[2 * i + 1], (1, NUM_FILTERS),
                                               dtype=jnp.float32))

    fc_w = 0.1 * jax.random.normal(kws[-2],
                                   (len(FILTER_SIZES) * NUM_FILTERS, NUM_CLASSES),
                                   dtype=jnp.float32)
    fc_b = 0.1 * jax.random.normal(kws[-1], (1, NUM_CLASSES), dtype=jnp.float32)

    out = textcnn_forward(x, conv_ws, conv_bs, fc_w, fc_b, tb=8)
    out = jax.block_until_ready(out)

    ref = ref_forward(x, conv_ws, conv_bs, fc_w, fc_b)
    assert out.shape == (B, NUM_CLASSES), out.shape
    # bf16 MXU operands vs f32 reference -> loose-but-safe tolerance.
    assert jnp.allclose(out, ref, atol=1e-1, rtol=5e-2), (
        float(jnp.max(jnp.abs(out - ref))))

    print("KERNEL_OK")
</pallas_src>

<mosaic_0001>
module attributes {stable_mosaic.version = 11 : i64} {
  func.func @textcnn_kernel(%arg0: i32, %arg1: memref<8x16x32xf32, #tpu.memory_space<vmem>>, %arg2: memref<96x128xbf16, #tpu.memory_space<vmem>>, %arg3: memref<1x128xf32, #tpu.memory_space<vmem>>, %arg4: memref<128x128xbf16, #tpu.memory_space<vmem>>, %arg5: memref<128x128xbf16, #tpu.memory_space<vmem>>, %arg6: memref<1x128xf32, #tpu.memory_space<vmem>>, %arg7: memref<128x128xbf16, #tpu.memory_space<vmem>>, %arg8: memref<160x128xbf16, #tpu.memory_space<vmem>>, %arg9: memref<1x128xf32, #tpu.memory_space<vmem>>, %arg10: memref<128x128xbf16, #tpu.memory_space<vmem>>, %arg11: memref<1x128xf32, #tpu.memory_space<vmem>>, %arg12: memref<8x128xf32, #tpu.memory_space<vmem>>) attributes {dimension_semantics = [#tpu.dimension_semantics<parallel>], iteration_bounds = array<i64: 2>, scalar_prefetch = 0 : i64, scratch_operands = 0 : i64, tpu.core_type = #tpu.core_type<tc>, window_params = [{transform_indices = @transform_0, window_bounds = array<i64: 8, 16, 32>}, {pipeline_mode = #tpu.pipeline_mode<synchronous>, transform_indices = @transform_1, window_bounds = array<i64: 96, 128>}, {pipeline_mode = #tpu.pipeline_mode<synchronous>, transform_indices = @transform_2, window_bounds = array<i64: 1, 128>}, {pipeline_mode = #tpu.pipeline_mode<synchronous>, transform_indices = @transform_3, window_bounds = array<i64: 128, 128>}, {pipeline_mode = #tpu.pipeline_mode<synchronous>, transform_indices = @transform_4, window_bounds = array<i64: 128, 128>}, {pipeline_mode = #tpu.pipeline_mode<synchronous>, transform_indices = @transform_5, window_bounds = array<i64: 1, 128>}, {pipeline_mode = #tpu.pipeline_mode<synchronous>, transform_indices = @transform_6, window_bounds = array<i64: 128, 128>}, {pipeline_mode = #tpu.pipeline_mode<synchronous>, transform_indices = @transform_7, window_bounds = array<i64: 160, 128>}, {pipeline_mode = #tpu.pipeline_mode<synchronous>, transform_indices = @transform_8, window_bounds = array<i64: 1, 128>}, {pipeline_mode = #tpu.pipeline_mode<synchronous>, transform_indices = @transform_9, window_bounds = array<i64: 128, 128>}, {pipeline_mode = #tpu.pipeline_mode<synchronous>, transform_indices = @transform_10, window_bounds = array<i64: 1, 128>}, {transform_indices = @transform_11, window_bounds = array<i64: 8, 128>}]} {
    %c0 = arith.constant 0 : index
    %c0_0 = arith.constant 0 : index
    %c0_1 = arith.constant 0 : index
    %0 = vector.load %arg1[%c0, %c0_0, %c0_1] : memref<8x16x32xf32, #tpu.memory_space<vmem>>, vector<8x16x32xf32>
    %1 = arith.truncf %0 : vector<8x16x32xf32> to vector<8x16x32xbf16>
    %2 = vector.extract_strided_slice %1 {offsets = [0, 0, 0], sizes = [8, 14, 32], strides = [1, 1, 1]} : vector<8x16x32xbf16> to vector<8x14x32xbf16>
    %3 = vector.extract_strided_slice %1 {offsets = [0, 1, 0], sizes = [8, 14, 32], strides = [1, 1, 1]} : vector<8x16x32xbf16> to vector<8x14x32xbf16>
    %4 = vector.extract_strided_slice %1 {offsets = [0, 2, 0], sizes = [8, 14, 32], strides = [1, 1, 1]} : vector<8x16x32xbf16> to vector<8x14x32xbf16>
    %5 = tpu.concatenate %2, %3, %4 in 2 : vector<8x14x32xbf16>, vector<8x14x32xbf16>, vector<8x14x32xbf16> -> vector<8x14x96xbf16>
    %6 = vector.shape_cast %5 : vector<8x14x96xbf16> to vector<112x96xbf16>
    %c0_2 = arith.constant 0 : index
    %c0_3 = arith.constant 0 : index
    %7 = vector.load %arg2[%c0_2, %c0_3] : memref<96x128xbf16, #tpu.memory_space<vmem>>, vector<96x128xbf16>
    %cst = arith.constant dense<0.000000e+00> : vector<112x128xf32>
    %8 = tpu.matmul %6, %7, %cst {dimension_numbers = #tpu.dot_dimension_numbers<[1], [0], [0], [1], [0, 0, 1, 1], [], []>} : vector<112x96xbf16>, vector<96x128xbf16>, vector<112x128xf32> -> vector<112x128xf32>
    %9 = vector.shape_cast %8 : vector<112x128xf32> to vector<8x14x128xf32>
    %c0_4 = arith.constant 0 : index
    %c0_5 = arith.constant 0 : index
    %10 = vector.load %arg3[%c0_4, %c0_5] : memref<1x128xf32, #tpu.memory_space<vmem>>, vector<1x128xf32>
    %11 = vector.shape_cast %10 : vector<1x128xf32> to vector<1x1x128xf32>
    %12 = vector.broadcast %11 : vector<1x1x128xf32> to vector<8x14x128xf32>
    %13 = arith.addf %9, %12 : vector<8x14x128xf32>
    %cst_6 = arith.constant 0.000000e+00 : f32
    %14 = vector.broadcast %cst_6 : f32 to vector<8x14x128xf32>
    %15 = arith.maximumf %13, %14 : vector<8x14x128xf32>
    %cst_7 = arith.constant dense<0xFF800000> : vector<8x128xf32>
    %16 = vector.multi_reduction <maximumf>, %15, %cst_7 [1] : vector<8x14x128xf32> to vector<8x128xf32>
    %17 = arith.truncf %16 : vector<8x128xf32> to vector<8x128xbf16>
    %c0_8 = arith.constant 0 : index
    %c0_9 = arith.constant 0 : index
    %18 = vector.load %arg4[%c0_8, %c0_9] : memref<128x128xbf16, #tpu.memory_space<vmem>>, vector<128x128xbf16>
    %cst_10 = arith.constant dense<0.000000e+00> : vector<8x128xf32>
    %19 = tpu.matmul %17, %18, %cst_10 {dimension_numbers = #tpu.dot_dimension_numbers<[1], [0], [0], [1], [0, 0, 1, 1], [], []>} : vector<8x128xbf16>, vector<128x128xbf16>, vector<8x128xf32> -> vector<8x128xf32>
    %20 = vector.extract_strided_slice %1 {offsets = [0, 0, 0], sizes = [8, 13, 32], strides = [1, 1, 1]} : vector<8x16x32xbf16> to vector<8x13x32xbf16>
    %21 = vector.extract_strided_slice %1 {offsets = [0, 1, 0], sizes = [8, 13, 32], strides = [1, 1, 1]} : vector<8x16x32xbf16> to vector<8x13x32xbf16>
    %22 = vector.extract_strided_slice %1 {offsets = [0, 2, 0], sizes = [8, 13, 32], strides = [1, 1, 1]} : vector<8x16x32xbf16> to vector<8x13x32xbf16>
    %23 = vector.extract_strided_slice %1 {offsets = [0, 3, 0], sizes = [8, 13, 32], strides = [1, 1, 1]} : vector<8x16x32xbf16> to vector<8x13x32xbf16>
    %24 = tpu.concatenate %20, %21, %22, %23 in 2 : vector<8x13x32xbf16>, vector<8x13x32xbf16>, vector<8x13x32xbf16>, vector<8x13x32xbf16> -> vector<8x13x128xbf16>
    %25 = vector.shape_cast %24 : vector<8x13x128xbf16> to vector<104x128xbf16>
    %c0_11 = arith.constant 0 : index
    %c0_12 = arith.constant 0 : index
    %26 = vector.load %arg5[%c0_11, %c0_12] : memref<128x128xbf16, #tpu.memory_space<vmem>>, vector<128x128xbf16>
    %cst_13 = arith.constant dense<0.000000e+00> : vector<104x128xf32>
    %27 = tpu.matmul %25, %26, %cst_13 {dimension_numbers = #tpu.dot_dimension_numbers<[1], [0], [0], [1], [0, 0, 1, 1], [], []>} : vector<104x128xbf16>, vector<128x128xbf16>, vector<104x128xf32> -> vector<104x128xf32>
    %28 = vector.shape_cast %27 : vector<104x128xf32> to vector<8x13x128xf32>
    %c0_14 = arith.constant 0 : index
    %c0_15 = arith.constant 0 : index
    %29 = vector.load %arg6[%c0_14, %c0_15] : memref<1x128xf32, #tpu.memory_space<vmem>>, vector<1x128xf32>
    %30 = vector.shape_cast %29 : vector<1x128xf32> to vector<1x1x128xf32>
    %31 = vector.broadcast %30 : vector<1x1x128xf32> to vector<8x13x128xf32>
    %32 = arith.addf %28, %31 : vector<8x13x128xf32>
    %cst_16 = arith.constant 0.000000e+00 : f32
    %33 = vector.broadcast %cst_16 : f32 to vector<8x13x128xf32>
    %34 = arith.maximumf %32, %33 : vector<8x13x128xf32>
    %cst_17 = arith.constant dense<0xFF800000> : vector<8x128xf32>
    %35 = vector.multi_reduction <maximumf>, %34, %cst_17 [1] : vector<8x13x128xf32> to vector<8x128xf32>
    %36 = arith.truncf %35 : vector<8x128xf32> to vector<8x128xbf16>
    %c0_18 = arith.constant 0 : index
    %c0_19 = arith.constant 0 : index
    %37 = vector.load %arg7[%c0_18, %c0_19] : memref<128x128xbf16, #tpu.memory_space<vmem>>, vector<128x128xbf16>
    %cst_20 = arith.constant dense<0.000000e+00> : vector<8x128xf32>
    %38 = tpu.matmul %36, %37, %cst_20 {dimension_numbers = #tpu.dot_dimension_numbers<[1], [0], [0], [1], [0, 0, 1, 1], [], []>} : vector<8x128xbf16>, vector<128x128xbf16>, vector<8x128xf32> -> vector<8x128xf32>
    %39 = arith.addf %19, %38 : vector<8x128xf32>
    %40 = vector.extract_strided_slice %1 {offsets = [0, 0, 0], sizes = [8, 12, 32], strides = [1, 1, 1]} : vector<8x16x32xbf16> to vector<8x12x32xbf16>
    %41 = vector.extract_strided_slice %1 {offsets = [0, 1, 0], sizes = [8, 12, 32], strides = [1, 1, 1]} : vector<8x16x32xbf16> to vector<8x12x32xbf16>
    %42 = vector.extract_strided_slice %1 {offsets = [0, 2, 0], sizes = [8, 12, 32], strides = [1, 1, 1]} : vector<8x16x32xbf16> to vector<8x12x32xbf16>
    %43 = vector.extract_strided_slice %1 {offsets = [0, 3, 0], sizes = [8, 12, 32], strides = [1, 1, 1]} : vector<8x16x32xbf16> to vector<8x12x32xbf16>
    %44 = vector.extract_strided_slice %1 {offsets = [0, 4, 0], sizes = [8, 12, 32], strides = [1, 1, 1]} : vector<8x16x32xbf16> to vector<8x12x32xbf16>
    %45 = tpu.concatenate %40, %41, %42, %43, %44 in 2 : vector<8x12x32xbf16>, vector<8x12x32xbf16>, vector<8x12x32xbf16>, vector<8x12x32xbf16>, vector<8x12x32xbf16> -> vector<8x12x160xbf16>
    %46 = vector.shape_cast %45 : vector<8x12x160xbf16> to vector<96x160xbf16>
    %c0_21 = arith.constant 0 : index
    %c0_22 = arith.constant 0 : index
    %47 = vector.load %arg8[%c0_21, %c0_22] : memref<160x128xbf16, #tpu.memory_space<vmem>>, vector<160x128xbf16>
    %cst_23 = arith.constant dense<0.000000e+00> : vector<96x128xf32>
    %48 = tpu.matmul %46, %47, %cst_23 {dimension_numbers = #tpu.dot_dimension_numbers<[1], [0], [0], [1], [0, 0, 1, 1], [], []>} : vector<96x160xbf16>, vector<160x128xbf16>, vector<96x128xf32> -> vector<96x128xf32>
    %49 = vector.shape_cast %48 : vector<96x128xf32> to vector<8x12x128xf32>
    %c0_24 = arith.constant 0 : index
    %c0_25 = arith.constant 0 : index
    %50 = vector.load %arg9[%c0_24, %c0_25] : memref<1x128xf32, #tpu.memory_space<vmem>>, vector<1x128xf32>
    %51 = vector.shape_cast %50 : vector<1x128xf32> to vector<1x1x128xf32>
    %52 = vector.broadcast %51 : vector<1x1x128xf32> to vector<8x12x128xf32>
    %53 = arith.addf %49, %52 : vector<8x12x128xf32>
    %cst_26 = arith.constant 0.000000e+00 : f32
    %54 = vector.broadcast %cst_26 : f32 to vector<8x12x128xf32>
    %55 = arith.maximumf %53, %54 : vector<8x12x128xf32>
    %cst_27 = arith.constant dense<0xFF800000> : vector<8x128xf32>
    %56 = vector.multi_reduction <maximumf>, %55, %cst_27 [1] : vector<8x12x128xf32> to vector<8x128xf32>
    %57 = arith.truncf %56 : vector<8x128xf32> to vector<8x128xbf16>
    %c0_28 = arith.constant 0 : index
    %c0_29 = arith.constant 0 : index
    %58 = vector.load %arg10[%c0_28, %c0_29] : memref<128x128xbf16, #tpu.memory_space<vmem>>, vector<128x128xbf16>
    %cst_30 = arith.constant dense<0.000000e+00> : vector<8x128xf32>
    %59 = tpu.matmul %57, %58, %cst_30 {dimension_numbers = #tpu.dot_dimension_numbers<[1], [0], [0], [1], [0, 0, 1, 1], [], []>} : vector<8x128xbf16>, vector<128x128xbf16>, vector<8x128xf32> -> vector<8x128xf32>
    %60 = arith.addf %39, %59 : vector<8x128xf32>
    %c0_31 = arith.constant 0 : index
    %c0_32 = arith.constant 0 : index
    %61 = vector.load %arg11[%c0_31, %c0_32] : memref<1x128xf32, #tpu.memory_space<vmem>>, vector<1x128xf32>
    %62 = vector.broadcast %61 : vector<1x128xf32> to vector<8x128xf32>
    %63 = arith.addf %60, %62 : vector<8x128xf32>
    %c0_33 = arith.constant 0 : index
    %c0_34 = arith.constant 0 : index
    %64 = vector.load %arg12[%c0_33, %c0_34] : memref<8x128xf32, #tpu.memory_space<vmem>>, vector<8x128xf32>
    tpu.vector_store %arg12[%c0_33, %c0_34], %63 {strides = array<i32>} : memref<8x128xf32, #tpu.memory_space<vmem>>, vector<8x128xf32>,
    return
  }
  func.func @transform_0(%arg0: i32) -> (i32, i32, i32) {
    %c0_i32 = arith.constant 0 : i32
    %c0_i32_0 = arith.constant 0 : i32
    %c0_i32_1 = arith.constant 0 : i32
    return %arg0, %c0_i32, %c0_i32_0 : i32, i32, i32
  }
  func.func @transform_1(%arg0: i32) -> (i32, i32) {
    %c0_i32 = arith.constant 0 : i32
    %c0_i32_0 = arith.constant 0 : i32
    %c0_i32_1 = arith.constant 0 : i32
    return %c0_i32, %c0_i32_0 : i32, i32
  }
  func.func @transform_2(%arg0: i32) -> (i32, i32) {
    %c0_i32 = arith.constant 0 : i32
    %c0_i32_0 = arith.constant 0 : i32
    %c0_i32_1 = arith.constant 0 : i32
    return %c0_i32, %c0_i32_0 : i32, i32
  }
  func.func @transform_3(%arg0: i32) -> (i32, i32) {
    %c0_i32 = arith.constant 0 : i32
    %c0_i32_0 = arith.constant 0 : i32
    %c0_i32_1 = arith.constant 0 : i32
    return %c0_i32, %c0_i32_0 : i32, i32
  }
  func.func @transform_4(%arg0: i32) -> (i32, i32) {
    %c0_i32 = arith.constant 0 : i32
    %c0_i32_0 = arith.constant 0 : i32
    %c0_i32_1 = arith.constant 0 : i32
    return %c0_i32, %c0_i32_0 : i32, i32
  }
  func.func @transform_5(%arg0: i32) -> (i32, i32) {
    %c0_i32 = arith.constant 0 : i32
    %c0_i32_0 = arith.constant 0 : i32
    %c0_i32_1 = arith.constant 0 : i32
    return %c0_i32, %c0_i32_0 : i32, i32
  }
  func.func @transform_6(%arg0: i32) -> (i32, i32) {
    %c0_i32 = arith.constant 0 : i32
    %c0_i32_0 = arith.constant 0 : i32
    %c0_i32_1 = arith.constant 0 : i32
    return %c0_i32, %c0_i32_0 : i32, i32
  }
  func.func @transform_7(%arg0: i32) -> (i32, i32) {
    %c0_i32 = arith.constant 0 : i32
    %c0_i32_0 = arith.constant 0 : i32
    %c0_i32_1 = arith.constant 0 : i32
    return %c0_i32, %c0_i32_0 : i32, i32
  }
  func.func @transform_8(%arg0: i32) -> (i32, i32) {
    %c0_i32 = arith.constant 0 : i32
    %c0_i32_0 = arith.constant 0 : i32
    %c0_i32_1 = arith.constant 0 : i32
    return %c0_i32, %c0_i32_0 : i32, i32
  }
  func.func @transform_9(%arg0: i32) -> (i32, i32) {
    %c0_i32 = arith.constant 0 : i32
    %c0_i32_0 = arith.constant 0 : i32
    %c0_i32_1 = arith.constant 0 : i32
    return %c0_i32, %c0_i32_0 : i32, i32
  }
  func.func @transform_10(%arg0: i32) -> (i32, i32) {
    %c0_i32 = arith.constant 0 : i32
    %c0_i32_0 = arith.constant 0 : i32
    %c0_i32_1 = arith.constant 0 : i32
    return %c0_i32, %c0_i32_0 : i32, i32
  }
  func.func @transform_11(%arg0: i32) -> (i32, i32) {
    %c0_i32 = arith.constant 0 : i32
    %c0_i32_0 = arith.constant 0 : i32
    return %arg0, %c0_i32 : i32, i32
  }
}

</mosaic_0001>

<bundles_post_ra>
// kernel: tpu_custom_call.1
= control target key start
LH: loop header
LB: loop body
LE: loop exit
PB: predicated region body
PF: predicated region fallthrough
CT: control target
= control target key end

     0   :  { %s9491_s0 = inlined_call_operand.hbm [shape: f32[16,16,32], index: 0, kind: input, shape index: {}]   ;;  %s9492_s1 = inlined_call_operand.hbm [shape: bf16[96,128], index: 1, kind: input, shape index: {}]   ;;  %s9493_s2 = inlined_call_operand.vmem [shape: f32[1,128], index: 2, kind: input, shape index: {}]   ;;  %s9494_s3 = inlined_call_operand.hbm [shape: bf16[128,128], index: 3, kind: input, shape index: {}]   ;;  %s9495_s4 = inlined_call_operand.hbm [shape: bf16[128,128], index: 4, kind: input, shape index: {}]   ;;  %s9496_s5 = inlined_call_operand.vmem [shape: f32[1,128], index: 5, kind: input, shape index: {}]   ;;  %s9497_s6 = inlined_call_operand.hbm [shape: bf16[128,128], index: 6, kind: input, shape index: {}]   ;;  %s9498_s7 = inlined_call_operand.hbm [shape: bf16[160,128], index: 7, kind: input, shape index: {}]   ;;  %s9499_s8 = inlined_call_operand.vmem [shape: f32[1,128], index: 8, kind: input, shape index: {}]   ;;  %s9500_s9 = inlined_call_operand.hbm [shape: bf16[128,128], index: 9, kind: input, shape index: {}]   ;;  %s9501_s10 = inlined_call_operand.vmem [shape: f32[1,128], index: 10, kind: input, shape index: {}]   ;;  %s9502_s11 = inlined_call_operand.hbm [shape: f32[16,128], index: 11, kind: output, shape index: {}]  }
   0x1   :  { %9556 = sst [smem:[#allocation35_spill]] %s9492_s1 }
   0x2   :  { %9557 = sst [smem:[#allocation36_spill]] %s9499_s8 }
   0x3   :  { %9558 = sst [smem:[#allocation37_spill]] %s9501_s10 }
   0x4   :  { %9559 = sst [smem:[#allocation38_spill]] %s9502_s11 }
   0x5   :  { %16 = vsyncpa [#allocation3], 0 }
   0x6   :  { %18 = vsyncpa [#allocation3 + $0x1], 0 }
   0x7   :  { %19 = vsyncpa [#allocation6], 0 }
   0x8   :  { %20 = vsyncpa [#allocation9], 0 }
   0x9   :  { %21 = vsyncpa [#allocation12], 0 }
   0xa   :  { %22 = vsyncpa [#allocation4], 0 }
   0xb   :  { %24 = vsyncpa [#allocation4 + $0x1], 0  ;;  %s7453_s17 = smov 0   ;;  %s7455_s18 = smov 0  }
   0xc   :  { %s7457_s19 = smov 0   ;;  %s7459_s20 = smov 0  }
   0xd LB: > { %s7373_s21 = smov [#allocation5]   ;;  %s7474_s23 = sadd.s32 4294967295, %s7371_s20   ;;  %s7371_s20 = sphi %s7459_s20, %s9681_s20   ;;  %s7367_s19 = sphi %s7457_s19, %s9680_s19   ;;  %s7363_s18 = sphi %s7455_s18, %s9679_s18   ;;  %s7359_s17 = sphi %s7453_s17, %s9678_s17  }
   0xe   : > { %s309_s22 = sshll.u32 %s7373_s21, 4  ;;  %p6591_p0 = scmp.ge.s32.totalorder %s7371_s20, 1  ;;  %s7479_s22 = int_to_ptr.vmem [resolvable:$true] %s309_s22 }
   0xf   : > { %p9504_p1 = scmp.eq.s32.totalorder %s7474_s23, 0  ;;  %p297_p2 = scmp.lt.s32.totalorder %s7371_s20, 3 }
  0x10   : > { %s7374_s25 = smov [#allocation8]   ;;  %s7375_s28 = smov [#allocation11]  }
  0x11   : > { %p7481_p3 = pnand %p6591_p0, %p297_p2  ;;  %s338_s26 = sshll.u32 %s7374_s25, 4  ;;  %s7494_s26 = int_to_ptr.vmem [resolvable:$true] %s338_s26 }
  0x12   : > { %s367_s29 = sshll.u32 %s7375_s28, 4  ;;  %s9562_s1 = sld [smem:[#allocation35_spill]]  ;;  %s7496_s29 = int_to_ptr.vmem [resolvable:$true] %s367_s29 }
  0x13   : > { %s9560_s24 = scalar_select %p7481_p3, 1, 0 }
  0x14   : > { %p6956_p5 = pneg %p7481_p3 }
  0x16   : > { %p7490_p6 = pnand %p6956_p5, %p9504_p1 }
  0x18   : > { %s7095_s13 = scalar_lea.hbm %s9562_s1, 768  ;;  %p7506_p8 = pneg %p7490_p6 }
  0x19   : > { %p7096_p7 = scmp.ne.s32.totalorder %s9562_s1, %s7095_s13  ;;  %p7102_p11 = scmp.lt.u32.totalorder %s7095_s13, %s9562_s1 }
  0x1b   : > { %p7098_p9 = pnand %p7506_p8, %p7096_p7 }
  0x1d   : > { %p7099_p10 = pneg %p7098_p9 }
  0x1f   : > { %p7104_p12 = pnand %p7102_p11, %p7099_p10 }
  0x21   : > { %7107 = shalt.err (!%p7104_p12)
}
  0x22   : > { %s7108_s28 = scalar_lea.vmem %s7479_s22, 768  ;;  %p7116_p5 = scmp.lt.s32.totalorder %s7479_s22, %s7479_s22 }
  0x23   : > { %p7109_p13 = scmp.ne.s32.totalorder %s7479_s22, %s7108_s28  ;;  %p7117_p4 = scmp.lt.s32.totalorder %s7108_s28, %s7108_s28 }
  0x25   : > { %p7111_p0 = pnand %p7109_p13, %p7506_p8  ;;  %p7118_p7 = por %p7117_p4, %p7116_p5 }
  0x27   : > { %p7112_p2 = pneg %p7111_p0 }
  0x29   : > { %p7119_p9 = pnand %p7118_p7, %p7112_p2 }
  0x2b   : > { %7122 = shalt.err (!%p7119_p9)
}
  0x2c   : > { %s7376_s30 = smov 64   ;;  %s7377_s12 = smov 4  }
  0x2d   : > { %6959 = dma.hbm_to_vmem [thread:$0]  (!%p7490_p6), %s9562_s1, 768, %s7479_s22, [#allocation6], %s7376_s30, %s7376_s30, %s7377_s12  }
  0x2e   : > { %s7123_s25 = scalar_lea.hbm %s9495_s4, 1024 }
  0x2f   : > { %p7124_p4 = scmp.ne.s32.totalorder %s9495_s4, %s7123_s25  ;;  %p7130_p12 = scmp.lt.u32.totalorder %s7123_s25, %s9495_s4 }
  0x31   : > { %p7126_p10 = pnand %p7124_p4, %p7506_p8 }
  0x33   : > { %p7127_p11 = pneg %p7126_p10 }
  0x35   : > { %p7132_p13 = pnand %p7130_p12, %p7127_p11 }
  0x37   : > { %7135 = shalt.err (!%p7132_p13)
}
  0x38   : > { %s7136_s22 = scalar_lea.vmem %s7494_s26, 1024  ;;  %p7144_p7 = scmp.lt.s32.totalorder %s7494_s26, %s7494_s26 }
  0x39   : > { %p7137_p0 = scmp.ne.s32.totalorder %s7494_s26, %s7136_s22  ;;  %p7145_p9 = scmp.lt.s32.totalorder %s7136_s22, %s7136_s22 }
  0x3b   : > { %p7139_p2 = pnand %p7137_p0, %p7506_p8  ;;  %p7146_p4 = por %p7145_p9, %p7144_p7 }
  0x3d   : > { %p7140_p5 = pneg %p7139_p2 }
  0x3f   : > { %p7147_p10 = pnand %p7146_p4, %p7140_p5 }
  0x41   : > { %7150 = shalt.err (!%p7147_p10)
}
  0x42   : > { %6965 = dma.hbm_to_vmem [thread:$0]  (!%p7490_p6), %s9495_s4, 1024, %s7494_s26, [#allocation9], %s7376_s30, %s7376_s30, %s7377_s12  }
  0x43   : > { %s7151_s14 = scalar_lea.hbm %s9498_s7, 1280 }
  0x44   : > { %p7152_p11 = scmp.ne.s32.totalorder %s9498_s7, %s7151_s14  ;;  %p7158_p0 = scmp.lt.u32.totalorder %s7151_s14, %s9498_s7 }
  0x46   : > { %p7154_p12 = pnand %p7152_p11, %p7506_p8 }
  0x48   : > { %p7155_p13 = pneg %p7154_p12 }
  0x4a   : > { %p7160_p2 = pnand %p7158_p0, %p7155_p13 }
  0x4c   : > { %7163 = shalt.err (!%p7160_p2)
}
  0x4d   : > { %s7164_s26 = scalar_lea.vmem %s7496_s29, 1280  ;;  %p7172_p4 = scmp.lt.s32.totalorder %s7496_s29, %s7496_s29 }
  0x4e   : > { %p7165_p5 = scmp.ne.s32.totalorder %s7496_s29, %s7164_s26  ;;  %p7173_p10 = scmp.lt.s32.totalorder %s7164_s26, %s7164_s26 }
  0x50   : > { %p7167_p7 = pnand %p7165_p5, %p7506_p8  ;;  %p7174_p11 = por %p7173_p10, %p7172_p4 }
  0x52   : > { %p7168_p9 = pneg %p7167_p7 }
  0x54   : > { %p7175_p12 = pnand %p7174_p11, %p7168_p9 }
  0x56   : > { %7178 = shalt.err (!%p7175_p12)
}
  0x57   : > { %6971 = dma.hbm_to_vmem [thread:$0]  (!%p7490_p6), %s9498_s7, 1280, %s7496_s29, [#allocation12], %s7376_s30, %s7376_s30, %s7377_s12  }
  0x58   : > { %s7378_s10 = smov [#allocation7]   ;;  %s7379_s13 = smov [#allocation10]  }
  0x59   : > { %s325_s11 = sshll.u32 %s7378_s10, 4  ;;  %s354_s14 = sshll.u32 %s7379_s13, 4  ;;  %s326_s11 = int_to_ptr.vmem [resolvable:$true] %s325_s11  ;;  %s355_s14 = int_to_ptr.vmem [resolvable:$true] %s354_s14 }
  0x5a   : > { %s7179_s25 = scalar_lea.hbm %s9494_s3, 1024 }
  0x5b   : > { %p7180_p13 = scmp.ne.s32.totalorder %s9494_s3, %s7179_s25  ;;  %p7186_p5 = scmp.lt.u32.totalorder %s7179_s25, %s9494_s3 }
  0x5d   : > { %p7182_p0 = pnand %p7180_p13, %p7506_p8 }
  0x5f   : > { %p7183_p2 = pneg %p7182_p0 }
  0x61   : > { %p7188_p7 = pnand %p7186_p5, %p7183_p2 }
  0x63   : > { %7191 = shalt.err (!%p7188_p7)
}
  0x64   : > { %s7192_s29 = scalar_lea.vmem %s326_s11, 1024  ;;  %p7200_p11 = scmp.lt.s32.totalorder %s326_s11, %s326_s11 }
  0x65   : > { %p7193_p9 = scmp.ne.s32.totalorder %s326_s11, %s7192_s29  ;;  %p7201_p12 = scmp.lt.s32.totalorder %s7192_s29, %s7192_s29 }
  0x67   : > { %p7195_p4 = pnand %p7193_p9, %p7506_p8  ;;  %p7202_p1 = por %p7201_p12, %p7200_p11 }
  0x69   : > { %p7196_p10 = pneg %p7195_p4 }
  0x6b   : > { %p7203_p3 = pnand %p7202_p1, %p7196_p10 }
  0x6d   : > { %7206 = shalt.err (!%p7203_p3)
}
  0x6e   : > { %6962 = dma.hbm_to_vmem [thread:$0]  (!%p7490_p6), %s9494_s3, 1024, %s326_s11, [#allocation6], %s7376_s30, %s7376_s30, %s7377_s12  }
  0x6f   : > { %s7207_s15 = scalar_lea.hbm %s9497_s6, 1024 }
  0x70   : > { %p7208_p1 = scmp.ne.s32.totalorder %s9497_s6, %s7207_s15  ;;  %p7214_p0 = scmp.lt.u32.totalorder %s7207_s15, %s9497_s6 }
  0x72   : > { %p7210_p3 = pnand %p7208_p1, %p7506_p8 }
  0x74   : > { %p7211_p13 = pneg %p7210_p3 }
  0x76   : > { %p7216_p2 = pnand %p7214_p0, %p7211_p13 }
  0x78   : > { %7219 = shalt.err (!%p7216_p2)
}
  0x79   : > { %s7220_s22 = scalar_lea.vmem %s355_s14, 1024  ;;  %p7228_p4 = scmp.lt.s32.totalorder %s355_s14, %s355_s14 }
  0x7a   : > { %p7221_p5 = scmp.ne.s32.totalorder %s355_s14, %s7220_s22  ;;  %p7229_p10 = scmp.lt.s32.totalorder %s7220_s22, %s7220_s22 }
  0x7c   : > { %p7223_p7 = pnand %p7221_p5, %p7506_p8  ;;  %p7230_p11 = por %p7229_p10, %p7228_p4 }
  0x7e   : > { %p7224_p9 = pneg %p7223_p7 }
  0x80   : > { %p7231_p12 = pnand %p7230_p11, %p7224_p9 }
  0x82   : > { %7234 = shalt.err (!%p7231_p12)
}
  0x83   : > { %6968 = dma.hbm_to_vmem [thread:$0]  (!%p7490_p6), %s9497_s6, 1024, %s355_s14, [#allocation9], %s7376_s30, %s7376_s30, %s7377_s12  }
  0x84   : > { %s7380_s1 = smov [#allocation13]   ;;  %s7235_s15 = scalar_lea.hbm %s9500_s9, 1024 }
  0x85   : > { %s383_s8 = sshll.u32 %s7380_s1, 4  ;;  %p7236_p1 = scmp.ne.s32.totalorder %s9500_s9, %s7235_s15  ;;  %s384_s8 = int_to_ptr.vmem [resolvable:$true] %s383_s8 }
  0x86   : > { %p7242_p0 = scmp.lt.u32.totalorder %s7235_s15, %s9500_s9 }
  0x87   : > { %p7238_p3 = pnand %p7236_p1, %p7506_p8 }
  0x89   : > { %p7239_p13 = pneg %p7238_p3 }
  0x8b   : > { %p7244_p2 = pnand %p7242_p0, %p7239_p13 }
  0x8d   : > { %7247 = shalt.err (!%p7244_p2)
}
  0x8e   : > { %s7248_s14 = scalar_lea.vmem %s384_s8, 1024  ;;  %p7256_p4 = scmp.lt.s32.totalorder %s384_s8, %s384_s8 }
  0x8f   : > { %p7249_p5 = scmp.ne.s32.totalorder %s384_s8, %s7248_s14  ;;  %p7257_p10 = scmp.lt.s32.totalorder %s7248_s14, %s7248_s14 }
  0x91   : > { %p7251_p7 = pnand %p7249_p5, %p7506_p8  ;;  %p7258_p11 = por %p7257_p10, %p7256_p4 }
  0x93   : > { %p7252_p9 = pneg %p7251_p7 }
  0x95   : > { %p7259_p12 = pnand %p7258_p11, %p7252_p9 }
  0x97   : > { %7262 = shalt.err (!%p7259_p12)
}
  0x98   : > { %6974 = dma.hbm_to_vmem [thread:$0]  (!%p7490_p6), %s9500_s9, 1024, %s384_s8, [#allocation12], %s7376_s30, %s7376_s30, %s7377_s12  }
  0x99   : > { %s6590_s27 = sadd.s32 4294967294, %s7371_s20   ;;  %s7647_s16 = sadd.s32 1, %s7371_s20  }
  0x9a   : > { %s34_s29 = ssub.s32 %s7371_s20, %s7647_s16  ;;  %s37_s1 = sadd.s32 1, %s7367_s19 }
  0x9b   : > { %p35_p8 = scmp.eq.s32.totalorder %s34_s29, 0  ;;  %p44_p1 = scmp.ne.s32.totalorder %s7367_s19, %s7363_s18 }
  0x9c   : > { %p45_p3 = scmp.eq.s32.totalorder %s7371_s20, 0  ;;  %p50_p13 = scmp.ne.s32.totalorder %s7363_s18, %s7359_s17 }
  0x9d   : > { %s7658_s10 = scalar_select %p35_p8, %s7367_s19, %s37_s1  }
  0x9e   : > { %p7660_p0 = por %p45_p3, %p44_p1  ;;  %p9565_p2 = scmp.eq.s32.totalorder %s7474_s23, 0 }
  0x9f   : > { %p284_p5 = scmp.eq.s32.totalorder %s7474_s23, 1  ;;  %p290_p7 = scmp.eq.s32.totalorder %s6590_s27, 1 }
  0xa0   : > { %p7666_p6 = por %p9565_p2, %p50_p13  ;;  %p6989_p9 = scmp.lt.s32.totalorder %s7371_s20, 2 }
  0xa1   : > { %s400_s12 = sand.u32 1, %s7367_s19   ;;  %p7673_p4 = por %p284_p5, %p44_p1 }
  0xa2   : > { %p7677_p10 = por %p290_p7, %p50_p13  ;;  %s6599_s21 = sshll.u32 %s400_s12, 7 }
  0xa3   : > { %s9567_s8 = scalar_select %p7673_p4, 1, 0 }
  0xa4   : > { %s9568_s15 = scalar_select %p7677_p10, 1, 0 }
  0xa5   : > { %s6716_s25 = sshll.u32 %s7371_s20, 11  ;;  %s404_s22 = scalar_lea.vmem [#allocation2], %s6599_s21 }
  0xa6   : > { %s7685_s14 = scalar_lea.hbm %s9491_s0, %s6716_s25  ;;  %s412_s11 = sshll.u32 %s404_s22, 4  ;;  %s7687_s11 = int_to_ptr.vmem [resolvable:$true] %s412_s11 }
  0xa7   : > { %p7691_p11 = pnand %p6989_p9, %p7660_p0  ;;  %s7695_s29 = scalar_lea.sflag [#allocation3], %s400_s12 }
  0xa8   : > { %s7263_s1 = scalar_lea.hbm %s7685_s14, 2048  ;;  %s7268_s13 = scalar_lea.hbm %s9491_s0, 4096 }
  0xa9   : > { %p7264_p12 = scmp.ne.s32.totalorder %s7685_s14, %s7263_s1  ;;  %p7265_p8 = pneg %p7691_p11 }
  0xaa   : > { %p7269_p13 = scmp.lt.u32.totalorder %s7685_s14, %s9491_s0  ;;  %p7270_p0 = scmp.lt.u32.totalorder %s7268_s13, %s7263_s1 }
  0xab   : > { %p7266_p1 = pnand %p7265_p8, %p7264_p12  ;;  %p7272_p5 = scmp.lt.u32.totalorder %s7263_s1, %s7685_s14 }
  0xac   : > { %p7271_p2 = por %p7270_p0, %p7269_p13 }
  0xad   : > { %p7267_p3 = pneg %p7266_p1 }
  0xae   : > { %p7273_p7 = por %p7272_p5, %p7271_p2 }
  0xb0   : > { %p7274_p9 = pnand %p7273_p7, %p7267_p3 }
  0xb2   : > { %7277 = shalt.err (!%p7274_p9)
}
  0xb3   : > { %s7278_s12 = scalar_lea.vmem %s7687_s11, 2048  ;;  %s7381_s22 = smov [#allocation2]  }
  0xb4   : > { %p7279_p12 = scmp.ne.s32.totalorder %s7687_s11, %s7278_s12  ;;  %s7283_s21 = sshll.u32 %s7381_s22, 4  ;;  %s7284_s21 = int_to_ptr.vmem [resolvable:$false] %s7283_s21 }
  0xb5   : > { %s7285_s25 = scalar_lea.vmem %s7284_s21, 4096  ;;  %p7286_p4 = scmp.lt.s32.totalorder %s7687_s11, %s7284_s21 }
  0xb6   : > { %p7281_p1 = pnand %p7279_p12, %p7265_p8  ;;  %p7287_p13 = scmp.lt.s32.totalorder %s7285_s25, %s7278_s12 }
  0xb8   : > { %p7282_p10 = pneg %p7281_p1  ;;  %p7288_p0 = por %p7287_p13, %p7286_p4 }
  0xba   : > { %p7289_p2 = pnand %p7288_p0, %p7282_p10 }
  0xbc   : > { %7292 = shalt.err (!%p7289_p2)
}
  0xbd   : > { %s7382_s1 = smov 128   ;;  %s7383_s13 = smov 8  }
  0xbe   : > { %6978 = dma.hbm_to_vmem [thread:$0]  (!%p7691_p11), %s7685_s14, 2048, %s7687_s11, %s7695_s29, %s7382_s1, %s7382_s1, %s7383_s13  }
  0xbf   : > { %p9570_p8 = scmp.ne.s32.totalorder %s9560_s24, 0 }
  0xc1   : > { %424 = sbr.rel (%p9570_p8) target bundleno = 1413 (0x585), region = 64 }
  0xc8   : > { %s7726_s28 = sand.u32 1, %s7363_s18  }
  0xc9   : > { %s6604_s26 = sshll.u32 %s7726_s28, 7  ;;  %s427_s12 = scalar_lea.sflag [#allocation3], %s7726_s28 }
  0xca   : > { %s7730_s22 = scalar_lea.vmem [#allocation2], %s6604_s26 }
  0xcb   : > { %7338 = dma.done.wait (%p7666_p6), %s427_s12, 2048  }
  0xcc   : > { %7340 = vsyncadd (%p7666_p6), %s427_s12, 4294965248  ;;  %p9571_p4 = scmp.eq.s32.totalorder %s7474_s23, 0 }
  0xce   : > { %7342 = dma.done.wait (%p9571_p4), [#allocation6], 1792   ;;  %p9572_p10 = pmov %p9571_p4 }
  0xcf   : > { %p9573_p11 = pmov %p9571_p4 }
  0xd0   : > { %7344 = vsyncadd (%p9572_p10), [#allocation6], 4294965504 }
  0xd1   : > { %7346 = dma.done.wait (%p9573_p11), [#allocation9], 2048   ;;  %p9574_p3 = pmov %p9571_p4 }
  0xd3   : > { %7348 = vsyncadd (%p9574_p3), [#allocation9], 4294965248  ;;  %p9575_p5 = pmov %p9574_p3 }
  0xd4   : > { %p9576_p7 = pmov %p9574_p3 }
  0xd5   : > { %7350 = dma.done.wait (%p9575_p5), [#allocation12], 2304  }
  0xd6   : > { %7352 = vsyncadd (%p9576_p7), [#allocation12], 4294964992  ;;  %v9508_v0 = vmov 0.0   ;;  %v503_v1 = vld [vmem:[%s7730_s22 + $0x40] sm:$0xff]  ;;  %v504_v2 = vld [vmem:[%s7730_s22 + $0x48] sm:$0xff]  ;;  %s7385_s24 = smov 64  }
  0xd7   : > { %6916 = vmatprep.subr.bf16.mxu1 %v9508_v0  ;;  %6772 = vmatprep.subr.bf16.mxu0 %v9508_v0  ;;  %v505_v3 = vld [vmem:[%s7730_s22 + $0x50] sm:$0xff]  ;;  %v7753_v4 = vpack.c.bf16 %v504_v2, %v503_v1  ;;  %v506_v5 = vld [vmem:[%s7730_s22 + $0x58] sm:$0xff]  ;;  %v507_v6 = vld [vmem:[%s7730_s22 + $0x60] sm:$0xff]  ;;  %s7386_s30 = smov 32   ;;  %vm7387_vm0 = vmmov 0   ;;  %s7388_s14 = smov 96  }
  0xd8   : > { %v508_v7 = vld [vmem:[%s7730_s22 + $0x68] sm:$0xff]  ;;  %v7758_v8 = vpack.c.bf16 %v506_v5, %v505_v3  ;;  %v509_v10 = vld [vmem:[%s7730_s22 + $0x70] sm:$0xff]  ;;  %v510_v11 = vld [vmem:[%s7730_s22 + $0x78] sm:$0xff]  ;;  %6800 = vmatprep.mubr.msk.bf16.mxu1 %vm7387_vm0, %v9508_v0  ;;  %6784 = vmatprep.mubr.msk.bf16.mxu0 %vm7387_vm0, %v9508_v0  ;;  %vm623_vm1 = vcmask 261120   ;;  %vm640_vm2 = vcmask 523264   ;;  %vm1440_vm3 = vcmask 785408  }
  0xd9   : > { %9577 = vst [vmem:[#allocation20_spill] sm:$0xff] %v7753_v4  ;;  %v7760_v9 = vpack.c.bf16 %v508_v7, %v507_v6  ;;  %v603_v12 = vrot.slane %v7753_v4, 1  ;;  %v548_v13 = vshrl.u32 %v7753_v4, 16  ;;  %v550_v14 = vshll.u32 %v7753_v4, 16  ;;  %v495_v17 = vld [vmem:[%s7730_s22] sm:$0xff]  ;;  %v496_v18 = vld [vmem:[%s7730_s22 + $0x8] sm:$0xff] }
  0xda   : > { %9578 = vst [vmem:[#allocation21_spill] sm:$0xff] %v7758_v8  ;;  %v557_v15 = vshll.u32 %v7758_v8, 16  ;;  %v7768_v16 = vpack.c.bf16 %v510_v11, %v509_v10  ;;  %v604_v19 = vrot.slane %v7758_v8, 1  ;;  %v555_v21 = vshrl.u32 %v7758_v8, 16  ;;  %v497_v22 = vld [vmem:[%s7730_s22 + $0x10] sm:$0xff]  ;;  %v498_v23 = vld [vmem:[%s7730_s22 + $0x18] sm:$0xff] }
  0xdb   : > { %615 = vrot.lane.b32.xlu1 %v603_v12, %s7385_s24  ;;  %v552_v20 = vrot.slane %v550_v14, 1  ;;  %v564_v25 = vshll.u32 %v7760_v9, 16  ;;  %v499_v26 = vld [vmem:[%s7730_s22 + $0x20] sm:$0xff]  ;;  %v500_v27 = vld [vmem:[%s7730_s22 + $0x28] sm:$0xff]  ;;  %v7784_v29 = vpack.c.bf16 %v496_v18, %v495_v17  ;;  %v7787_v32 = vpack.c.bf16 %v498_v23, %v497_v22  ;;  %v501_v33 = vld [vmem:[%s7730_s22 + $0x30] sm:$0xff]  ;;  %s9672_s13 = sld [smem:[#allocation36_spill]] }
  0xdc   : > { %v559_v24 = vrot.slane %v557_v15, 1  ;;  %v7047_v30 = vld [vmem:[#allocation5] sm:$0xff]   ;;  %v571_v31 = vshll.u32 %v7768_v16, 16  ;;  %v502_v34 = vld [vmem:[%s7730_s22 + $0x38] sm:$0xff]  ;;  %v605_v35 = vrot.slane %v7760_v9, 1  ;;  %v562_v37 = vshrl.u32 %v7760_v9, 16 }
  0xdd   : > { %v553_v28 = vor.u32 %v552_v20, %v548_v13  ;;  %9579 = vst [vmem:[#allocation22_spill] sm:$0xff] %v7787_v32  ;;  %v566_v38 = vrot.slane %v564_v25, 1  ;;  %v7799_v39 = vpack.c.bf16 %v500_v27, %v499_v26  ;;  %6922 = vmatpush3.bf16.msra.mxu1 %v7047_v30  ;;  %v7048_v40 = vld [vmem:[#allocation5 + $0x8] sm:$0xff]   ;;  %6773 = vmatpush3.bf16.msra.mxu0 %v7047_v30  ;;  %v7801_v41 = vrot.slane %v548_v13, 1  ;;  %v7049_v51 = vld [vmem:[#allocation5 + $0x10] sm:$0xff]   ;;  %v7050_v3 = vld [vmem:[#allocation5 + $0x18] sm:$0xff]  }
  0xde   : > { %v560_v36 = vor.u32 %v559_v24, %v555_v21  ;;  %v606_v42 = vrot.slane %v7768_v16, 1  ;;  %v520_v43 = vshrl.u32 %v7784_v29, 16  ;;  %v7805_v44 = vpack.c.bf16 %v502_v34, %v501_v33  ;;  %6917 = vmatprep.subr.bf16.mxu1 %v9508_v0  ;;  %6774 = vmatprep.subr.bf16.mxu0 %v9508_v0  ;;  %v7051_v17 = vld [vmem:[#allocation5 + $0x20] sm:$0xff]   ;;  %v7052_v23 = vld [vmem:[#allocation5 + $0x28] sm:$0xff]   ;;  %s6611_s26 = sshll.u32 %s7726_s28, 3  ;;  %s9674_s21 = sld [smem:[#allocation38_spill]] }
  0xdf   : > { %617 = vrot.lane.b32.xlu1 %v604_v19, %s7385_s24  ;;  %583 = vrot.lane.b32.xlu0 %v553_v28, %s7386_s30  ;;  %9580 = vst [vmem:[#allocation23_spill] sm:$0xff] %v7799_v39  ;;  %v569_v45 = vshrl.u32 %v7768_v16, 16  ;;  %v573_v46 = vrot.slane %v571_v31, 1  ;;  %v522_v47 = vshll.u32 %v7784_v29, 16  ;;  %v527_v48 = vshrl.u32 %v7787_v32, 16  ;;  %p9675_p9 = scmp.ne.s32.totalorder %s9567_s8, 0 }
  0xe0   : > { %9581 = vst [vmem:[#allocation24_spill] sm:$0xff] %v7805_v44  ;;  %v567_v49 = vor.u32 %v566_v38, %v562_v37  ;;  %v529_v50 = vshll.u32 %v7787_v32, 16  ;;  %v599_v52 = vrot.slane %v7784_v29, 1  ;;  %v601_v53 = vrot.slane %v7799_v39, 1 }
  0xe1   : > { %6923 = vmatpush3.bf16.msra.mxu1 %v7048_v40  ;;  %6775 = vmatpush3.bf16.msra.mxu0 %v7048_v40  ;;  %v2423_v54 = vrot.slane %v520_v43, 1  ;;  %v534_v55 = vshrl.u32 %v7799_v39, 16  ;;  %v536_v56 = vshll.u32 %v7799_v39, 16  ;;  %v541_v57 = vshrl.u32 %v7805_v44, 16 }
  0xe2   : > { %6918 = vmatprep.subr.bf16.mxu1 %v9508_v0  ;;  %6776 = vmatprep.subr.bf16.mxu0 %v9508_v0  ;;  %v2424_v58 = vrot.slane %v522_v47, 2  ;;  %v524_v59 = vrot.slane %v522_v47, 1  ;;  %v2426_v60 = vrot.slane %v527_v48, 1  ;;  %v543_v61 = vshll.u32 %v7805_v44, 16 }
  0xe3   : > { %619 = vrot.lane.b32.xlu1 %v605_v35, %s7385_s24  ;;  %585 = vrot.lane.b32.xlu0 %v560_v36, %s7386_s30  ;;  %v574_v62 = vor.u32 %v573_v46, %v569_v45  ;;  %v2427_v63 = vrot.slane %v529_v50, 2  ;;  %v531_v1 = vrot.slane %v529_v50, 1  ;;  %v600_v2 = vrot.slane %v7787_v32, 1 }
  0xe4   : > { %v2429_v5 = vrot.slane %v534_v55, 1  ;;  %v2430_v6 = vrot.slane %v536_v56, 2  ;;  %v538_v7 = vrot.slane %v536_v56, 1  ;;  %v2432_v10 = vrot.slane %v541_v57, 1 }
  0xe5   : > { %6924 = vmatpush3.bf16.msra.mxu1 %v7049_v51  ;;  %6777 = vmatpush3.bf16.msra.mxu0 %v7049_v51  ;;  %v2433_v11 = vrot.slane %v543_v61, 2  ;;  %v545_v12 = vrot.slane %v543_v61, 1  ;;  %v2438_v13 = vrot.slane %v555_v21, 1  ;;  %v2425_v18 = vor.u32 %v2424_v58, %v2423_v54 }
  0xe6   : > { %6919 = vmatprep.subr.bf16.mxu1 %v9508_v0  ;;  %6778 = vmatprep.subr.bf16.mxu0 %v9508_v0  ;;  %v525_v19 = vor.u32 %v524_v59, %v520_v43  ;;  %v2428_v20 = vor.u32 %v2427_v63, %v2426_v60  ;;  %v532_v21 = vor.u32 %v531_v1, %v527_v48  ;;  %v2439_v22 = vrot.slane %v557_v15, 2 }
  0xe7   : > { %621 = vrot.lane.b32.xlu1 %v606_v42, %s7385_s24  ;;  %587 = vrot.lane.b32.xlu0 %v567_v49, %s7386_s30  ;;  %v2431_v15 = vor.u32 %v2430_v6, %v2429_v5  ;;  %v539_v24 = vor.u32 %v538_v7, %v534_v55  ;;  %v602_v26 = vrot.slane %v7805_v44, 1  ;;  %v2444_v27 = vrot.slane %v569_v45, 1 }
  0xe8   : > { %v2434_v28 = vor.u32 %v2433_v11, %v2432_v10  ;;  %v546_v30 = vor.u32 %v545_v12, %v541_v57  ;;  %v2445_v33 = vrot.slane %v571_v31, 2  ;;  %v2436_v34 = vrot.slane %v550_v14, 2 }
  0xe9   : > { %6925 = vmatpush3.bf16.msra.mxu1 %v7050_v3  ;;  %6779 = vmatpush3.bf16.msra.mxu0 %v7050_v3  ;;  %v2441_v35 = vrot.slane %v562_v37, 1  ;;  %v2442_v36 = vrot.slane %v564_v25, 2  ;;  %v2440_v38 = vor.u32 %v2439_v22, %v2438_v13  ;;  %v7389_v37 = vmov 1966171168  }
  0xea   : > { %6920 = vmatprep.subr.bf16.mxu1 %v9508_v0  ;;  %6780 = vmatprep.subr.bf16.mxu0 %v9508_v0  ;;  %v2446_v40 = vor.u32 %v2445_v33, %v2444_v27  ;;  %v2437_v31 = vor.u32 %v2436_v34, %v7801_v41  ;;  %v667_v42 = vunpack.c.l.s4 %v7389_v37  ;;  %v669_v43 = vlaneseq }
  0xeb   : > { %589 = vrot.lane.b32.xlu0 %v574_v62, %s7386_s30  ;;  %607 = vrot.lane.b32.xlu1 %v599_v52, %s7385_s24  ;;  %v2443_v14 = vor.u32 %v2442_v36, %v2441_v35  ;;  %vm2334_vm4 = vcmask 1045504   ;;  %vm5458_vm5 = vcmask 1041409   ;;  %vm5353_vm6 = vcmask 1044480  }
  0xec   : > { %v668_v47 = vunpack.c.0.s8 %v667_v42  ;;  %v670_v48 = vshrl.u32 %v669_v43, 7  ;;  %v5675_v42 = vrot.slane %v7784_v29, 2  ;;  %vm5460_vm7 = vcmask 1042434  }
  0xed   : > { %6926 = vmatpush3.bf16.msra.mxu1 %v7051_v17  ;;  %6781 = vmatpush3.bf16.msra.mxu0 %v7051_v17  ;;  %v7390_v17 = vmov 1983009808   ;;  %vm5462_vm8 = vcmask 1043459   ;;  %vm5464_vm9 = vcmask 1044484   ;;  %vm5466_vm10 = vcmask 1045509  }
  0xee   : > { %6921 = vmatprep.subr.bf16.mxu1 %v9508_v0  ;;  %6782 = vmatprep.subr.bf16.mxu0 %v9508_v0  ;;  %v7885_v52 = vsub.s32 %v668_v47, %v670_v48  ;;  %vm5468_vm11 = vcmask 1046534   ;;  %vm5470_vm12 = vcmask 1047559   ;;  %vm6237_vm13 = vcmask 1043456  }
  0xef   : > { %2447 = vrot.lane.b32.xlu1 %v2425_v18, %s7388_s14  ;;  %575 = vrot.lane.b32.xlu0 %v525_v19, %s7386_s30  ;;  %v1567_v18 = vunpack.c.l.s4 %v7390_v17 }
  0xf1   : > { %6927 = vmatpush3.bf16.msra.mxu1 %v7052_v23  ;;  %6783 = vmatpush3.bf16.msra.mxu0 %v7052_v23 }
  0xf2   : > { %6812 = vmatprep.subr.bf16.mxu1 %v9508_v0  ;;  %6856 = vmatprep.subr.bf16.mxu0 %v9508_v0 }
  0xf3   : > { %2449 = vrot.lane.b32.xlu1 %v2428_v20, %s7388_s14  ;;  %577 = vrot.lane.b32.xlu0 %v532_v21, %s7386_s30 }
  0xf7   : > { %611 = vrot.lane.b32.xlu1 %v601_v53, %s7385_s24  ;;  %609 = vrot.lane.b32.xlu0 %v600_v2, %s7385_s24 }
  0xfb   : > { %2451 = vrot.lane.b32.xlu1 %v2431_v15, %s7388_s14  ;;  %579 = vrot.lane.b32.xlu0 %v539_v24, %s7386_s30 }
  0xff   : > { %2453 = vrot.lane.b32.xlu1 %v2434_v28, %s7388_s14  ;;  %581 = vrot.lane.b32.xlu0 %v546_v30, %s7386_s30  ;;  %v1568_v30 = vunpack.c.0.s8 %v1567_v18  ;;  %s6712_s30 = sshll.u32 %s7474_s23, 7  ;;  %s6450_s23 = scalar_lea.sflag [#allocation4], %s7726_s28 }
 0x100   : > { %s9447_s25 = scalar_lea.hbm %s9674_s21, %s6712_s30 }
 0x103   : > { %2457 = vrot.lane.b32.xlu1 %v2440_v38, %s7388_s14  ;;  %613 = vrot.lane.b32.xlu0 %v602_v26, %s7385_s24  ;;  %s9673_s24 = sld [smem:[#allocation37_spill]] }
 0x107   : > { %2461 = vrot.lane.b32.xlu1 %v2446_v40, %s7388_s14  ;;  %2455 = vrot.lane.b32.xlu0 %v2437_v31, %s7388_s14 }
 0x10b   : > { %2459 = vrot.lane.b32.xlu0 %v2443_v14, %s7388_s14  ;;  %s492_s14 = scalar_lea.vmem [#allocation14], %s6611_s26 }
 0x10c   : > { %s6463_s11 = sshll.u32 %s492_s14, 4  ;;  %s9449_s11 = int_to_ptr.vmem [resolvable:$true] %s6463_s11 }
 0x10d   : > { %s7293_s1 = scalar_lea.vmem %s9449_s11, 128 }
 0x10e   : > { %p7294_p6 = scmp.ne.s32.totalorder %s9449_s11, %s7293_s1 }
 0x110   : > { %p7295_p12 = pnand %p7294_p6, %p9675_p9 }
 0x112   : > { %p7296_p1 = pneg %p7295_p12 }
 0x14d   : > { %v616_v25 = vpop.permute.xlu1 %615 }
 0x151   : > { %v618_v45 = vpop.permute.xlu1 %617  ;;  %v584_v46 = vpop.permute.xlu0 %583 }
 0x152   : > { %v633_v41 = vsel %vm623_vm1, %v7753_v4, %v584_v46  ;;  %v7931_v46 = vsub.s32 %v1568_v30, %v670_v48 }
 0x153   : > { %v7888_v53 = vsel %vm640_vm2, %v633_v41, %v616_v25 }
 0x154   : > { %v857_v58 = vcombine.high %v7888_v53, %v7888_v53  ;;  %v864_v10 = vrot.slane %v7888_v53, %v7885_v52 }
 0x155   : > { %v620_v49 = vpop.permute.xlu1 %619  ;;  %v586_v50 = vpop.permute.xlu0 %585 }
 0x156   : > { %v635_v51 = vsel %vm623_vm1, %v7758_v8, %v586_v50  ;;  %v871_v60 = vrot.slane %v857_v58, %v7885_v52  ;;  %v872_v24 = vcombine.high %v864_v10, %v864_v10 }
 0x157   : > { %v7891_v54 = vsel %vm640_vm2, %v635_v51, %v618_v45  ;;  %v880_v45 = vrot.slane %v864_v10, %v7885_v52 }
 0x158   : > { %v912_v55 = vrot.slane %v7891_v54, %v7885_v52  ;;  %v905_v61 = vcombine.high %v7891_v54, %v7891_v54  ;;  %v873_v3 = vcombine.high %v871_v60, %v871_v60  ;;  %v887_v5 = vrot.slane %v871_v60, %v7885_v52 }
 0x159   : > { %v7895_v56 = vpop.permute.xlu1 %621  ;;  %v588_v57 = vpop.permute.xlu0 %587  ;;  %v894_v25 = vrot.slane %v872_v24, %v7885_v52 }
 0x15a   : > { %v920_v59 = vcombine.high %v912_v55, %v912_v55  ;;  %v637_v2 = vsel %vm623_vm1, %v7760_v9, %v588_v57  ;;  %v919_v6 = vrot.slane %v905_v61, %v7885_v52  ;;  %v928_v7 = vrot.slane %v912_v55, %v7885_v52 }
 0x15b   : > { %v7913_v12 = vsel %vm640_vm2, %v637_v2, %v620_v49  ;;  %v901_v20 = vrot.slane %v873_v3, %v7885_v52  ;;  %v903_v21 = vcombine.high %v887_v5, %v887_v5  ;;  %v1210_v60 = vcombine.low %v880_v45, %v894_v25 }
 0x15c   : > { %v942_v1 = vrot.slane %v920_v59, %v7885_v52  ;;  %v935_v22 = vrot.slane %v919_v6, %v7885_v52  ;;  %v950_v23 = vcombine.high %v928_v7, %v928_v7  ;;  %v953_v15 = vcombine.high %v7913_v12, %v7913_v12 }
 0x15d   : > { %v7902_v62 = vpop.permute.xlu0 %589  ;;  %v608_v63 = vpop.permute.xlu1 %607  ;;  %v960_v27 = vrot.slane %v7913_v12, %v7885_v52  ;;  %v1257_v33 = vcombine.low %v887_v5, %v901_v20  ;;  %v1258_v34 = vcombine.low %v903_v21, %v928_v7  ;;  %v921_v36 = vcombine.high %v919_v6, %v919_v6  ;;  %v7056_v6 = vld [vmem:[#allocation8 + $0x18] sm:$0xff]  }
 0x15e   : > { %v952_v11 = vcombine.high %v942_v1, %v942_v1  ;;  %v1259_v35 = vcombine.low %v942_v1, %v950_v23  ;;  %v967_v38 = vrot.slane %v953_v15, %v7885_v52  ;;  %v6614_v1 = vcombine.high %v880_v45, %v894_v25 }
 0x15f   : > { %v968_v37 = vcombine.high %v960_v27, %v960_v27  ;;  %v1274_v49 = vrot.slane %v1258_v34, %v7885_v52  ;;  %v1267_v51 = vrot.slane %v1257_v33, %v7885_v52  ;;  %v949_v57 = vrot.slane %v921_v36, %v7885_v52 }
 0x160   : > { %v1260_v26 = vcombine.low %v952_v11, %v935_v22  ;;  %v1281_v55 = vrot.slane %v1259_v35, %v7885_v52  ;;  %v969_v58 = vcombine.high %v967_v38, %v967_v38  ;;  %v976_v48 = vrot.slane %v960_v27, %v7885_v52 }
 0x161   : > { %v2448_v13 = vpop.permute.xlu1 %2447  ;;  %v576_v19 = vpop.permute.xlu0 %575  ;;  %v990_v61 = vrot.slane %v968_v37, %v7885_v52  ;;  %v9507_v5 = vrot.slane %v7758_v8, 2  ;;  %v1289_v17 = vcombine.low %v1267_v51, %v1274_v49  ;;  %v7949_v20 = vrot.slane %v967_v38, %v7885_v52  ;;  %v7053_v37 = vld [vmem:[#allocation8] sm:$0xff]  }
 0x162   : > { %v625_v28 = vsel %vm623_vm1, %v7784_v29, %v576_v19  ;;  %v1288_v43 = vrot.slane %v1260_v26, %v7885_v52  ;;  %v951_v29 = vcombine.high %v935_v22, %v935_v22  ;;  %v997_v21 = vrot.slane %v969_v58, %v7885_v52 }
 0x163   : > { %v642_v40 = vsel %vm640_vm2, %v625_v28, %v608_v63  ;;  %v7953_v23 = vrot.slane %v1210_v60, %v7885_v52  ;;  %v1307_v15 = vcombine.low %v976_v48, %v990_v61  ;;  %v6615_v27 = vcombine.high %v976_v48, %v990_v61 }
 0x164   : > { %v665_v50 = vcombine.high %v642_v40, %v642_v40  ;;  %v672_v59 = vrot.slane %v642_v40, %v7885_v52  ;;  %v1290_v63 = vcombine.low %v1281_v55, %v1288_v43  ;;  %v2464_v11 = vsel %vm1440_vm3, %v642_v40, %v2448_v13 }
 0x165   : > { %v7925_v31 = vpop.permute.xlu1 %2449  ;;  %v578_v14 = vpop.permute.xlu0 %577  ;;  %v1306_v19 = vcombine.low %v949_v57, %v951_v29  ;;  %v7958_v13 = vrot.slane %v6614_v1, %v7885_v52  ;;  %v2487_v28 = vcombine.high %v2464_v11, %v2464_v11  ;;  %v7965_v33 = vsel %vm623_vm1, %v7768_v16, %v7902_v62 }
 0x166   : > { %v679_v10 = vrot.slane %v665_v50, %v7885_v52  ;;  %v680_v22 = vcombine.high %v672_v59, %v672_v59  ;;  %v1304_v24 = vrot.slane %v1290_v63, %v7885_v52  ;;  %v627_v30 = vsel %vm623_vm1, %v7787_v32, %v578_v14 }
 0x167   : > { %v2494_v35 = vrot.slane %v2464_v11, %v7885_v52  ;;  %v1297_v36 = vrot.slane %v1289_v17, %v7885_v52  ;;  %v1309_v38 = vcombine.low %v7949_v20, %v997_v21  ;;  %v7971_v40 = vrot.slane %v672_v59, %v7885_v52 }
 0x168   : > { %v681_v34 = vcombine.high %v679_v10, %v679_v10  ;;  %v7974_v25 = vrot.slane %v680_v22, %v7885_v52  ;;  %v1316_v62 = vrot.slane %v1306_v19, %v7885_v52  ;;  %v1323_v45 = vrot.slane %v1307_v15, %v7885_v52 }
 0x169   : > { %v612_v2 = vpop.permute.xlu1 %611  ;;  %v610_v3 = vpop.permute.xlu0 %609  ;;  %v5683_v49 = vcombine.low %v2464_v11, %v5675_v42  ;;  %v1305_v51 = vcombine.low %v1297_v36, %v1304_v24  ;;  %v1330_v55 = vrot.slane %v6615_v27, %v7885_v52  ;;  %v7983_v57 = vrot.slane %v679_v10, %v7885_v52  ;;  %v7054_v10 = vld [vmem:[#allocation8 + $0x8] sm:$0xff]  }
 0x16a   : > { %v644_v50 = vsel %vm640_vm2, %v627_v30, %v610_v3  ;;  %v2501_v29 = vrot.slane %v2487_v28, %v7885_v52  ;;  %v7987_v59 = vrot.slane %v681_v34, %v7885_v52  ;;  %v2502_v60 = vcombine.high %v2494_v35, %v2494_v35 }
 0x16b   : > { %v713_v58 = vcombine.high %v644_v50, %v644_v50  ;;  %v7989_v48 = vcombine.high %v2464_v11, %v5675_v42  ;;  %6801 = vmatmul.mubr.msk.bf16.vlgmr.msra.gmra.mrb[0].mxu1 %vm1440_vm3, %v1305_v51  ;;  %v1061_v63 = vcombine.low %v7971_v40, %v7974_v25  ;;  %v720_v1 = vrot.slane %v644_v50, %v7885_v52 }
 0x16c   : > { %v7999_v3 = vsel %vm1440_vm3, %v644_v50, %v7925_v31  ;;  %6813 = vmatpush3.bf16.msra.mxu1 %v7053_v37  ;;  %v1337_v17 = vrot.slane %v1309_v38, %v7885_v52  ;;  %v6612_v42 = vcombine.high %v7971_v40, %v7974_v25  ;;  %v2503_v11 = vcombine.high %v2501_v29, %v2501_v29  ;;  %v7055_v25 = vld [vmem:[#allocation8 + $0x10] sm:$0xff]  }
 0x16d   : > { %v7976_v14 = vpop.permute.xlu1 %2451  ;;  %v580_v43 = vpop.permute.xlu0 %579  ;;  %9582 = vst [vmem:[#allocation25_spill] sm:$0xff] %v7989_v48  ;;  %9583 = vst [vmem:[#allocation26_spill] sm:$0xff] %v7999_v3  ;;  %v2510_v19 = vrot.slane %v2494_v35, %v7885_v52  ;;  %v8006_v21 = vrot.slane %v5683_v49, %v7931_v46  ;;  %6814 = vmatprep.subr.bf16.mxu1 %v9508_v0  ;;  %v8010_v22 = vrot.slane %v2501_v29, %v7885_v52 }
 0x16e   : > { %v629_v61 = vsel %vm623_vm1, %v7799_v39, %v580_v43  ;;  %v727_v31 = vrot.slane %v713_v58, %v7885_v52  ;;  %v728_v15 = vcombine.high %v720_v1, %v720_v1  ;;  %6804 = vmatprep.mubr.msk.bf16.mxu1 %vm7387_vm0, %v9508_v0  ;;  %v2524_v30 = vrot.slane %v2502_v60, %v7885_v52 }
 0x16f   : > { %9584 = vst [vmem:[#allocation27_spill] sm:$0xff] %v8006_v21  ;;  %v646_v24 = vsel %vm640_vm2, %v629_v61, %v612_v2  ;;  %v711_v34 = vcombine.high %v7983_v57, %v7983_v57  ;;  %v2542_v35 = vrot.slane %v7999_v3, %v7885_v52  ;;  %v8026_v36 = vrot.slane %v1061_v63, %v7885_v52 }
 0x170   : > { %v2535_v2 = vcombine.high %v7999_v3, %v7999_v3  ;;  %6815 = vmatpush3.bf16.msra.mxu1 %v7054_v10  ;;  %v1338_v38 = vcombine.low %v1316_v62, %v1323_v45  ;;  %v1339_v40 = vcombine.low %v1330_v55, %v1337_v17  ;;  %v8031_v37 = vrot.slane %v2503_v11, %v7885_v52 }
 0x171   : > { %v8016_v27 = vpop.permute.xlu1 %2453  ;;  %v736_v43 = vrot.slane %v720_v1, %v7885_v52  ;;  %v761_v49 = vcombine.high %v646_v24, %v646_v24  ;;  %v768_v50 = vrot.slane %v646_v24, %v7885_v52  ;;  %6816 = vmatprep.subr.bf16.mxu1 %v9508_v0  ;;  %v729_v51 = vcombine.high %v727_v31, %v727_v31  ;;  %v582_v47 = vpop.permute.xlu0 %581 }
 0x172   : > { %v750_v29 = vrot.slane %v728_v15, %v7885_v52  ;;  %v1346_v58 = vrot.slane %v1338_v38, %v7885_v52  ;;  %v1353_v60 = vrot.slane %v1339_v40, %v7885_v52  ;;  %v3043_v62 = vcombine.low %v2510_v19, %v2524_v30 }
 0x173   : > { %v743_v45 = vrot.slane %v727_v31, %v7885_v52  ;;  %v2550_v55 = vcombine.high %v2542_v35, %v2542_v35  ;;  %v2558_v61 = vrot.slane %v2542_v35, %v7885_v52  ;;  %v6658_v63 = vcombine.high %v2510_v19, %v2524_v30 }
 0x174   : > { %v758_v1 = vcombine.high %v736_v43, %v736_v43  ;;  %v2549_v10 = vrot.slane %v2535_v2, %v7885_v52  ;;  %v1354_v17 = vcombine.low %v1346_v58, %v1353_v60  ;;  %6817 = vmatpush3.bf16.msra.mxu1 %v7055_v25  ;;  %v8043_v15 = vrot.slane %v6612_v42, %v7885_v52 }
 0x175   : > { %v2458_v11 = vpop.permute.xlu1 %2457  ;;  %v2533_v38 = vcombine.high %v8010_v22, %v8010_v22  ;;  %v775_v40 = vrot.slane %v761_v49, %v7885_v52  ;;  %v776_v31 = vcombine.high %v768_v50, %v768_v50  ;;  %6818 = vmatprep.subr.bf16.mxu1 %v9508_v0  ;;  %v757_v30 = vrot.slane %v729_v51, %v7885_v52 }
 0x176   : > { %v760_v35 = vcombine.high %v750_v29, %v750_v29  ;;  %v8052_v2 = vcombine.low %v711_v34, %v736_v43  ;;  %6805 = vmatmul.mubr.msk.bf16.gmra.mrb[4].mxu1 %vm1440_vm3, %v1354_v17  ;;  %v759_v42 = vcombine.high %v743_v45, %v743_v45  ;;  %v8056_v25 = vrot.slane %v2550_v55, %v7885_v52  ;;  %v7057_v55 = vld [vmem:[#allocation8 + $0x20] sm:$0xff]  }
 0x177   : > { %v2885_v58 = vunpack.i.h.s16 %v2558_v61  ;;  %v8060_v49 = vsel %vm1440_vm3, %v7891_v54, %v2458_v11  ;;  %6808 = vmatprep.mubr.msk.bf16.mxu1 %vm7387_vm0, %v9508_v0  ;;  %v8065_v60 = vrot.slane %v3043_v62, %v7885_v52  ;;  %v8068_v34 = vrot.slane %v6658_v63, %v7885_v52 }
 0x178   : > { %9585 = vst [vmem:[#allocation28_spill] sm:$0xff] %v8060_v49  ;;  %v8070_v43 = vcombine.low %v750_v29, %v758_v1  ;;  %v2551_v51 = vcombine.high %v2549_v10, %v2549_v10  ;;  %6819 = vmatpush3.bf16.msra.mxu1 %v7056_v6  ;;  %v777_v17 = vcombine.high %v775_v40, %v775_v40 }
 0x179   : > { %v784_v41 = vrot.slane %v768_v50, %v7885_v52  ;;  %v798_v54 = vrot.slane %v776_v31, %v7885_v52  ;;  %v8076_v11 = vsel %vm1440_vm3, %v646_v24, %v7976_v14  ;;  %6820 = vmatprep.subr.bf16.mxu1 %v9508_v0  ;;  %v8081_v29 = vcombine.low %v760_v35, %v743_v45 }
 0x17a   : > { %9586 = vst [vmem:[#allocation29_spill] sm:$0xff] %v8076_v11  ;;  %v2583_v6 = vcombine.high %v8076_v11, %v8076_v11  ;;  %v2727_v50 = vcombine.high %v8060_v49, %v8060_v49  ;;  %v8087_v63 = vcombine.low %v757_v30, %v759_v42  ;;  %v8090_v1 = vrot.slane %v2549_v10, %v7885_v52  ;;  %v7058_v10 = vld [vmem:[#allocation8 + $0x28] sm:$0xff]  }
 0x17b   : > { %v8092_v14 = vpack.i.b16 %v2558_v61, %v2533_v38  ;;  %v8095_v24 = vpack.i.b16 %v8056_v25, %v2885_v58  ;;  %v8099_v31 = vcombine.high %v2558_v61, %v2558_v61  ;;  %v8103_v35 = vrot.slane %v8076_v11, %v7885_v52  ;;  %v7059_v61 = vld [vmem:[#allocation8 + $0x30] sm:$0xff]  }
 0x17c   : > { %v2734_v30 = vrot.slane %v8060_v49, %v7885_v52  ;;  %6821 = vmatpush3.bf16.msra.mxu1 %v7057_v55  ;;  %v8108_v38 = vrot.slane %v2551_v51, %v7885_v52  ;;  %v8111_v42 = vrot.slane %v777_v17, %v7885_v52  ;;  %v1113_v58 = vcombine.low %v784_v41, %v798_v54 }
 0x17d   : > { %v6613_v19 = vcombine.high %v784_v41, %v798_v54  ;;  %6822 = vmatprep.subr.bf16.mxu1 %v9508_v0  ;;  %v8117_v45 = vrot.slane %v2583_v6, %v7885_v52  ;;  %v631_v55 = vsel %vm623_vm1, %v7805_v44, %v582_v47  ;;  %v2741_v26 = vrot.slane %v2727_v50, %v7885_v52  ;;  %v614_v54 = vpop.permute.xlu0 %613 }
 0x17e   : > { %v8125_v17 = vrot.slane %v775_v40, %v7885_v52  ;;  %v5768_v41 = vcombine.low %v8060_v49, %v9507_v5  ;;  %v8133_v6 = vsel %vm640_vm2, %v7965_v33, %v7895_v56  ;;  %v8141_v40 = vrot.slane %v8103_v35, %v7885_v52 }
 0x17f   : > { %v2742_v51 = vcombine.high %v2734_v30, %v2734_v30  ;;  %v8144_v5 = vrot.slane %v1113_v58, %v7885_v52  ;;  %v8149_v33 = vrot.slane %v6613_v19, %v7885_v52  ;;  %v8152_v47 = vrot.slane %v2734_v30, %v7885_v52 }
 0x180   : > { %6823 = vmatpush3.bf16.msra.mxu1 %v7058_v10  ;;  %v2743_v50 = vcombine.high %v2741_v26, %v2741_v26  ;;  %v648_v7 = vsel %vm640_vm2, %v631_v55, %v614_v54  ;;  %v1001_v10 = vcombine.high %v8133_v6, %v8133_v6  ;;  %v1008_v58 = vrot.slane %v8133_v6, %v7885_v52 }
 0x181   : > { %9587 = vst [vmem:[#allocation30_spill] sm:$0xff] %v8152_v47  ;;  %6824 = vmatprep.subr.bf16.mxu1 %v9508_v0  ;;  %v8161_v18 = vrot.slane %v2741_v26, %v7885_v52  ;;  %v8164_v19 = vrot.slane %v5768_v41, %v7931_v46  ;;  %v807_v30 = vcombine.high %v8125_v17, %v8125_v17  ;;  %v7060_v26 = vld [vmem:[#allocation8 + $0x38] sm:$0xff]  }
 0x182   : > { %v999_v56 = vcombine.high %v7949_v20, %v7949_v20  ;;  %v8171_v55 = vrot.slane %v2742_v51, %v7885_v52  ;;  %v1015_v54 = vrot.slane %v1001_v10, %v7885_v52  ;;  %v1016_v62 = vcombine.high %v1008_v58, %v1008_v58 }
 0x183   : > { %9588 = vst [vmem:[#allocation31_spill] sm:$0xff] %v8161_v18  ;;  %v1024_v28 = vrot.slane %v1008_v58, %v7885_v52  ;;  %v8177_v41 = vcombine.high %v8152_v47, %v8152_v47  ;;  %v809_v49 = vcombine.high %v648_v7, %v648_v7  ;;  %v816_v8 = vrot.slane %v648_v7, %v7885_v52 }
 0x184   : > { %6825 = vmatpush3.bf16.msra.mxu1 %v7059_v61  ;;  %v9590_v20 = vmov 0.0   ;;  %v1017_v51 = vcombine.high %v1015_v54, %v1015_v54  ;;  %v1031_v21 = vrot.slane %v1015_v54, %v7885_v52  ;;  %v1038_v10 = vrot.slane %v1016_v62, %v7885_v52 }
 0x185   : > { %9589 = vst [vmem:[#allocation32_spill] sm:$0xff] %v8177_v41  ;;  %6826 = vmatprep.subr.bf16.mxu1 %v9590_v20  ;;  %v1046_v44 = vcombine.high %v1024_v28, %v1024_v28  ;;  %v8185_v61 = vrot.slane %v2743_v50, %v7885_v52  ;;  %v2945_v58 = vunpack.i.h.s16 %v8161_v18  ;;  %v8190_v11 = vsel %vm1440_vm3, %v648_v7, %v8016_v27  ;;  %v2456_v18 = vpop.permute.xlu0 %2455 }
 0x186   : > { %9591 = vst [vmem:[#allocation33_spill] sm:$0xff] %v8190_v11  ;;  %v1355_v0 = vcombine.low %v999_v56, %v1024_v28  ;;  %v1045_v39 = vrot.slane %v1017_v51, %v7885_v52  ;;  %v1047_v3 = vcombine.high %v1031_v21, %v1031_v21  ;;  %v1048_v32 = vcombine.high %v1038_v10, %v1038_v10 }
 0x187   : > { %v1356_v48 = vcombine.low %v1038_v10, %v1046_v44  ;;  %v8195_v62 = vcombine.high %v8171_v55, %v8171_v55  ;;  %v824_v47 = vcombine.high %v816_v8, %v816_v8  ;;  %v823_v7 = vrot.slane %v809_v49, %v7885_v52 }
 0x188   : > { %6827 = vmatpush3.bf16.msra.mxu1 %v7060_v26  ;;  %v832_v27 = vrot.slane %v816_v8, %v7885_v52  ;;  %v1357_v28 = vcombine.low %v1048_v32, %v1031_v21  ;;  %v1358_v56 = vcombine.low %v1045_v39, %v1047_v3  ;;  %v2631_v44 = vcombine.high %v8190_v11, %v8190_v11 }
 0x189   : > { %6876 = vmatprep.subr.bf16.mxu1 %v9590_v20  ;;  %v2638_v26 = vrot.slane %v8190_v11, %v7885_v52  ;;  %v9592_v51 = vcombine.low %v7983_v57, %v7987_v59  ;;  %v1093_v54 = vcombine.low %v8026_v36, %v8043_v15  ;;  %v1365_v49 = vrot.slane %v1355_v0, %v7885_v52  ;;  %v2460_v41 = vpop.permute.xlu0 %2459 }
 0x18a   : > { %v8215_v8 = vsel %vm1440_vm3, %v7888_v53, %v2456_v18  ;;  %v1372_v32 = vrot.slane %v1356_v48, %v7885_v52  ;;  %v1379_v39 = vrot.slane %v1357_v28, %v7885_v52  ;;  %v8220_v3 = vpack.i.b16 %v8185_v61, %v2945_v58 }
 0x18b   : > { %v1085_v10 = vrot.slane %v9592_v51, %v7885_v52  ;;  %v846_v21 = vrot.slane %v824_v47, %v7885_v52  ;;  %v9594_v57 = vrot.slane %v8052_v2, %v7885_v52  ;;  %v1101_v36 = vrot.slane %v1093_v54, %v7885_v52  ;;  %v2462_v51 = vpop.permute.xlu1 %2461 }
 0x18c   : > { %9593 = vst [vmem:[#allocation34_spill] sm:$0xff] %v8220_v3  ;;  %v825_v0 = vcombine.high %v823_v7, %v823_v7  ;;  %v854_v15 = vcombine.high %v832_v27, %v832_v27  ;;  %v9595_v53 = vrot.slane %v7753_v4, 2  ;;  %v1386_v48 = vrot.slane %v1358_v56, %v7885_v52 }
 0x18d   : > { %v1094_v59 = vcombine.low %v1085_v10, %v9594_v57  ;;  %v839_v58 = vrot.slane %v823_v7, %v7885_v52  ;;  %v2645_v28 = vrot.slane %v2631_v44, %v7885_v52  ;;  %v2646_v47 = vcombine.high %v2638_v26, %v2638_v26 }
 0x18e   : > { %v5752_v18 = vcombine.high %v8215_v8, %v9595_v53  ;;  %v2679_v2 = vcombine.high %v8215_v8, %v8215_v8  ;;  %v1387_v10 = vcombine.low %v1365_v49, %v1372_v32  ;;  %v1388_v57 = vcombine.low %v1379_v39, %v1386_v48 }
 0x18f   : > { %v1108_v50 = vrot.slane %v1094_v59, %v7885_v52  ;;  %v856_v11 = vcombine.high %v846_v21, %v846_v21  ;;  %v1161_v4 = vcombine.low %v807_v30, %v832_v27  ;;  %v8239_v53 = vsel %vm1440_vm3, %v8133_v6, %v2462_v51 }
 0x190   : > { %v5766_v54 = vrot.slane %v5752_v18, %v7931_v46  ;;  %v1162_v7 = vcombine.low %v846_v21, %v854_v15  ;;  %v1395_v59 = vrot.slane %v1387_v10, %v7885_v52  ;;  %v1402_v3 = vrot.slane %v1388_v57, %v7885_v52 }
 0x191   : > { %v1109_v56 = vcombine.low %v1101_v36, %v1108_v50  ;;  %v853_v18 = vrot.slane %v825_v0, %v7885_v52  ;;  %v855_v49 = vcombine.high %v839_v58, %v839_v58  ;;  %v2647_v32 = vcombine.high %v2645_v28, %v2645_v28 }
 0x192   : > { %v8242_v44 = vcombine.low %v5766_v54, %v8164_v19  ;;  %v8248_v30 = vrot.slane %v2638_v26, %v7885_v52  ;;  %v9596_v6 = vrot.slane %v7768_v16, 2  ;;  %v8256_v27 = vrot.slane %v8215_v8, %v7885_v52 }
 0x193   : > { %6785 = vmatmul.mubr.msk.bf16.vlgmr.msra.gmra.mrb[0].mxu0 %vm1440_vm3, %v1109_v56  ;;  %v2693_v39 = vrot.slane %v2679_v2, %v7885_v52  ;;  %v1403_v21 = vcombine.low %v1395_v59, %v1402_v3  ;;  %v1183_v36 = vrot.slane %v1161_v4, %v7885_v52  ;;  %v8263_v26 = vrot.slane %v2645_v28, %v7885_v52 }
 0x194   : > { %v5802_v50 = vcombine.low %v8239_v53, %v9596_v6  ;;  %6788 = vmatprep.mubr.msk.bf16.mxu0 %vm7387_vm0, %v9590_v20  ;;  %v8267_v0 = vsel %vm1440_vm3, %v7913_v12, %v2460_v41  ;;  %v1134_v15 = vrot.slane %v8087_v63, %v7885_v52  ;;  %v1190_v51 = vrot.slane %v1162_v7, %v7885_v52 }
 0x195   : > { %v1208_v48 = vcombine.low %v856_v11, %v839_v58  ;;  %v8273_v3 = vrot.slane %v2646_v47, %v7885_v52  ;;  %v8277_v2 = vrot.slane %v8239_v53, %v7885_v52  ;;  %6809 = vmatmul.mubr.msk.bf16.gmra.mrb[8].mxu1 %vm1440_vm3, %v1403_v21  ;;  %v9597_v4 = vrot.slane %v7760_v9, 2 }
 0x196   : > { %v9598_v41 = vrot.slane %v8081_v29, %v7885_v52  ;;  %v9599_v63 = vrot.slane %v8070_v43, %v7885_v52  ;;  %v1143_v58 = vcombine.low %v1134_v15, %v8144_v5  ;;  %6828 = vmatprep.mubr.msk.bf16.mxu1 %vm7387_vm0, %v9590_v20  ;;  %v9600_v28 = vcombine.low %v8125_v17, %v8111_v42 }
 0x197   : > { %v5786_v12 = vcombine.high %v8267_v0, %v9597_v4  ;;  %v8297_v54 = vrot.slane %v5802_v50, %v7931_v46  ;;  %v2694_v29 = vcombine.high %v8256_v27, %v8256_v27  ;;  %v2695_v10 = vcombine.high %v2693_v39, %v2693_v39 }
 0x198   : > { %v1142_v11 = vcombine.low %v9599_v63, %v9598_v41  ;;  %v1176_v47 = vrot.slane %v9600_v28, %v7885_v52  ;;  %v8302_v43 = vrot.slane %v2693_v39, %v7885_v52  ;;  %v1157_v56 = vrot.slane %v1143_v58, %v7885_v52 }
 0x199   : > { %v5800_v5 = vrot.slane %v5786_v12, %v7931_v46  ;;  %v1209_v42 = vcombine.low %v853_v18, %v855_v49  ;;  %v8309_v17 = vrot.slane %v2647_v32, %v7885_v52  ;;  %v8313_v59 = vcombine.high %v8248_v30, %v8248_v30 }
 0x19a   : > { %v1150_v57 = vrot.slane %v1142_v11, %v7885_v52  ;;  %v1191_v7 = vcombine.low %v8149_v33, %v1176_v47  ;;  %v2911_v6 = vunpack.i.h.s16 %v8248_v30  ;;  %v1218_v50 = vrot.slane %v1208_v48, %v7885_v52 }
 0x19b   : > { %v2823_v39 = vcombine.high %v8239_v53, %v8239_v53  ;;  %v8320_v21 = vcombine.low %v5800_v5, %v8297_v54  ;;  %v2838_v33 = vcombine.high %v8277_v2, %v8277_v2  ;;  %v8325_v18 = vrot.slane %v2694_v29, %v7885_v52 }
 0x19c   : > { %v1158_v15 = vcombine.low %v1150_v57, %v1157_v56  ;;  %v8328_v49 = vrot.slane %v2695_v10, %v7885_v52  ;;  %v2725_v32 = vcombine.high %v8302_v43, %v8302_v43  ;;  %v2947_v48 = vunpack.i.h.s16 %v8185_v61 }
 0x19d   : > { %v1192_v4 = vcombine.low %v1183_v36, %v1190_v51  ;;  %v1199_v12 = vrot.slane %v1191_v7, %v7885_v52  ;;  %v9601_v41 = vcombine.low %v8010_v22, %v8031_v37  ;;  %v2775_v11 = vcombine.high %v8267_v0, %v8267_v0 }
 0x19e   : > { %6789 = vmatmul.mubr.msk.bf16.gmra.mrb[4].mxu0 %vm1440_vm3, %v1158_v15  ;;  %v8343_v58 = vrot.slane %v8267_v0, %v7885_v52  ;;  %v9602_v36 = vcombine.low %v8092_v14, %v8095_v24  ;;  %v3075_v28 = vcombine.low %v8065_v60, %v8068_v34  ;;  %v1225_v37 = vrot.slane %v1209_v42, %v7885_v52 }
 0x19f   : > { %v3067_v63 = vrot.slane %v9601_v41, %v7885_v52  ;;  %6792 = vmatprep.mubr.msk.bf16.mxu0 %vm7387_vm0, %v9590_v20  ;;  %v1206_v22 = vrot.slane %v1192_v4, %v7885_v52  ;;  %v1241_v47 = vcombine.low %v7953_v23, %v7958_v13  ;;  %v2581_v29 = vcombine.high %v8090_v1, %v8090_v1 }
 0x1a0   : > { %v3074_v51 = vrot.slane %v9602_v36, %v7885_v52  ;;  %v3083_v5 = vrot.slane %v3075_v28, %v7885_v52  ;;  %v2582_v14 = vcombine.high %v8056_v25, %v8056_v25  ;;  %v9603_v60 = vcombine.high %v8103_v35, %v8103_v35 }
 0x1a1   : > { %v1207_v24 = vcombine.low %v1199_v12, %v1206_v22  ;;  %v1240_v57 = vcombine.low %v1218_v50, %v1225_v37  ;;  %v1255_v56 = vrot.slane %v1241_v47, %v7885_v52  ;;  %v2628_v23 = vcombine.high %v8141_v40, %v8141_v40 }
 0x1a2   : > { %v3076_v10 = vcombine.low %v3067_v63, %v3074_v51  ;;  %v2620_v34 = vrot.slane %v9603_v60, %v7885_v52  ;;  %v2887_v7 = vunpack.i.h.s16 %v8056_v25  ;;  %v2889_v42 = vunpack.i.h.s16 %v8099_v31 }
 0x1a3   : > { %v2891_v15 = vunpack.i.h.s16 %v2582_v14  ;;  %v1248_v4 = vrot.slane %v1240_v57, %v7885_v52  ;;  %v2893_v41 = vunpack.i.h.s16 %v8090_v1  ;;  %v2895_v35 = vunpack.i.h.s16 %v8108_v38 }
 0x1a4   : > { %v3090_v13 = vrot.slane %v3076_v10, %v7885_v52  ;;  %v3095_v12 = vcombine.low %v2620_v34, %v2628_v23  ;;  %v6632_v63 = vpack.i.b16 %v8099_v31, %v2887_v7  ;;  %v6633_v36 = vpack.i.b16 %v2582_v14, %v2889_v42 }
 0x1a5   : > { %v6634_v51 = vpack.i.b16 %v8090_v1, %v2891_v15  ;;  %v1256_v28 = vcombine.low %v1248_v4, %v1255_v56  ;;  %v6635_v25 = vpack.i.b16 %v8108_v38, %v2893_v41  ;;  %v6636_v22 = vpack.i.b16 %v2581_v29, %v2895_v35 }
 0x1a6   : > { %v3091_v50 = vcombine.low %v3083_v5, %v3090_v13  ;;  %6793 = vmatmul.mubr.msk.bf16.gmra.mrb[8].mxu0 %vm1440_vm3, %v1207_v24  ;;  %v3123_v37 = vrot.slane %v3095_v12, %v7885_v52  ;;  %v3092_v47 = vcombine.low %v6632_v63, %v6633_v36  ;;  %v2613_v10 = vrot.slane %v8117_v45, %v7885_v52 }
 0x1a7   : > { %6796 = vmatprep.mubr.msk.bf16.mxu0 %vm7387_vm0, %v9590_v20  ;;  %v9604_v1 = vcombine.high %v8117_v45, %v8117_v45  ;;  %v2913_v5 = vunpack.i.h.s16 %v8273_v3  ;;  %v3093_v38 = vcombine.low %v6634_v51, %v6635_v25  ;;  %v3094_v29 = vcombine.low %v6636_v22, %v8141_v40 }
 0x1a8   : > { %6829 = vmatmul.mubr.bf16.vlgmr.msra.gmra.mrb[12].mxu1 %v3091_v50  ;;  %v2630_v14 = vcombine.high %v2620_v34, %v2620_v34  ;;  %v2678_v60 = vcombine.high %v8273_v3, %v8273_v3  ;;  %v3102_v24 = vrot.slane %v3092_v47, %v7885_v52  ;;  %v2629_v57 = vcombine.high %v2613_v10, %v2613_v10 }
 0x1a9   : > { %v2627_v31 = vrot.slane %v9604_v1, %v7885_v52  ;;  %6832 = vmatprep.mubr.msk.bf16.mxu1 %vm7387_vm0, %v9590_v20  ;;  %v2915_v56 = vunpack.i.h.s16 %v8313_v59  ;;  %v6638_v45 = vpack.i.b16 %v8273_v3, %v2911_v6  ;;  %v3109_v23 = vrot.slane %v3093_v38, %v7885_v52 }
 0x1aa   : > { %v3116_v13 = vrot.slane %v3094_v29, %v7885_v52  ;;  %v2917_v7 = vunpack.i.h.s16 %v2678_v60  ;;  %v6639_v42 = vpack.i.b16 %v8313_v59, %v2913_v5  ;;  %v6637_v40 = vpack.i.b16 %v8248_v30, %v2629_v57 }
 0x1ab   : > { %v6640_v34 = vpack.i.b16 %v2678_v60, %v2915_v56  ;;  %v3141_v15 = vcombine.low %v2630_v14, %v2613_v10  ;;  %v2677_v4 = vcombine.high %v8263_v26, %v8263_v26  ;;  %v3124_v41 = vcombine.low %v3102_v24, %v3109_v23  ;;  %v9606_v24 = vld [vmem:[#allocation30_spill] sm:$0xff] }
 0x1ac   : > { %v3125_v35 = vcombine.low %v3116_v13, %v3123_v37  ;;  %v6641_v12 = vpack.i.b16 %v8263_v26, %v2917_v7  ;;  %v3143_v50 = vcombine.low %v6638_v45, %v6639_v42  ;;  %v3142_v3 = vcombine.low %v2627_v31, %v6637_v40  ;;  %v9609_v7 = vld [vmem:[#allocation32_spill] sm:$0xff] }
 0x1ad   : > { %v3151_v6 = vrot.slane %v3141_v15, %v7885_v52  ;;  %v2919_v63 = vunpack.i.h.s16 %v8263_v26  ;;  %v2921_v36 = vunpack.i.h.s16 %v8309_v17  ;;  %v3132_v30 = vrot.slane %v3124_v41, %v7885_v52 }
 0x1ae   : > { %6797 = vmatmul.mubr.msk.bf16.gmra.mrb[12].mxu0 %vm1440_vm3, %v1256_v28  ;;  %v3139_v59 = vrot.slane %v3125_v35, %v7885_v52  ;;  %v3144_v51 = vcombine.low %v6640_v34, %v6641_v12  ;;  %v3165_v25 = vrot.slane %v3143_v50, %v7885_v52  ;;  %v2789_v22 = vrot.slane %v2775_v11, %v7885_v52 }
 0x1af   : > { %v3158_v37 = vrot.slane %v3142_v3, %v7885_v52  ;;  %v6642_v26 = vpack.i.b16 %v8309_v17, %v2919_v63  ;;  %v6643_v47 = vpack.i.b16 %v2677_v4, %v2921_v36  ;;  %6872 = vmatprep.mubr.msk.bf16.mxu0 %vm7387_vm0, %v9590_v20  ;;  %v2702_v28 = vrot.slane %v8256_v27, %v7885_v52  ;;  %v9605_v17 = vld [vmem:[#allocation31_spill] sm:$0xff] }
 0x1b0   : > { %v3193_v10 = vcombine.low %v8302_v43, %v8328_v49  ;;  %v3140_v1 = vcombine.low %v3132_v30, %v3139_v59  ;;  %v3172_v31 = vrot.slane %v3144_v51, %v7885_v52  ;;  %v8428_v11 = vrot.slane %v2838_v33, %v7885_v52  ;;  %v9611_v51 = vld [vmem:[#allocation34_spill] sm:$0xff] }
 0x1b1   : > { %v2773_v5 = vcombine.high %v9605_v17, %v9605_v17  ;;  %v3190_v38 = vcombine.low %v6642_v26, %v6643_v47  ;;  %v2943_v29 = vunpack.i.h.s16 %v8195_v62  ;;  %v3191_v27 = vcombine.low %v2702_v28, %v8325_v18  ;;  %v9613_v47 = vld [vmem:[#allocation22_spill] sm:$0xff] }
 0x1b2   : > { %v6659_v14 = vcombine.high %v2702_v28, %v8325_v18  ;;  %6833 = vmatmul.mubr.bf16.gmra.mrb[16].mxu1 %v3140_v1  ;;  %v3173_v49 = vcombine.low %v3151_v6, %v3158_v37  ;;  %v3174_v60 = vcombine.low %v3165_v25, %v3172_v31  ;;  %v6644_v57 = vpack.i.b16 %v9606_v24, %v2725_v32  ;;  %v9612_v37 = vld [vmem:[#allocation25_spill] sm:$0xff] }
 0x1b3   : > { %v6650_v33 = vpack.i.b16 %v2773_v5, %v2947_v48  ;;  %v2790_v56 = vcombine.high %v8343_v58, %v8343_v58  ;;  %v2805_v45 = vrot.slane %v2789_v22, %v7885_v52  ;;  %6836 = vmatprep.mubr.msk.bf16.mxu1 %vm7387_vm0, %v9590_v20  ;;  %v8448_v18 = vrot.slane %v8343_v58, %v7885_v52 }
 0x1b4   : > { %v3188_v23 = vrot.slane %v3174_v60, %v7885_v52  ;;  %v3200_v43 = vrot.slane %v3190_v38, %v7885_v52  ;;  %v3221_v32 = vrot.slane %v3193_v10, %v7885_v52  ;;  %v9607_v61 = vunpack.i.h.s16 %v9606_v24 }
 0x1b5   : > { %v9608_v13 = vunpack.i.h.s16 %v8171_v55  ;;  %v9610_v40 = vunpack.i.h.s16 %v9609_v7  ;;  %v6648_v58 = vpack.i.b16 %v9605_v17, %v2943_v29  ;;  %v2837_v15 = vrot.slane %v2823_v39, %v7885_v52 }
 0x1b6   : > { %v6645_v48 = vpack.i.b16 %v8171_v55, %v9607_v61  ;;  %v3181_v4 = vrot.slane %v3173_v49, %v7885_v52  ;;  %v3207_v41 = vrot.slane %v3191_v27, %v7885_v52  ;;  %v3214_v35 = vrot.slane %v6659_v14, %v7885_v52 }
 0x1b7   : > { %v6646_v42 = vpack.i.b16 %v9609_v7, %v9608_v13  ;;  %v6647_v34 = vpack.i.b16 %v8195_v62, %v9610_v40  ;;  %v2846_v55 = vrot.slane %v8277_v2, %v7885_v52  ;;  %v2791_v12 = vcombine.high %v2789_v22, %v2789_v22  ;;  %v9615_v22 = vld [vmem:[#allocation26_spill] sm:$0xff] }
 0x1b8   : > { %v2821_v50 = vcombine.high %v2805_v45, %v2805_v45  ;;  %v3239_v3 = vcombine.low %v6644_v57, %v6645_v48  ;;  %v2812_v62 = vrot.slane %v2790_v56, %v7885_v52  ;;  %v3189_v6 = vcombine.low %v3181_v4, %v3188_v23  ;;  %v9619_v48 = vld [vmem:[#allocation29_spill] sm:$0xff] }
 0x1b9   : > { %v3222_v63 = vcombine.low %v3200_v43, %v3207_v41  ;;  %v3223_v36 = vcombine.low %v3214_v35, %v3221_v32  ;;  %v2965_v30 = vunpack.i.h.s16 %v8428_v11  ;;  %v3242_v39 = vcombine.low %v6650_v33, %v8448_v18  ;;  %v9617_v32 = vld [vmem:[#allocation23_spill] sm:$0xff] }
 0x1ba   : > { %v3240_v59 = vcombine.low %v6646_v42, %v6647_v34  ;;  %v3241_v25 = vcombine.low %v6648_v58, %v9611_v51  ;;  %v5698_v26 = vrot.slane %v9612_v37, %v7931_v46  ;;  %v9614_v2 = vrot.slane %v9613_v47, 2  ;;  %6837 = vmatmul.mubr.bf16.gmra.mrb[20].mxu1 %v3189_v6 }
 0x1bb   : > { %v2839_v31 = vcombine.high %v2837_v15, %v2837_v15  ;;  %v2868_v17 = vcombine.high %v2846_v55, %v2846_v55  ;;  %v2963_v5 = vunpack.i.h.s16 %v2846_v55  ;;  %v6651_v38 = vpack.i.b16 %v2846_v55, %v2821_v50  ;;  %6840 = vmatprep.mubr.msk.bf16.mxu1 %vm7387_vm0, %v9590_v20 }
 0x1bc   : > { %v5700_v28 = vcombine.low %v9615_v22, %v9614_v2  ;;  %v9616_v10 = vmov %v9614_v2  ;;  %v3249_v29 = vrot.slane %v3239_v3, %v7885_v52  ;;  %v2819_v27 = vrot.slane %v2791_v12, %v7885_v52 }
 0x1bd   : > { %v8484_v1 = vcombine.high %v9615_v22, %v9616_v10  ;;  %v2822_v14 = vcombine.high %v2812_v62, %v2812_v62  ;;  %v3230_v49 = vrot.slane %v3222_v63, %v7885_v52  ;;  %v3237_v60 = vrot.slane %v3223_v36, %v7885_v52  ;;  %v9621_v36 = vld [vmem:[#allocation24_spill] sm:$0xff] }
 0x1be   : > { %v3256_v24 = vrot.slane %v3240_v59, %v7885_v52  ;;  %v3263_v57 = vrot.slane %v3241_v25, %v7885_v52  ;;  %v3270_v33 = vrot.slane %v3242_v39, %v7885_v52  ;;  %v6653_v56 = vpack.i.b16 %v2868_v17, %v2965_v30  ;;  %v9623_v39 = vld [vmem:[#allocation33_spill] sm:$0xff] }
 0x1bf   : > { %v5708_v23 = vrot.slane %v5700_v28, %v7931_v46  ;;  %v5715_v43 = vrot.slane %v8484_v1, %v7931_v46  ;;  %v9618_v61 = vrot.slane %v9617_v32, 2  ;;  %v2867_v7 = vrot.slane %v2839_v31, %v7885_v52  ;;  %v9627_v31 = vld [vmem:[#allocation27_spill] sm:$0xff] }
 0x1c0   : > { %v2820_v42 = vcombine.high %v8448_v18, %v8448_v18  ;;  %v3271_v40 = vcombine.low %v3249_v29, %v3256_v24  ;;  %v6652_v34 = vpack.i.b16 %v8428_v11, %v2963_v5  ;;  %v3290_v58 = vcombine.low %v2819_v27, %v6651_v38 }
 0x1c1   : > { %v5717_v13 = vcombine.low %v9619_v48, %v9618_v61  ;;  %v2853_v4 = vrot.slane %v2837_v15, %v7885_v52  ;;  %v3289_v41 = vcombine.low %v2822_v14, %v2805_v45  ;;  %v3238_v35 = vcombine.low %v3230_v49, %v3237_v60 }
 0x1c2   : > { %v2870_v55 = vcombine.high %v8428_v11, %v8428_v11  ;;  %v5716_v12 = vcombine.high %v5708_v23, %v5708_v23  ;;  %v9620_v50 = vmov %v9618_v61  ;;  %v3272_v6 = vcombine.low %v3263_v57, %v3270_v33  ;;  %v9625_v11 = vld [vmem:[#allocation20_spill] sm:$0xff] }
 0x1c3   : > { %v8511_v3 = vcombine.high %v9619_v48, %v9620_v50  ;;  %v3291_v63 = vcombine.low %v6652_v34, %v6653_v56  ;;  %v5725_v18 = vrot.slane %v5717_v13, %v7931_v46  ;;  %v9622_v30 = vrot.slane %v9621_v36, 2  ;;  %6841 = vmatmul.mubr.bf16.gmra.mrb[24].mxu1 %v3238_v35 }
 0x1c4   : > { %v9626_v51 = vrot.slane %v9625_v11, 2  ;;  %v2973_v37 = vunpack.i.h.s16 %v2867_v7  ;;  %v3288_v47 = vcombine.low %v2812_v62, %v2820_v42  ;;  %6844 = vmatprep.mubr.msk.bf16.mxu1 %vm7387_vm0, %v9590_v20  ;;  %v3279_v2 = vrot.slane %v3271_v40, %v7885_v52  ;;  %v9636_v11 = vld [vmem:[#allocation28_spill] sm:$0xff] }
 0x1c5   : > { %v5734_v59 = vcombine.low %v9623_v39, %v9622_v30  ;;  %v9624_v45 = vmov %v9622_v30  ;;  %v3312_v22 = vrot.slane %v3290_v58, %v7885_v52  ;;  %v3305_v28 = vrot.slane %v3289_v41, %v7885_v52 }
 0x1c6   : > { %v8520_v15 = vcombine.high %v9623_v39, %v9624_v45  ;;  %v5751_v25 = vcombine.low %v8215_v8, %v9626_v51  ;;  %v2869_v10 = vcombine.high %v2853_v4, %v2853_v4  ;;  %v2969_v1 = vunpack.i.h.s16 %v2870_v55 }
 0x1c7   : > { %v5699_v5 = vcombine.high %v9627_v31, %v9627_v31  ;;  %v3286_v38 = vrot.slane %v3272_v6, %v7885_v52  ;;  %v3319_v8 = vrot.slane %v3291_v63, %v7885_v52  ;;  %v2967_v29 = vunpack.i.h.s16 %v2868_v17 }
 0x1c8   : > { %v2971_v62 = vunpack.i.h.s16 %v2853_v4  ;;  %v5742_v27 = vrot.slane %v5734_v59, %v7931_v46  ;;  %v5759_v14 = vrot.slane %v5751_v25, %v7931_v46  ;;  %v5840_v60 = vcombine.low %v5698_v26, %v5708_v23  ;;  %v9634_v59 = vld [vmem:[#allocation21_spill] sm:$0xff] }
 0x1c9   : > { %v5839_v49 = vcombine.low %v9627_v31, %v5699_v5  ;;  %v3287_v24 = vcombine.low %v3279_v2, %v3286_v38  ;;  %v3298_v57 = vrot.slane %v3288_v47, %v7885_v52  ;;  %v3321_v33 = vcombine.low %v3312_v22, %v3319_v8 }
 0x1ca   : > { %v6657_v56 = vpack.i.b16 %v2869_v10, %v2973_v37  ;;  %v6655_v32 = vpack.i.b16 %v2853_v4, %v2969_v1  ;;  %v8542_v48 = vrot.slane %v5840_v60, %v7931_v46  ;;  %v5733_v17 = vcombine.high %v5725_v18, %v5725_v18 }
 0x1cb   : > { %v8539_v61 = vrot.slane %v5839_v49, %v7931_v46  ;;  %v9630_v13 = vrot.slane %v7760_v9, 2  ;;  %v3320_v40 = vcombine.low %v3298_v57, %v3305_v28  ;;  %v6654_v34 = vpack.i.b16 %v2870_v55, %v2967_v29  ;;  %6845 = vmatmul.mubr.bf16.gmra.mrb[28].mxu1 %v3287_v24 }
 0x1cc   : > { %9629 = vst [vmem:[#allocation30_spill] sm:$0xff] %v8542_v48  ;;  %v6656_v26 = vpack.i.b16 %v2867_v7, %v2971_v62  ;;  %v5857_v4 = vcombine.low %v5716_v12, %v5715_v43  ;;  %v5858_v41 = vcombine.low %v5725_v18, %v5733_v17  ;;  %v5732_v35 = vrot.slane %v8511_v3, %v7931_v46 }
 0x1cd   : > { %9628 = vst [vmem:[#allocation31_spill] sm:$0xff] %v8539_v61  ;;  %v5785_v42 = vcombine.low %v8267_v0, %v9630_v13  ;;  %6848 = vmatprep.mubr.msk.bf16.mxu1 %vm7387_vm0, %v9590_v20  ;;  %v3335_v9 = vrot.slane %v3321_v33, %v7885_v52  ;;  %v3337_v0 = vcombine.low %v6654_v34, %v6655_v32  ;;  %v9633_v12 = vrot.slane %v7768_v16, 2 }
 0x1ce   : > { %v3338_v55 = vcombine.low %v6656_v26, %v6657_v56  ;;  %v8557_v7 = vrot.slane %v5857_v4, %v7931_v46  ;;  %v8560_v50 = vrot.slane %v5858_v41, %v7931_v46  ;;  %v5749_v43 = vrot.slane %v8520_v15, %v7931_v46 }
 0x1cf   : > { %v5803_v3 = vcombine.high %v8239_v53, %v9633_v12  ;;  %v5767_v6 = vcombine.high %v5759_v14, %v5759_v14  ;;  %v5793_v63 = vrot.slane %v5785_v42, %v7931_v46  ;;  %v5750_v18 = vcombine.high %v5742_v27, %v5742_v27  ;;  %v6629_v42 = vld [vmem:[%s9493_s2] ss:$0 sm:$0xff] }
 0x1d0   : > { %9631 = vst [vmem:[#allocation32_spill] sm:$0xff] %v8557_v7  ;;  %9632 = vst [vmem:[#allocation34_spill] sm:$0xff] %v8560_v50  ;;  %v3328_v36 = vrot.slane %v3320_v40, %v7885_v52  ;;  %v9635_v45 = vrot.slane %v9634_v59, 2  ;;  %v5818_v16 = vcombine.high %v8297_v54, %v8297_v54  ;;  %v3345_v51 = vrot.slane %v3337_v0, %v7885_v52 }
 0x1d1   : > { %v3352_v25 = vrot.slane %v3338_v55, %v7885_v52  ;;  %v5784_v37 = vcombine.high %v8164_v19, %v8164_v19  ;;  %v5817_v47 = vrot.slane %v5803_v3, %v7931_v46  ;;  %v5893_v2 = vcombine.low %v5759_v14, %v5767_v6 }
 0x1d2   : > { %v5769_v15 = vcombine.high %v9636_v11, %v9635_v45  ;;  %v3336_v53 = vcombine.low %v3328_v36, %v3335_v9  ;;  %v5801_v22 = vcombine.high %v5793_v63, %v5793_v63  ;;  %v5875_v28 = vcombine.low %v5732_v35, %v5742_v27 }
 0x1d3   : > { %v5876_v10 = vcombine.low %v5750_v18, %v5749_v43  ;;  %v5930_v31 = vcombine.low %v5818_v16, %v5817_v47  ;;  %v3353_v54 = vcombine.low %v3345_v51, %v3352_v25  ;;  %v8593_v29 = vrot.slane %v5893_v2, %v7931_v46 }
 0x1d4   : > { %6849 = vmatmul.mubr.bf16.gmra.mrb[32].mxu1 %v3336_v53  ;;  %v5783_v1 = vrot.slane %v5769_v15, %v7931_v46  ;;  %v8587_v5 = vrot.slane %v5875_v28, %v7931_v46  ;;  %v5912_v8 = vcombine.low %v5793_v63, %v5801_v22  ;;  %v8597_v62 = vrot.slane %v8242_v44, %v7931_v46 }
 0x1d5   : > { %6852 = vmatprep.mubr.msk.bf16.mxu1 %vm7387_vm0, %v9590_v20  ;;  %v8590_v38 = vrot.slane %v5876_v10, %v7931_v46  ;;  %9639 = vst [vmem:[#allocation26_spill] sm:$0xff] %v8593_v29  ;;  %v8609_v24 = vrot.slane %v8320_v21, %v7931_v46  ;;  %v8612_v57 = vrot.slane %v5930_v31, %v7931_v46 }
 0x1d6   : > { %9637 = vst [vmem:[#allocation25_spill] sm:$0xff] %v8587_v5  ;;  %v5911_v19 = vcombine.low %v5784_v37, %v5783_v1  ;;  %9640 = vst [vmem:[#allocation23_spill] sm:$0xff] %v8597_v62  ;;  %v3360_v44 = vrot.slane %v3353_v54, %v7885_v52  ;;  %v8619_v56 = vrot.slane %v5912_v8, %v7931_v46  ;;  %v7066_v5 = vld [vmem:[#allocation7 + $0x28] sm:$0xff]  }
 0x1d7   : > { %9638 = vst [vmem:[#allocation22_spill] sm:$0xff] %v8590_v38  ;;  %9641 = vst [vmem:[#allocation29_spill] sm:$0xff] %v8609_v24  ;;  %v1865_v40 = vcombine.high %v6629_v42, %v6629_v42  ;;  %v8635_v34 = vrot.slane %v6629_v42, %v7931_v46 }
 0x1d8   : > { %9642 = vst [vmem:[#allocation24_spill] sm:$0xff] %v8612_v57  ;;  %v8616_v33 = vrot.slane %v5911_v19, %v7931_v46  ;;  %9644 = vst [vmem:[#allocation20_spill] sm:$0xff] %v8619_v56 }
 0x1d9   : > { %v8638_v4 = vrot.slane %v1865_v40, %v7931_v46  ;;  %v8642_v9 = vcombine.high %v8635_v34, %v8635_v34 }
 0x1da   : > { %9643 = vst [vmem:[#allocation33_spill] sm:$0xff] %v8616_v33 }
 0x1db   : > { %v8650_v6 = vcombine.high %v8638_v4, %v8638_v4 }
 0x1dc   : > { %6853 = vmatmul.mubr.bf16.gmra.mrb[36].mxu1 %v3360_v44 }
 0x1dd   : > { %6892 = vmatprep.mubr.msk.bf16.mxu1 %vm7387_vm0, %v9590_v20 }
 0x23e   : > { %v1528_v26 = vpop.f32.mrb[0].mxu1 }
 0x23f   : > { %v1701_v41 = vcombine.high %v1528_v26, %v1528_v26  ;;  %v6802_v35 = vpop.f32.mrb[1].mxu1  ;;  %v1708_v31 = vrot.slane %v1528_v26, %v7931_v46 }
 0x240   : > { %v1531_v0 = vpop.f32.mrb[2].mxu1 }
 0x241   : > { %v8645_v55 = vrot.slane %v1701_v41, %v7931_v46  ;;  %v1718_v43 = vcombine.high %v1531_v0, %v1531_v0  ;;  %v6803_v12 = vpop.f32.mrb[3].mxu1  ;;  %v1725_v3 = vrot.slane %v1531_v0, %v7931_v46 }
 0x243   : > { %v1717_v63 = vcombine.high %v8645_v55, %v8645_v55  ;;  %v1732_v18 = vrot.slane %v1718_v43, %v7931_v46  ;;  %v1733_v36 = vcombine.high %v1725_v3, %v1725_v3  ;;  %v1922_v59 = vadd.f32 %v8642_v9, %v1725_v3 }
 0x245   : > { %v1921_v45 = vadd.f32 %v8635_v34, %v1717_v63  ;;  %v1923_v11 = vadd.f32 %v8638_v4, %v1733_v36  ;;  %v1924_v15 = vadd.f32 %v8650_v6, %v1732_v18  ;;  %v1734_v16 = vcombine.high %v1732_v18, %v1732_v18 }
 0x246   : > { %v1978_v51 = vmax.f32 %v1922_v59, 0.0 }
 0x247   : > { %v1977_v53 = vmax.f32 %v1921_v45, 0.0  ;;  %v1979_v25 = vmax.f32 %v1923_v11, 0.0  ;;  %v1980_v37 = vmax.f32 %v1924_v15, 0.0  ;;  %v1925_v54 = vadd.f32 %v8635_v34, %v1734_v16 }
 0x248   : > { %v1716_v45 = vcombine.high %v1708_v31, %v1708_v31 }
 0x249   : > { %v2219_v47 = vcombine.low %v1977_v53, %v1978_v51  ;;  %v1536_v2 = vpop.f32.mrb[4].mxu1  ;;  %v2220_v22 = vcombine.low %v1979_v25, %v1980_v37  ;;  %v1981_v63 = vmax.f32 %v1925_v54, 0.0 }
 0x24a   : > { %v1735_v28 = vcombine.high %v1536_v2, %v1536_v2  ;;  %v1742_v10 = vrot.slane %v1536_v2, %v7931_v46  ;;  %v6806_v1 = vpop.f32.mrb[5].mxu1 }
 0x24b   : > { %v2227_v19 = vrot.slane %v2219_v47, %v7931_v46  ;;  %v1539_v8 = vpop.f32.mrb[6].mxu1  ;;  %v2234_v44 = vrot.slane %v2220_v22, %v7931_v46 }
 0x24c   : > { %v1749_v42 = vrot.slane %v1735_v28, %v7931_v46  ;;  %v1750_v40 = vcombine.high %v1742_v10, %v1742_v10  ;;  %v1926_v41 = vadd.f32 %v8642_v9, %v1742_v10  ;;  %v6807_v35 = vpop.f32.mrb[7].mxu1  ;;  %v1759_v0 = vrot.slane %v1539_v8, %v7931_v46 }
 0x24d   : > { %v2235_v43 = vcombine.low %v2227_v19, %v2234_v44  ;;  %v1752_v16 = vcombine.high %v1539_v8, %v1539_v8  ;;  %v1919_v10 = vadd.f32 %v8642_v9, %v1716_v45  ;;  %v6668_v8 = vld [vmem:[%s9496_s5] ss:$0 sm:$0xff] }
 0x24e   : > { %v1751_v12 = vcombine.high %v1749_v42, %v1749_v42  ;;  %v1927_v3 = vadd.f32 %v8638_v4, %v1750_v40  ;;  %v1928_v26 = vadd.f32 %v8635_v34, %v1749_v42  ;;  %v1982_v18 = vmax.f32 %v1926_v41, 0.0 }
 0x24f   : > { %v1767_v36 = vcombine.high %v1759_v0, %v1759_v0  ;;  %v1930_v59 = vadd.f32 %v8638_v4, %v1759_v0  ;;  %v1766_v54 = vrot.slane %v1752_v16, %v7931_v46  ;;  %v1918_v42 = vadd.f32 %v8635_v34, %v1708_v31 }
 0x250   : > { %v1929_v11 = vadd.f32 %v8642_v9, %v1751_v12  ;;  %v1983_v15 = vmax.f32 %v1927_v3, 0.0  ;;  %v2236_v53 = vcombine.low %v1981_v63, %v1982_v18  ;;  %v1984_v25 = vmax.f32 %v1928_v26, 0.0 }
 0x251   : > { %v1931_v51 = vadd.f32 %v8650_v6, %v1767_v36  ;;  %v1986_v22 = vmax.f32 %v1930_v59, 0.0  ;;  %v1975_v0 = vmax.f32 %v1919_v10, 0.0  ;;  %v1768_v3 = vcombine.high %v1766_v54, %v1766_v54 }
 0x252   : > { %v1985_v37 = vmax.f32 %v1929_v11, 0.0  ;;  %v2250_v47 = vrot.slane %v1983_v15, %v7931_v46  ;;  %v2243_v2 = vrot.slane %v2236_v53, %v7931_v46  ;;  %v4264_v26 = vcombine.high %v6668_v8, %v6668_v8 }
 0x253   : > { %v1987_v28 = vmax.f32 %v1931_v51, 0.0  ;;  %v1920_v18 = vadd.f32 %v8638_v4, %v8645_v55  ;;  %v1974_v36 = vmax.f32 %v1918_v42, 0.0  ;;  %v4271_v31 = vrot.slane %v6668_v8, %v7885_v52 }
 0x254   : > { %v2252_v1 = vcombine.low %v1984_v25, %v1985_v37  ;;  %v2251_v19 = vcombine.low %v2243_v2, %v2250_v47  ;;  %v1933_v15 = vadd.f32 %v8642_v9, %v1768_v3  ;;  %v4278_v16 = vrot.slane %v4264_v26, %v7885_v52  ;;  %v7061_v25 = vld [vmem:[#allocation7] sm:$0xff]  }
 0x255   : > { %v2253_v44 = vcombine.low %v1986_v22, %v1987_v28  ;;  %v2203_v45 = vcombine.low %v1974_v36, %v1975_v0  ;;  %v1976_v53 = vmax.f32 %v1920_v18, 0.0  ;;  %v4279_v37 = vcombine.high %v4271_v31, %v4271_v31  ;;  %6877 = vmatpush3.bf16.msra.mxu1 %v7061_v25 }
 0x256   : > { %v2260_v40 = vrot.slane %v2252_v1, %v7931_v46  ;;  %v2375_v41 = vsel %vm2334_vm4, %v2251_v19, -inf  ;;  %v1989_v55 = vmax.f32 %v1933_v15, 0.0  ;;  %v4280_v22 = vcombine.high %v4278_v16, %v4278_v16  ;;  %6878 = vmatprep.subr.bf16.mxu1 %v9590_v20 }
 0x257   : > { %v2267_v35 = vrot.slane %v2253_v44, %v7931_v46  ;;  %v2376_v12 = vmax.f32 %v2235_v43, %v2375_v41  ;;  %v1932_v43 = vadd.f32 %v8635_v34, %v1766_v54  ;;  %v2210_v47 = vrot.slane %v2203_v45, %v7931_v46 }
 0x258   : > { %v2217_v28 = vrot.slane %v1976_v53, %v7931_v46  ;;  %v8695_v19 = vrot.slane %v4271_v31, %v7885_v52  ;;  %v8698_v44 = vrot.slane %v4278_v16, %v7885_v52  ;;  %v8701_v54 = vrot.slane %v4279_v37, %v7885_v52 }
 0x259   : > { %v8683_v63 = vcombine.low %v2260_v40, %v2267_v35  ;;  %v2377_v59 = vrot.slane %v2376_v12, 4  ;;  %v1988_v1 = vmax.f32 %v1932_v43, 0.0  ;;  %v8704_v41 = vrot.slane %v4280_v22, %v7885_v52 }
 0x25a   : > { %v2218_v8 = vcombine.low %v2210_v47, %v2217_v28  ;;  %v8709_v18 = vcombine.high %v8695_v19, %v8695_v19  ;;  %v8713_v36 = vcombine.high %v8698_v44, %v8698_v44  ;;  %v7062_v47 = vld [vmem:[#allocation7 + $0x8] sm:$0xff]  }
 0x25b   : > { %v2378_v11 = vmax.f32 %v2376_v12, %v2377_v59  ;;  %v2269_v40 = vcombine.low %v1988_v1, %v1989_v55  ;;  %v8725_v15 = vcombine.high %v8704_v41, %v8704_v41  ;;  %6879 = vmatpush3.bf16.msra.mxu1 %v7062_v47 }
 0x25c   : > { %v8716_v59 = vsel %vm2334_vm4, %v2218_v8, -inf  ;;  %6880 = vmatprep.subr.bf16.mxu1 %v9590_v20 }
 0x25d   : > { %v2379_v51 = vrot.slane %v2378_v11, 2  ;;  %v2276_v31 = vrot.slane %v2269_v40, %v7931_v46 }
 0x25f   : > { %v2380_v2 = vmax.f32 %v2378_v11, %v2379_v51  ;;  %v8721_v11 = vcombine.high %v8701_v54, %v8701_v54 }
 0x261   : > { %v2381_v10 = vrot.slane %v2380_v2, 1 }
 0x263   : > { %v2382_v42 = vmax.f32 %v2380_v2, %v2381_v10 }
 0x265   : > { %v2404_v35 = vpack.c.bf16 %v2382_v42, %v2382_v42 }
 0x266   : > { %v1496_v0 = vpop.f32.mrb[0].mxu0 }
 0x267   : > { %v1565_v12 = vcombine.high %v1496_v0, %v1496_v0  ;;  %v1572_v3 = vrot.slane %v1496_v0, %v7931_v46  ;;  %v6786_v26 = vpop.f32.mrb[1].mxu0  ;;  %v8729_v2 = vunpack.c.l.b16 %v2404_v35 }
 0x268   : > { %v1499_v45 = vpop.f32.mrb[2].mxu0  ;;  %v1544_v43 = vpop.f32.mrb[8].mxu1 }
 0x269   : > { %v1579_v16 = vrot.slane %v1565_v12, %v7931_v46  ;;  %v1580_v53 = vcombine.high %v1572_v3, %v1572_v3  ;;  %v1886_v51 = vadd.f32 %v8635_v34, %v1572_v3  ;;  %v1582_v25 = vcombine.high %v1499_v45, %v1499_v45  ;;  %v6787_v37 = vpop.f32.mrb[3].mxu0  ;;  %v6810_v10 = vpop.f32.mrb[9].mxu1 }
 0x26a   : > { %v1769_v55 = vcombine.high %v1544_v43, %v1544_v43  ;;  %v1776_v22 = vrot.slane %v1544_v43, %v7931_v46  ;;  %v1589_v28 = vrot.slane %v1499_v45, %v7931_v46  ;;  %v1547_v0 = vpop.f32.mrb[10].mxu1 }
 0x26b   : > { %v1581_v1 = vcombine.high %v1579_v16, %v1579_v16  ;;  %v1887_v8 = vadd.f32 %v8642_v9, %v1580_v53  ;;  %v1888_v42 = vadd.f32 %v8638_v4, %v1579_v16  ;;  %v1942_v40 = vmax.f32 %v1886_v51, 0.0  ;;  %v6811_v37 = vpop.f32.mrb[11].mxu1 }
 0x26c   : > { %v1783_v12 = vrot.slane %v1769_v55, %v7931_v46  ;;  %v1784_v3 = vcombine.high %v1776_v22, %v1776_v22  ;;  %v1934_v35 = vadd.f32 %v8638_v4, %v1776_v22  ;;  %v1596_v26 = vrot.slane %v1582_v25, %v7931_v46 }
 0x26d   : > { %v1889_v45 = vadd.f32 %v8650_v6, %v1581_v1  ;;  %v1943_v43 = vmax.f32 %v1887_v8, 0.0  ;;  %v1944_v10 = vmax.f32 %v1888_v42, 0.0  ;;  %v1597_v53 = vcombine.high %v1589_v28, %v1589_v28 }
 0x26e   : > { %v1785_v17 = vcombine.high %v1783_v12, %v1783_v12  ;;  %v1935_v16 = vadd.f32 %v8635_v34, %v1784_v3  ;;  %v1936_v51 = vadd.f32 %v8642_v9, %v1783_v12  ;;  %v1990_v47 = vmax.f32 %v1934_v35, 0.0 }
 0x26f   : > { %v1945_v55 = vmax.f32 %v1889_v45, 0.0  ;;  %v2054_v32 = vcombine.low %v1942_v40, %v1943_v43  ;;  %v1598_v13 = vcombine.high %v1596_v26, %v1596_v26  ;;  %v1890_v22 = vadd.f32 %v8635_v34, %v1589_v28 }
 0x270   : > { %v1937_v25 = vadd.f32 %v8638_v4, %v1785_v17  ;;  %v1991_v37 = vmax.f32 %v1935_v16, 0.0  ;;  %v1992_v21 = vmax.f32 %v1936_v51, 0.0  ;;  %v2283_v1 = vrot.slane %v1990_v47, %v7931_v46 }
 0x271   : > { %v1504_v8 = vpop.f32.mrb[4].mxu0  ;;  %v2055_v42 = vcombine.low %v1944_v10, %v1945_v55  ;;  %v2062_v60 = vrot.slane %v2054_v32, %v7931_v46  ;;  %v1891_v3 = vadd.f32 %v8642_v9, %v1597_v53  ;;  %v1892_v12 = vadd.f32 %v8638_v4, %v1596_v26 }
 0x272   : > { %v6790_v35 = vpop.f32.mrb[5].mxu0  ;;  %v2284_v45 = vcombine.low %v2276_v31, %v2283_v1  ;;  %v2285_v40 = vcombine.low %v1991_v37, %v1992_v21  ;;  %v8749_v43 = vadd.f32 %v8635_v34, %v1598_v13  ;;  %v1946_v28 = vmax.f32 %v1890_v22, 0.0 }
 0x273   : > { %v8751_v17 = vpop.f32.mrb[6].mxu0  ;;  %v2069_v16 = vrot.slane %v2055_v42, %v7931_v46  ;;  %v1947_v51 = vmax.f32 %v1891_v3, 0.0  ;;  %v1948_v47 = vmax.f32 %v1892_v12, 0.0  ;;  %v1786_v10 = vcombine.high %v1547_v0, %v1547_v0 }
 0x274   : > { %v6791_v55 = vpop.f32.mrb[7].mxu0  ;;  %v2293_v32 = vrot.slane %v2285_v40, %v7931_v46  ;;  %v2383_v53 = vsel %vm2334_vm4, %v2284_v45, -inf  ;;  %v1793_v26 = vrot.slane %v1547_v0, %v7931_v46  ;;  %v1993_v31 = vmax.f32 %v1937_v25, 0.0  ;;  %v7063_v25 = vld [vmem:[#allocation7 + $0x10] sm:$0xff]  }
 0x275   : > { %v2070_v21 = vcombine.low %v2062_v60, %v2069_v16  ;;  %v2384_v13 = vmax.f32 %v8683_v63, %v2383_v53  ;;  %v2071_v37 = vcombine.low %v1946_v28, %v1947_v51  ;;  %v2085_v22 = vrot.slane %v1948_v47, %v7931_v46  ;;  %6881 = vmatpush3.bf16.msra.mxu1 %v7063_v25 }
 0x276   : > { %v1800_v1 = vrot.slane %v1786_v10, %v7931_v46  ;;  %v1801_v42 = vcombine.high %v1793_v26, %v1793_v26  ;;  %v1938_v3 = vadd.f32 %v8650_v6, %v1793_v26  ;;  %v1599_v12 = vcombine.high %v1504_v8, %v1504_v8  ;;  %6882 = vmatprep.subr.bf16.mxu1 %v9590_v20 }
 0x277   : > { %v2385_v35 = vrot.slane %v2384_v13, 4  ;;  %v2078_v40 = vrot.slane %v2071_v37, %v7931_v46  ;;  %v1606_v45 = vrot.slane %v1504_v8, %v7931_v46  ;;  %v1949_v0 = vmax.f32 %v8749_v43, 0.0 }
 0x278   : > { %v1802_v60 = vcombine.high %v1800_v1, %v1800_v1  ;;  %v1939_v63 = vadd.f32 %v8635_v34, %v1801_v42  ;;  %v1940_v28 = vadd.f32 %v8642_v9, %v1800_v1  ;;  %v1994_v16 = vmax.f32 %v1938_v3, 0.0 }
 0x279   : > { %v8766_v51 = vpop.f32.mrb[8].mxu0  ;;  %v2386_v47 = vmax.f32 %v2384_v13, %v2385_v35  ;;  %v2086_v10 = vcombine.low %v2078_v40, %v2085_v22  ;;  %v1613_v55 = vrot.slane %v1599_v12, %v7931_v46  ;;  %v1614_v53 = vcombine.high %v1606_v45, %v1606_v45 }
 0x27a   : > { %v6794_v37 = vpop.f32.mrb[9].mxu0  ;;  %v1941_v8 = vadd.f32 %v8638_v4, %v1802_v60  ;;  %v1995_v43 = vmax.f32 %v1939_v63, 0.0  ;;  %v1996_v49 = vmax.f32 %v1940_v28, 0.0  ;;  %v2286_v14 = vcombine.low %v1993_v31, %v1994_v16 }
 0x27b   : > { %v8769_v26 = vpop.f32.mrb[12].mxu1  ;;  %v8772_v27 = vpop.f32.mrb[10].mxu0  ;;  %v2387_v1 = vrot.slane %v2386_v47, 2  ;;  %v2335_v13 = vsel %vm2334_vm4, %v2086_v10, -inf  ;;  %v1615_v22 = vcombine.high %v1613_v55, %v1613_v55  ;;  %v1894_v3 = vadd.f32 %v8642_v9, %v1606_v45 }
 0x27c   : > { %v6830_v42 = vpop.f32.mrb[13].mxu1  ;;  %v6795_v35 = vpop.f32.mrb[11].mxu0  ;;  %v2336_v40 = vmax.f32 %v2070_v21, %v2335_v13  ;;  %v1997_v25 = vmax.f32 %v1941_v8, 0.0  ;;  %v2300_v60 = vrot.slane %v2286_v14, %v7931_v46  ;;  %v2302_v63 = vcombine.low %v1995_v43, %v1996_v49 }
 0x27d   : > { %v8777_v12 = vpop.f32.mrb[14].mxu1  ;;  %v2388_v28 = vmax.f32 %v2386_v47, %v2387_v1  ;;  %v1895_v16 = vadd.f32 %v8638_v4, %v1614_v53  ;;  %v1896_v37 = vadd.f32 %v8650_v6, %v1613_v55  ;;  %v1897_v42 = vadd.f32 %v8635_v34, %v1615_v22 }
 0x27e   : > { %v6831_v31 = vpop.f32.mrb[15].mxu1  ;;  %v2337_v10 = vrot.slane %v2336_v40, 4  ;;  %v2301_v39 = vcombine.low %v2293_v32, %v2300_v60  ;;  %v2309_v45 = vrot.slane %v2302_v63, %v7931_v46  ;;  %v2316_v30 = vrot.slane %v1997_v25, %v7931_v46  ;;  %v7064_v25 = vld [vmem:[#allocation7 + $0x18] sm:$0xff]  }
 0x27f   : > { %v2389_v35 = vrot.slane %v2388_v28, 1  ;;  %v1950_v21 = vmax.f32 %v1894_v3, 0.0  ;;  %v1951_v8 = vmax.f32 %v1895_v16, 0.0  ;;  %v1952_v13 = vmax.f32 %v1896_v37, 0.0  ;;  %6883 = vmatpush3.bf16.msra.mxu1 %v7064_v25 }
 0x280   : > { %v2338_v14 = vmax.f32 %v2336_v40, %v2337_v10  ;;  %v2317_v49 = vcombine.low %v2309_v45, %v2316_v30  ;;  %v1616_v47 = vcombine.high %v8751_v17, %v8751_v17  ;;  %v1623_v55 = vrot.slane %v8751_v17, %v7931_v46  ;;  %6884 = vmatprep.subr.bf16.mxu1 %v9590_v20 }
 0x281   : > { %v8789_v53 = vpop.f32.mrb[12].mxu0  ;;  %v2390_v43 = vmax.f32 %v2388_v28, %v2389_v35  ;;  %v2087_v32 = vcombine.low %v1949_v0, %v1950_v21  ;;  %v2088_v1 = vcombine.low %v1951_v8, %v1952_v13  ;;  %v1953_v22 = vmax.f32 %v1897_v42, 0.0 }
 0x282   : > { %v6798_v60 = vpop.f32.mrb[13].mxu0  ;;  %v2339_v63 = vrot.slane %v2338_v14, 2  ;;  %v2391_v3 = vsel %vm2334_vm4, %v2317_v49, -inf  ;;  %v1630_v40 = vrot.slane %v1616_v47, %v7931_v46  ;;  %v1631_v30 = vcombine.high %v1623_v55, %v1623_v55 }
 0x283   : > { %v8793_v31 = vpop.f32.mrb[14].mxu0  ;;  %v2405_v16 = vpack.c.bf16 %v2390_v43, %v2390_v43  ;;  %v2392_v37 = vmax.f32 %v2301_v39, %v2391_v3  ;;  %v2095_v17 = vrot.slane %v2087_v32, %v7931_v46  ;;  %v2102_v10 = vrot.slane %v2088_v1, %v7931_v46 }
 0x284   : > { %v6799_v28 = vpop.f32.mrb[15].mxu0  ;;  %v2340_v0 = vmax.f32 %v2338_v14, %v2339_v63  ;;  %v1632_v42 = vcombine.high %v1630_v40, %v1630_v40  ;;  %v1898_v45 = vadd.f32 %v8642_v9, %v1623_v55  ;;  %v1899_v35 = vadd.f32 %v8638_v4, %v1631_v30 }
 0x285   : > { %v8799_v21 = vpop.f32.mrb[16].mxu1  ;;  %v8802_v8 = vunpack.c.l.b16 %v2405_v16  ;;  %v2393_v13 = vrot.slane %v2392_v37, 4  ;;  %v2103_v39 = vcombine.low %v2095_v17, %v2102_v10  ;;  %v1900_v49 = vadd.f32 %v8635_v34, %v1630_v40 }
 0x286   : > { %v6834_v47 = vpop.f32.mrb[17].mxu1  ;;  %v2341_v43 = vrot.slane %v2340_v0, 1  ;;  %v1901_v32 = vadd.f32 %v8642_v9, %v1632_v42  ;;  %v1954_v14 = vmax.f32 %v1898_v45, 0.0  ;;  %v1955_v1 = vmax.f32 %v1899_v35, 0.0 }
 0x287   : > { %v8806_v60 = vpop.f32.mrb[18].mxu1  ;;  %v2394_v55 = vmax.f32 %v2392_v37, %v2393_v13  ;;  %v1956_v25 = vmax.f32 %v1900_v49, 0.0  ;;  %v1633_v63 = vcombine.high %v8766_v51, %v8766_v51  ;;  %v1640_v3 = vrot.slane %v8766_v51, %v7931_v46 }
 0x288   : > { %v6835_v30 = vpop.f32.mrb[19].mxu1  ;;  %v2342_v16 = vmax.f32 %v2340_v0, %v2341_v43  ;;  %v1957_v17 = vmax.f32 %v1901_v32, 0.0  ;;  %v2104_v40 = vcombine.low %v1953_v22, %v1954_v14  ;;  %v2118_v10 = vrot.slane %v1955_v1, %v7931_v46 }
 0x289   : > { %v2395_v28 = vrot.slane %v2394_v55, 2  ;;  %v1647_v42 = vrot.slane %v1633_v63, %v7931_v46  ;;  %v1648_v45 = vcombine.high %v1640_v3, %v1640_v3  ;;  %v1902_v35 = vadd.f32 %v8638_v4, %v1640_v3 }
 0x28a   : > { %v2399_v37 = vpack.c.bf16 %v2342_v16, %v2342_v16  ;;  %v2111_v13 = vrot.slane %v2104_v40, %v7931_v46  ;;  %v2120_v49 = vcombine.low %v1956_v25, %v1957_v17  ;;  %v3517_v47 = vcombine.high %v8769_v26, %v8769_v26 }
 0x28b   : > { %v8818_v51 = vmax.f32 %v2394_v55, %v2395_v28  ;;  %v1649_v0 = vcombine.high %v1647_v42, %v1647_v42  ;;  %v1903_v22 = vadd.f32 %v8650_v6, %v1648_v45  ;;  %v1904_v43 = vadd.f32 %v8635_v34, %v1647_v42 }
 0x28c   : > { %v8822_v32 = vunpack.c.l.b16 %v2399_v37  ;;  %v2119_v14 = vcombine.low %v2111_v13, %v2118_v10  ;;  %v2128_v1 = vrot.slane %v2120_v49, %v7931_v46  ;;  %v1958_v63 = vmax.f32 %v1902_v35, 0.0  ;;  %v7065_v35 = vld [vmem:[#allocation7 + $0x20] sm:$0xff]  }
 0x28d   : > { %v8825_v3 = vpop.f32.mrb[20].mxu1  ;;  %v1905_v30 = vadd.f32 %v8642_v9, %v1649_v0  ;;  %v1959_v16 = vmax.f32 %v1903_v22, 0.0  ;;  %v1960_v55 = vmax.f32 %v1904_v43, 0.0  ;;  %v3524_v28 = vrot.slane %v8769_v26, %v7885_v52  ;;  %6885 = vmatpush3.bf16.msra.mxu1 %v7065_v35 }
 0x28e   : > { %v6838_v17 = vpop.f32.mrb[21].mxu1  ;;  %v2343_v40 = vsel %vm2334_vm4, %v2119_v14, -inf  ;;  %v3531_v42 = vrot.slane %v3517_v47, %v7885_v52  ;;  %v1650_v10 = vcombine.high %v8772_v27, %v8772_v27  ;;  %v1657_v0 = vrot.slane %v8772_v27, %v7931_v46  ;;  %6886 = vmatprep.subr.bf16.mxu1 %v9590_v20 }
 0x28f   : > { %v8835_v45 = vpop.f32.mrb[22].mxu1  ;;  %v2344_v37 = vmax.f32 %v2103_v39, %v2343_v40  ;;  %v1961_v13 = vmax.f32 %v1905_v30, 0.0  ;;  %v2121_v49 = vcombine.low %v1958_v63, %v1959_v16  ;;  %v3532_v43 = vcombine.high %v3524_v28, %v3524_v28 }
 0x290   : > { %v6839_v22 = vpop.f32.mrb[23].mxu1  ;;  %v3533_v14 = vcombine.high %v3531_v42, %v3531_v42  ;;  %v3540_v17 = vrot.slane %v3524_v28, %v7885_v52  ;;  %v3547_v26 = vrot.slane %v3531_v42, %v7885_v52  ;;  %v1664_v39 = vrot.slane %v1650_v10, %v7931_v46 }
 0x291   : > { %v2345_v47 = vrot.slane %v2344_v37, 4  ;;  %v2135_v58 = vrot.slane %v2121_v49, %v7931_v46  ;;  %v8842_v23 = vcombine.low %v1960_v55, %v1961_v13  ;;  %v3554_v63 = vrot.slane %v3532_v43, %v7885_v52  ;;  %6887 = vmatpush3.bf16.msra.mxu1 %v7066_v5 }
 0x292   : > { %v3561_v27 = vrot.slane %v3533_v14, %v7885_v52  ;;  %v3562_v30 = vcombine.high %v3540_v17, %v3540_v17  ;;  %v3563_v16 = vcombine.high %v3547_v26, %v3547_v26  ;;  %v4321_v42 = vadd.f32 %v8695_v19, %v3540_v17  ;;  %6888 = vmatprep.subr.bf16.mxu1 %v9590_v20 }
 0x293   : > { %v2346_v40 = vmax.f32 %v2344_v37, %v2345_v47  ;;  %v8848_v28 = vcombine.low %v2128_v1, %v2135_v58  ;;  %v4325_v35 = vadd.f32 %v8698_v44, %v3547_v26  ;;  %v3564_v49 = vcombine.high %v3554_v63, %v3554_v63 }
 0x294   : > { %v3565_v55 = vcombine.high %v3561_v27, %v3561_v27  ;;  %v4322_v13 = vadd.f32 %v8701_v54, %v3554_v63  ;;  %v4323_v10 = vadd.f32 %v8709_v18, %v3562_v30  ;;  %v4326_v14 = vadd.f32 %v8704_v41, %v3561_v27 }
 0x295   : > { %v2347_v43 = vrot.slane %v2346_v40, 2  ;;  %v4327_v25 = vadd.f32 %v8713_v36, %v3563_v16  ;;  %v4425_v37 = vmax.f32 %v4321_v42, 0.0  ;;  %v4324_v1 = vadd.f32 %v8721_v11, %v3564_v49 }
 0x296   : > { %v8854_v22 = vpop.f32.mrb[24].mxu1  ;;  %v4328_v17 = vadd.f32 %v8725_v15, %v3565_v55  ;;  %v4426_v26 = vmax.f32 %v4322_v13, 0.0  ;;  %v4427_v47 = vmax.f32 %v4323_v10, 0.0  ;;  %v4429_v30 = vmax.f32 %v4325_v35, 0.0 }
 0x297   : > { %v6842_v58 = vpop.f32.mrb[25].mxu1  ;;  %v2348_v63 = vmax.f32 %v2346_v40, %v2347_v43  ;;  %v4430_v24 = vmax.f32 %v4326_v14, 0.0  ;;  %v4431_v56 = vmax.f32 %v4327_v25, 0.0  ;;  %v4428_v62 = vmax.f32 %v4324_v1, 0.0 }
 0x298   : > { %v8860_v57 = vpop.f32.mrb[26].mxu1  ;;  %v4432_v27 = vmax.f32 %v4328_v17, 0.0  ;;  %v4633_v29 = vcombine.low %v4425_v37, %v4426_v26  ;;  %v1665_v16 = vcombine.high %v1657_v0, %v1657_v0  ;;  %v1666_v38 = vcombine.high %v1664_v39, %v1664_v39 }
 0x299   : > { %v6843_v33 = vpop.f32.mrb[27].mxu1  ;;  %v2349_v42 = vrot.slane %v2348_v63, 1  ;;  %v4635_v58 = vcombine.low %v4429_v30, %v4430_v24  ;;  %v1906_v49 = vadd.f32 %v8638_v4, %v1657_v0  ;;  %v4634_v55 = vcombine.low %v4427_v47, %v4428_v62 }
 0x29a   : > { %v4636_v13 = vcombine.low %v4431_v56, %v4432_v27  ;;  %v4643_v10 = vrot.slane %v4633_v29, %v7885_v52  ;;  %v1907_v40 = vadd.f32 %v8635_v34, %v1665_v16  ;;  %v1908_v33 = vadd.f32 %v8642_v9, %v1664_v39 }
 0x29b   : > { %v2350_v35 = vmax.f32 %v2348_v63, %v2349_v42  ;;  %v4657_v25 = vrot.slane %v4635_v58, %v7885_v52  ;;  %v8868_v43 = vadd.f32 %v8638_v4, %v1666_v38  ;;  %v4650_v24 = vrot.slane %v4634_v55, %v7885_v52 }
 0x29c   : > { %v4664_v0 = vrot.slane %v4636_v13, %v7885_v52  ;;  %v1962_v14 = vmax.f32 %v1906_v49, 0.0  ;;  %v1963_v62 = vmax.f32 %v1907_v40, 0.0  ;;  %v1964_v37 = vmax.f32 %v1908_v33, 0.0 }
 0x29d   : > { %v2400_v29 = vpack.c.bf16 %v2350_v35, %v2350_v35  ;;  %v2144_v1 = vrot.slane %v8842_v23, %v7931_v46  ;;  %v3566_v38 = vcombine.high %v8777_v12, %v8777_v12  ;;  %v4665_v5 = vcombine.low %v4643_v10, %v4650_v24 }
 0x29e   : > { %v8872_v56 = vpop.f32.mrb[28].mxu1  ;;  %v4666_v17 = vcombine.low %v4657_v25, %v4664_v0  ;;  %v2151_v26 = vrot.slane %v1962_v14, %v7931_v46  ;;  %v3573_v47 = vrot.slane %v8777_v12, %v7885_v52  ;;  %v8884_v27 = vcombine.low %v1963_v62, %v1964_v37 }
 0x29f   : > { %v6846_v39 = vpop.f32.mrb[29].mxu1  ;;  %v5571_v30 = vunpack.c.l.b16 %v2400_v29  ;;  %v3580_v16 = vrot.slane %v3566_v38, %v7885_v52  ;;  %v1667_v23 = vcombine.high %v8789_v53, %v8789_v53  ;;  %v4673_v58 = vrot.slane %v4665_v5, %v7885_v52 }
 0x2a0   : > { %v8882_v63 = vpop.f32.mrb[30].mxu1  ;;  %v4680_v49 = vrot.slane %v4666_v17, %v7885_v52  ;;  %v2152_v55 = vcombine.low %v2144_v1, %v2151_v26  ;;  %v3581_v13 = vcombine.high %v3573_v47, %v3573_v47  ;;  %v3589_v35 = vrot.slane %v3573_v47, %v7885_v52 }
 0x2a1   : > { %v6847_v42 = vpop.f32.mrb[31].mxu1  ;;  %v8893_v12 = vsel %vm5458_vm5, %v5571_v30, %v8822_v32  ;;  %v3582_v40 = vcombine.high %v3580_v16, %v3580_v16  ;;  %v3596_v24 = vrot.slane %v3580_v16, %v7885_v52 }
 0x2a2   : > { %v8898_v25 = vcombine.low %v4673_v58, %v4680_v49  ;;  %v2351_v33 = vsel %vm2334_vm4, %v2152_v55, -inf  ;;  %v3603_v0 = vrot.slane %v3581_v13, %v7885_v52  ;;  %v3611_v32 = vcombine.high %v3589_v35, %v3589_v35 }
 0x2a3   : > { %v2352_v14 = vmax.f32 %v8848_v28, %v2351_v33  ;;  %v8905_v62 = vrot.slane %v3582_v40, %v7885_v52  ;;  %v4329_v29 = vadd.f32 %v8695_v19, %v3589_v35  ;;  %v3612_v37 = vcombine.high %v3596_v24, %v3596_v24 }
 0x2a4   : > { %v3613_v1 = vcombine.high %v3603_v0, %v3603_v0  ;;  %v4330_v38 = vadd.f32 %v8701_v54, %v3603_v0  ;;  %v4333_v39 = vadd.f32 %v8698_v44, %v3596_v24  ;;  %v4331_v28 = vadd.f32 %v8709_v18, %v3611_v32  ;;  %v7067_v0 = vld [vmem:[#allocation7 + $0x30] sm:$0xff]  }
 0x2a5   : > { %v2353_v17 = vrot.slane %v2352_v14, 4  ;;  %v4334_v47 = vadd.f32 %v8695_v19, %v8905_v62  ;;  %v4335_v42 = vadd.f32 %v8701_v54, %v3612_v37  ;;  %v4433_v58 = vmax.f32 %v4329_v29, 0.0  ;;  %6889 = vmatpush3.bf16.msra.mxu1 %v7067_v0 }
 0x2a6   : > { %v4332_v16 = vadd.f32 %v8721_v11, %v3613_v1  ;;  %v4434_v49 = vmax.f32 %v4330_v38, 0.0  ;;  %v4435_v40 = vmax.f32 %v4331_v28, 0.0  ;;  %v4437_v35 = vmax.f32 %v4333_v39, 0.0  ;;  %6890 = vmatprep.subr.bf16.mxu1 %v9590_v20 }
 0x2a7   : > { %v8910_v5 = vpop.f32.mrb[32].mxu1  ;;  %v2354_v13 = vmax.f32 %v2352_v14, %v2353_v17  ;;  %v4438_v33 = vmax.f32 %v4334_v47, 0.0  ;;  %v4439_v32 = vmax.f32 %v4335_v42, 0.0  ;;  %v1681_v29 = vrot.slane %v1667_v23, %v7931_v46 }
 0x2a8   : > { %v6850_v30 = vpop.f32.mrb[33].mxu1  ;;  %v4436_v26 = vmax.f32 %v4332_v16, 0.0  ;;  %v4682_v10 = vcombine.low %v4433_v58, %v4434_v49  ;;  %v4704_v1 = vrot.slane %v4437_v35, %v7885_v52  ;;  %v1965_v37 = vmax.f32 %v8868_v43, 0.0 }
 0x2a9   : > { %v8919_v55 = vpop.f32.mrb[34].mxu1  ;;  %v1674_v30 = vrot.slane %v8789_v53, %v7931_v46  ;;  %v2355_v50 = vrot.slane %v2354_v13, 2  ;;  %v8927_v39 = vcombine.low %v4438_v33, %v4439_v32  ;;  %v1683_v47 = vcombine.high %v1681_v29, %v1681_v29 }
 0x2aa   : > { %v6851_v24 = vpop.f32.mrb[35].mxu1  ;;  %v4683_v14 = vcombine.low %v4435_v40, %v4436_v26  ;;  %v4690_v38 = vrot.slane %v4682_v10, %v7885_v52  ;;  %v4719_v53 = vrot.slane %v4704_v1, %v7885_v52  ;;  %v1912_v42 = vadd.f32 %v8642_v9, %v1681_v29 }
 0x2ab   : > { %v1682_v17 = vcombine.high %v1674_v30, %v1674_v30  ;;  %v2356_v28 = vmax.f32 %v2354_v13, %v2355_v50  ;;  %v1910_v16 = vadd.f32 %v8650_v6, %v1674_v30  ;;  %v3615_v10 = vcombine.high %v8799_v21, %v8799_v21 }
 0x2ac   : > { %v4697_v23 = vrot.slane %v4683_v14, %v7885_v52  ;;  %v1913_v58 = vadd.f32 %v8638_v4, %v1683_v47  ;;  %v3622_v50 = vrot.slane %v8799_v21, %v7885_v52  ;;  %v1968_v33 = vmax.f32 %v1912_v42, 0.0  ;;  %v7068_v21 = vld [vmem:[#allocation7 + $0x38] sm:$0xff]  }
 0x2ad   : > { %v1911_v43 = vadd.f32 %v8635_v34, %v1682_v17  ;;  %v2357_v26 = vrot.slane %v2356_v28, 1  ;;  %v1966_v49 = vmax.f32 %v1910_v16, 0.0  ;;  %v3629_v24 = vrot.slane %v3615_v10, %v7885_v52  ;;  %6891 = vmatpush3.bf16.msra.mxu1 %v7068_v21 }
 0x2ae   : > { %v4705_v40 = vcombine.low %v4690_v38, %v4697_v23  ;;  %v1969_v30 = vmax.f32 %v1913_v58, 0.0  ;;  %v3630_v29 = vcombine.high %v3622_v50, %v3622_v50  ;;  %v3638_v7 = vrot.slane %v3622_v50, %v7885_v52  ;;  %6896 = vmatprep.subr.bf16.mxu1 %v9590_v20 }
 0x2af   : > { %v8940_v13 = vpop.f32.mrb[36].mxu1  ;;  %v1967_v35 = vmax.f32 %v1911_v43, 0.0  ;;  %v2358_v32 = vmax.f32 %v2356_v28, %v2357_v26  ;;  %v2154_v1 = vcombine.low %v1965_v37, %v1966_v49  ;;  %v3631_v16 = vcombine.high %v3629_v24, %v3629_v24 }
 0x2b0   : > { %v6854_v0 = vpop.f32.mrb[37].mxu1  ;;  %v4712_v17 = vrot.slane %v4705_v40, %v7885_v52  ;;  %v2184_v23 = vrot.slane %v1969_v30, %v7931_v46  ;;  %v3645_v43 = vrot.slane %v3629_v24, %v7885_v52  ;;  %v3652_v42 = vrot.slane %v3630_v29, %v7885_v52 }
 0x2b1   : > { %v3501_v14 = vpop.f32.mrb[38].mxu1  ;;  %v2170_v47 = vcombine.low %v1967_v35, %v1968_v33  ;;  %v2401_v61 = vpack.c.bf16 %v2358_v32, %v2358_v32  ;;  %v2168_v38 = vrot.slane %v2154_v1, %v7931_v46  ;;  %v8951_v10 = vrot.slane %v3631_v16, %v7885_v52 }
 0x2b2   : > { %v6855_v48 = vpop.f32.mrb[39].mxu1  ;;  %v4720_v28 = vcombine.low %v4712_v17, %v4719_v53  ;;  %v3660_v49 = vcombine.high %v3638_v7, %v3638_v7  ;;  %v3661_v50 = vcombine.high %v3645_v43, %v3645_v43  ;;  %v3662_v35 = vcombine.high %v3652_v42, %v3652_v42 }
 0x2b3   : > { %v2177_v37 = vrot.slane %v2170_v47, %v7931_v46  ;;  %v5572_v26 = vunpack.c.l.b16 %v2401_v61  ;;  %v9645_v48 = vrot.slane %v8884_v27, %v7931_v46  ;;  %v3663_v33 = vcombine.high %v8951_v10, %v8951_v10 }
 0x2b4   : > { %v5354_v40 = vsel %vm5353_vm6, %v4720_v28, -inf  ;;  %v9646_v27 = vcombine.high %v8905_v62, %v8905_v62  ;;  %v4337_v32 = vadd.f32 %v8721_v11, %v3638_v7  ;;  %v4338_v1 = vadd.f32 %v8698_v44, %v3652_v42 }
 0x2b5   : > { %v2169_v58 = vcombine.low %v9645_v48, %v2168_v38  ;;  %v2185_v53 = vcombine.low %v2177_v37, %v2184_v23  ;;  %v8962_v24 = vsel %vm5460_vm7, %v5572_v26, %v8893_v12  ;;  %v5355_v61 = vmax.f32 %v8898_v25, %v5354_v40 }
 0x2b6   : > { %v4336_v0 = vadd.f32 %v8709_v18, %v9646_v27  ;;  %v4339_v29 = vadd.f32 %v8704_v41, %v3660_v49  ;;  %v4340_v14 = vadd.f32 %v8713_v36, %v3662_v35  ;;  %v4341_v47 = vadd.f32 %v8725_v15, %v3645_v43 }
 0x2b7   : > { %v2359_v30 = vsel %vm2334_vm4, %v2185_v53, -inf  ;;  %v5356_v17 = vrot.slane %v5355_v61, 4  ;;  %v4342_v25 = vadd.f32 %v8695_v19, %v8951_v10  ;;  %v4343_v62 = vadd.f32 %v8701_v54, %v3661_v50 }
 0x2b8   : > { %v2360_v12 = vmax.f32 %v2169_v58, %v2359_v30  ;;  %v4440_v16 = vmax.f32 %v4336_v0, 0.0  ;;  %v4441_v21 = vmax.f32 %v4337_v32, 0.0  ;;  %v4442_v7 = vmax.f32 %v4338_v1, 0.0 }
 0x2b9   : > { %v5357_v38 = vmax.f32 %v5355_v61, %v5356_v17  ;;  %v4443_v28 = vmax.f32 %v4339_v29, 0.0  ;;  %v4444_v37 = vmax.f32 %v4340_v14, 0.0  ;;  %v4445_v42 = vmax.f32 %v4341_v47, 0.0 }
 0x2ba   : > { %v2361_v23 = vrot.slane %v2360_v12, 4  ;;  %v4446_v26 = vmax.f32 %v4342_v25, 0.0  ;;  %v4447_v48 = vmax.f32 %v4343_v62, 0.0  ;;  %v4722_v49 = vcombine.low %v4440_v16, %v4441_v21 }
 0x2bb   : > { %v5358_v40 = vrot.slane %v5357_v38, 2  ;;  %v4723_v53 = vcombine.low %v4442_v7, %v4443_v28  ;;  %v4731_v43 = vrot.slane %v8927_v39, %v7885_v52  ;;  %v4724_v35 = vcombine.low %v4444_v37, %v4445_v42 }
 0x2bc   : > { %v2362_v58 = vmax.f32 %v2360_v12, %v2361_v23  ;;  %v4738_v50 = vrot.slane %v4722_v49, %v7885_v52  ;;  %v8981_v27 = vcombine.low %v4446_v26, %v4447_v48  ;;  %v1684_v61 = vcombine.high %v8793_v31, %v8793_v31 }
 0x2bd   : > { %v5359_v0 = vmax.f32 %v5357_v38, %v5358_v40  ;;  %v4745_v30 = vrot.slane %v4723_v53, %v7885_v52  ;;  %v1691_v1 = vrot.slane %v8793_v31, %v7931_v46  ;;  %v4752_v29 = vrot.slane %v4724_v35, %v7885_v52 }
 0x2be   : > { %v2363_v32 = vrot.slane %v2362_v58, 2  ;;  %v4753_v14 = vcombine.low %v4731_v43, %v4738_v50  ;;  %v1698_v39 = vrot.slane %v1684_v61, %v7931_v46  ;;  %v3664_v17 = vcombine.high %v8806_v60, %v8806_v60 }
 0x2bf   : > { %v5360_v12 = vrot.slane %v5359_v0, 1  ;;  %v1699_v25 = vcombine.high %v1691_v1, %v1691_v1  ;;  %v1914_v62 = vadd.f32 %v8635_v34, %v1691_v1  ;;  %v4754_v16 = vcombine.low %v4745_v30, %v4752_v29 }
 0x2c0   : > { %v2364_v47 = vmax.f32 %v2362_v58, %v2363_v32  ;;  %v4761_v21 = vrot.slane %v4753_v14, %v7885_v52  ;;  %v1700_v7 = vcombine.high %v1698_v39, %v1698_v39  ;;  %v1916_v38 = vadd.f32 %v8638_v4, %v1698_v39 }
 0x2c1   : > { %v5361_v31 = vmax.f32 %v5359_v0, %v5360_v12  ;;  %v1915_v28 = vadd.f32 %v8642_v9, %v1699_v25  ;;  %v1970_v37 = vmax.f32 %v1914_v62, 0.0  ;;  %v4768_v42 = vrot.slane %v4754_v16, %v7885_v52 }
 0x2c2   : > { %v2365_v23 = vrot.slane %v2364_v47, 1  ;;  %v1917_v26 = vadd.f32 %v8650_v6, %v1700_v7  ;;  %v1972_v48 = vmax.f32 %v1916_v38, 0.0  ;;  %v3671_v49 = vrot.slane %v8806_v60, %v7885_v52 }
 0x2c3   : > { %v5418_v34 = vpack.c.bf16 %v5361_v31, %v5361_v31  ;;  %v1971_v58 = vmax.f32 %v1915_v28, 0.0  ;;  %v3678_v53 = vrot.slane %v3664_v17, %v7885_v52  ;;  %v9001_v43 = vcombine.low %v4761_v21, %v4768_v42 }
 0x2c4   : > { %v2366_v40 = vmax.f32 %v2364_v47, %v2365_v23  ;;  %v1973_v4 = vmax.f32 %v1917_v26, 0.0  ;;  %v3679_v35 = vcombine.high %v3671_v49, %v3671_v49  ;;  %v3687_v9 = vrot.slane %v3671_v49, %v7885_v52 }
 0x2c5   : > { %v9004_v50 = vunpack.c.l.b16 %v5418_v34  ;;  %v2186_v0 = vcombine.low %v1970_v37, %v1971_v58  ;;  %v3680_v6 = vcombine.high %v3678_v53, %v3678_v53  ;;  %v3694_v30 = vrot.slane %v3678_v53, %v7885_v52 }
 0x2c6   : > { %v2402_v61 = vpack.c.bf16 %v2366_v40, %v2366_v40  ;;  %v2187_v32 = vcombine.low %v1972_v48, %v1973_v4  ;;  %v3701_v60 = vrot.slane %v3679_v35, %v7885_v52  ;;  %v3709_v1 = vcombine.high %v3687_v9, %v3687_v9  ;;  %v7069_v40 = vld [vmem:[#allocation10] sm:$0xff]  }
 0x2c7   : > { %v2194_v14 = vrot.slane %v2186_v0, %v7931_v46  ;;  %v3708_v39 = vrot.slane %v3680_v6, %v7885_v52  ;;  %v4344_v17 = vadd.f32 %v8709_v18, %v3663_v33  ;;  %v3710_v47 = vcombine.high %v3694_v30, %v3694_v30  ;;  %6857 = vmatpush3.bf16.msra.mxu0 %v7069_v40 }
 0x2c8   : > { %v9008_v29 = vunpack.c.l.b16 %v2402_v61  ;;  %v2201_v12 = vrot.slane %v2187_v32, %v7931_v46  ;;  %v3711_v25 = vcombine.high %v3701_v60, %v3701_v60  ;;  %v4345_v62 = vadd.f32 %v8721_v11, %v3687_v9  ;;  %v7070_v32 = vld [vmem:[#allocation10 + $0x8] sm:$0xff]   ;;  %6858 = vmatprep.subr.bf16.mxu0 %v9590_v20 }
 0x2c9   : > { %v3712_v16 = vcombine.high %v3708_v39, %v3708_v39  ;;  %v4346_v21 = vadd.f32 %v8698_v44, %v3701_v60  ;;  %v4347_v7 = vadd.f32 %v8695_v19, %v3709_v1  ;;  %v4349_v38 = vadd.f32 %v8709_v18, %v3694_v30 }
 0x2ca   : > { %v2202_v31 = vcombine.low %v2194_v14, %v2201_v12  ;;  %v4348_v23 = vadd.f32 %v8701_v54, %v3711_v25  ;;  %v4350_v10 = vadd.f32 %v8721_v11, %v3708_v39  ;;  %v4351_v33 = vadd.f32 %v8698_v44, %v3710_v47 }
 0x2cb   : > { %v4352_v46 = vadd.f32 %v8704_v41, %v3712_v16  ;;  %v4448_v28 = vmax.f32 %v4344_v17, 0.0  ;;  %v4449_v37 = vmax.f32 %v4345_v62, 0.0  ;;  %v4450_v42 = vmax.f32 %v4346_v21, 0.0  ;;  %6859 = vmatpush3.bf16.msra.mxu0 %v7070_v32 }
 0x2cc   : > { %v2368_v26 = vmax.f32 %v2202_v31, %v8716_v59  ;;  %v4451_v48 = vmax.f32 %v4347_v7, 0.0  ;;  %v4452_v49 = vmax.f32 %v4348_v23, 0.0  ;;  %v4453_v34 = vmax.f32 %v4349_v38, 0.0  ;;  %v7071_v31 = vld [vmem:[#allocation10 + $0x10] sm:$0xff]   ;;  %6860 = vmatprep.subr.bf16.mxu0 %v9590_v20 }
 0x2cd   : > { %v4454_v58 = vmax.f32 %v4350_v10, 0.0  ;;  %v4455_v53 = vmax.f32 %v4351_v33, 0.0  ;;  %v4456_v4 = vmax.f32 %v4352_v46, 0.0  ;;  %v4771_v35 = vcombine.low %v4448_v28, %v4449_v37 }
 0x2ce   : > { %v2369_v9 = vrot.slane %v2368_v26, 4  ;;  %v4778_v61 = vrot.slane %v8981_v27, %v7885_v52  ;;  %v4792_v0 = vrot.slane %v4450_v42, %v7885_v52  ;;  %v4809_v6 = vcombine.low %v4451_v48, %v4452_v49 }
 0x2cf   : > { %v4785_v30 = vrot.slane %v4771_v35, %v7885_v52  ;;  %v4810_v59 = vcombine.low %v4453_v34, %v4454_v58  ;;  %v9030_v60 = vcombine.low %v4455_v53, %v4456_v4  ;;  %v3713_v1 = vcombine.high %v8825_v3, %v8825_v3  ;;  %6861 = vmatpush3.bf16.msra.mxu0 %v7071_v31  ;;  %v7072_v35 = vld [vmem:[#allocation10 + $0x18] sm:$0xff]  }
 0x2d0   : > { %v2370_v14 = vmax.f32 %v2368_v26, %v2369_v9  ;;  %v4807_v39 = vrot.slane %v4792_v0, %v7885_v52  ;;  %v4819_v27 = vrot.slane %v4809_v6, %v7885_v52  ;;  %v3720_v17 = vrot.slane %v8825_v3, %v7885_v52  ;;  %6862 = vmatprep.subr.bf16.mxu0 %v9590_v20 }
 0x2d1   : > { %v4793_v12 = vcombine.low %v4778_v61, %v4785_v30  ;;  %v4826_v47 = vrot.slane %v4810_v59, %v7885_v52  ;;  %v3727_v25 = vrot.slane %v3713_v1, %v7885_v52  ;;  %v4833_v62 = vrot.slane %v9030_v60, %v7885_v52 }
 0x2d2   : > { %v2371_v16 = vrot.slane %v2370_v14, 2  ;;  %v3728_v21 = vcombine.high %v3720_v17, %v3720_v17  ;;  %v3736_v7 = vrot.slane %v3720_v17, %v7885_v52  ;;  %v3762_v38 = vcombine.high %v8835_v45, %v8835_v45 }
 0x2d3   : > { %v4800_v23 = vrot.slane %v4793_v12, %v7885_v52  ;;  %v9047_v3 = vcombine.low %v4819_v27, %v4826_v47  ;;  %v3729_v10 = vcombine.high %v3727_v25, %v3727_v25  ;;  %v3743_v33 = vrot.slane %v3727_v25, %v7885_v52  ;;  %6863 = vmatpush3.bf16.msra.mxu0 %v7072_v35 }
 0x2d4   : > { %v2372_v46 = vmax.f32 %v2370_v14, %v2371_v16  ;;  %v3750_v28 = vrot.slane %v3728_v21, %v7885_v52  ;;  %v3758_v37 = vcombine.high %v3736_v7, %v3736_v7  ;;  %v4353_v42 = vadd.f32 %v8713_v36, %v3736_v7  ;;  %v7073_v21 = vld [vmem:[#allocation10 + $0x20] sm:$0xff]   ;;  %6864 = vmatprep.subr.bf16.mxu0 %v9590_v20 }
 0x2d5   : > { %v4808_v26 = vcombine.low %v4800_v23, %v4807_v39  ;;  %v4849_v48 = vrot.slane %v9047_v3, %v7885_v52  ;;  %v3757_v49 = vrot.slane %v3729_v10, %v7885_v52  ;;  %v3759_v34 = vcombine.high %v3743_v33, %v3743_v33 }
 0x2d6   : > { %v2373_v40 = vrot.slane %v2372_v46, 1  ;;  %v3760_v58 = vcombine.high %v3750_v28, %v3750_v28  ;;  %v4354_v53 = vadd.f32 %v8725_v15, %v3750_v28  ;;  %v4355_v4 = vadd.f32 %v8695_v19, %v3758_v37 }
 0x2d7   : > { %v5362_v9 = vsel %vm5353_vm6, %v4808_v26, -inf  ;;  %v3761_v61 = vcombine.high %v3757_v49, %v3757_v49  ;;  %v4357_v0 = vadd.f32 %v8709_v18, %v3743_v33  ;;  %v4358_v6 = vadd.f32 %v8721_v11, %v3757_v49  ;;  %6865 = vmatpush3.bf16.msra.mxu0 %v7073_v21 }
 0x2d8   : > { %v2374_v32 = vmax.f32 %v2372_v46, %v2373_v40  ;;  %v5363_v30 = vmax.f32 %v9001_v43, %v5362_v9  ;;  %v4356_v59 = vadd.f32 %v8701_v54, %v3760_v58  ;;  %v4359_v1 = vadd.f32 %v8698_v44, %v3759_v34  ;;  %v7074_v58 = vld [vmem:[#allocation10 + $0x28] sm:$0xff]   ;;  %6866 = vmatprep.subr.bf16.mxu0 %v9590_v20 }
 0x2d9   : > { %v4457_v14 = vmax.f32 %v4353_v42, 0.0  ;;  %v4458_v39 = vmax.f32 %v4354_v53, 0.0  ;;  %v4459_v27 = vmax.f32 %v4355_v4, 0.0  ;;  %v4461_v17 = vmax.f32 %v4357_v0, 0.0 }
 0x2da   : > { %v2403_v12 = vpack.c.bf16 %v2374_v32, %v2374_v32  ;;  %v5364_v47 = vrot.slane %v5363_v30, 4  ;;  %v4460_v25 = vmax.f32 %v4356_v59, 0.0  ;;  %v4462_v16 = vmax.f32 %v4358_v6, 0.0 }
 0x2db   : > { %v4463_v7 = vmax.f32 %v4359_v1, 0.0  ;;  %v4812_v31 = vcombine.low %v4457_v14, %v4458_v39  ;;  %v3769_v23 = vrot.slane %v8835_v45, %v7885_v52  ;;  %v3776_v43 = vrot.slane %v3762_v38, %v7885_v52  ;;  %6867 = vmatpush3.bf16.msra.mxu0 %v7074_v58 }
 0x2dc   : > { %v9069_v10 = vunpack.c.l.b16 %v2403_v12  ;;  %v5365_v33 = vmax.f32 %v5363_v30, %v5364_v47  ;;  %v4858_v46 = vcombine.low %v4459_v27, %v4460_v25  ;;  %v4859_v28 = vcombine.low %v4461_v17, %v4462_v16  ;;  %v7075_v12 = vld [vmem:[#allocation10 + $0x30] sm:$0xff]   ;;  %6868 = vmatprep.subr.bf16.mxu0 %v9590_v20 }
 0x2dd   : > { %v4840_v37 = vrot.slane %v4812_v31, %v7885_v52  ;;  %v4880_v42 = vrot.slane %v4463_v7, %v7885_v52  ;;  %v3777_v26 = vcombine.high %v3769_v23, %v3769_v23  ;;  %v3778_v49 = vcombine.high %v3776_v43, %v3776_v43 }
 0x2de   : > { %v5366_v34 = vrot.slane %v5365_v33, 2  ;;  %v4866_v40 = vrot.slane %v4858_v46, %v7885_v52  ;;  %v4873_v45 = vrot.slane %v4859_v28, %v7885_v52  ;;  %v3785_v38 = vrot.slane %v3769_v23, %v7885_v52 }
 0x2df   : > { %v4842_v53 = vcombine.low %v4833_v62, %v4840_v37  ;;  %v4895_v4 = vrot.slane %v4880_v42, %v7885_v52  ;;  %v3792_v35 = vrot.slane %v3776_v43, %v7885_v52  ;;  %v3799_v9 = vrot.slane %v3777_v26, %v7885_v52  ;;  %6869 = vmatpush3.bf16.msra.mxu0 %v7075_v12  ;;  %v7076_v26 = vld [vmem:[#allocation10 + $0x38] sm:$0xff]  }
 0x2e0   : > { %v5367_v0 = vmax.f32 %v5365_v33, %v5366_v34  ;;  %v4881_v6 = vcombine.low %v4866_v40, %v4873_v45  ;;  %v3806_v32 = vrot.slane %v3778_v49, %v7885_v52  ;;  %v3807_v30 = vcombine.high %v3785_v38, %v3785_v38  ;;  %6870 = vmatprep.subr.bf16.mxu0 %v9590_v20 }
 0x2e1   : > { %v4856_v59 = vrot.slane %v4842_v53, %v7885_v52  ;;  %v3808_v1 = vcombine.high %v3792_v35, %v3792_v35  ;;  %v3809_v14 = vcombine.high %v3799_v9, %v3799_v9  ;;  %v4360_v60 = vadd.f32 %v8695_v19, %v3761_v61 }
 0x2e2   : > { %v5368_v62 = vrot.slane %v5367_v0, 1  ;;  %v4888_v39 = vrot.slane %v4881_v6, %v7885_v52  ;;  %v3810_v27 = vcombine.high %v3806_v32, %v3806_v32  ;;  %v4361_v17 = vadd.f32 %v8701_v54, %v3785_v38 }
 0x2e3   : > { %v4857_v47 = vcombine.low %v4849_v48, %v4856_v59  ;;  %v4362_v25 = vadd.f32 %v8709_v18, %v3799_v9  ;;  %v4363_v16 = vadd.f32 %v8721_v11, %v3807_v30  ;;  %v4364_v21 = vadd.f32 %v8698_v44, %v3809_v14  ;;  %6871 = vmatpush3.bf16.msra.mxu0 %v7076_v26 }
 0x2e4   : > { %v5369_v61 = vmax.f32 %v5367_v0, %v5368_v62  ;;  %v4896_v7 = vcombine.low %v4888_v39, %v4895_v4  ;;  %v4365_v31 = vadd.f32 %v8704_v41, %v3792_v35  ;;  %v4366_v23 = vadd.f32 %v8713_v36, %v3806_v32 }
 0x2e5   : > { %v4367_v43 = vadd.f32 %v8725_v15, %v3808_v1  ;;  %v4464_v33 = vmax.f32 %v4360_v60, 0.0  ;;  %v4465_v46 = vmax.f32 %v4361_v17, 0.0  ;;  %v4466_v3 = vmax.f32 %v4362_v25, 0.0 }
 0x2e6   : > { %v5419_v48 = vpack.c.bf16 %v5369_v61, %v5369_v61  ;;  %v5370_v28 = vsel %vm5353_vm6, %v4896_v7, -inf  ;;  %v4467_v37 = vmax.f32 %v4363_v16, 0.0  ;;  %v4468_v42 = vmax.f32 %v4364_v21, 0.0 }
 0x2e7   : > { %v5371_v49 = vmax.f32 %v4857_v47, %v5370_v28  ;;  %v4469_v34 = vmax.f32 %v4365_v31, 0.0  ;;  %v4470_v40 = vmax.f32 %v4366_v23, 0.0  ;;  %v4471_v45 = vmax.f32 %v4367_v43, 0.0 }
 0x2e8   : > { %v9100_v38 = vunpack.c.l.b16 %v5419_v48  ;;  %v4897_v58 = vcombine.low %v4464_v33, %v4465_v46  ;;  %v4898_v53 = vcombine.low %v4466_v3, %v4467_v37  ;;  %v3811_v4 = vcombine.high %v8854_v22, %v8854_v22 }
 0x2e9   : > { %v5372_v35 = vrot.slane %v5371_v49, 4  ;;  %v4899_v9 = vcombine.low %v4468_v42, %v4469_v34  ;;  %v4900_v0 = vcombine.low %v4470_v40, %v4471_v45  ;;  %v3818_v6 = vrot.slane %v8854_v22, %v7885_v52 }
 0x2ea   : > { %v4907_v32 = vrot.slane %v4897_v58, %v7885_v52  ;;  %v4914_v30 = vrot.slane %v4898_v53, %v7885_v52  ;;  %v3825_v59 = vrot.slane %v3811_v4, %v7885_v52  ;;  %v4368_v1 = vadd.f32 %v8695_v19, %v3810_v27 }
 0x2eb   : > { %v5373_v14 = vmax.f32 %v5371_v49, %v5372_v35  ;;  %v4921_v60 = vrot.slane %v4899_v9, %v7885_v52  ;;  %v4928_v62 = vrot.slane %v4900_v0, %v7885_v52  ;;  %v3826_v39 = vcombine.high %v3818_v6, %v3818_v6 }
 0x2ec   : > { %v4929_v17 = vcombine.low %v4907_v32, %v4914_v30  ;;  %v3827_v12 = vcombine.high %v3825_v59, %v3825_v59  ;;  %v3834_v47 = vrot.slane %v3818_v6, %v7885_v52  ;;  %v3841_v22 = vrot.slane %v3825_v59, %v7885_v52 }
 0x2ed   : > { %v5374_v25 = vrot.slane %v5373_v14, 2  ;;  %v4930_v16 = vcombine.low %v4921_v60, %v4928_v62  ;;  %v3848_v21 = vrot.slane %v3826_v39, %v7885_v52  ;;  %v4472_v61 = vmax.f32 %v4368_v1, 0.0 }
 0x2ee   : > { %v4937_v27 = vrot.slane %v4929_v17, %v7885_v52  ;;  %v3855_v7 = vrot.slane %v3827_v12, %v7885_v52  ;;  %v3856_v31 = vcombine.high %v3834_v47, %v3834_v47  ;;  %v3857_v23 = vcombine.high %v3841_v22, %v3841_v22 }
 0x2ef   : > { %v5375_v43 = vmax.f32 %v5373_v14, %v5374_v25  ;;  %v4944_v33 = vrot.slane %v4930_v16, %v7885_v52  ;;  %v3858_v46 = vcombine.high %v3848_v21, %v3848_v21  ;;  %v4369_v3 = vadd.f32 %v8701_v54, %v3834_v47 }
 0x2f0   : > { %v3859_v48 = vcombine.high %v3855_v7, %v3855_v7  ;;  %v4370_v28 = vadd.f32 %v8709_v18, %v3848_v21  ;;  %v4371_v37 = vadd.f32 %v8721_v11, %v3856_v31  ;;  %v4373_v42 = vadd.f32 %v8695_v19, %v3841_v22 }
 0x2f1   : > { %v5376_v26 = vrot.slane %v5375_v43, 1  ;;  %v4945_v49 = vcombine.low %v4937_v27, %v4944_v33  ;;  %v4372_v34 = vadd.f32 %v8698_v44, %v3858_v46  ;;  %v4374_v40 = vadd.f32 %v8701_v54, %v3855_v7 }
 0x2f2   : > { %v4375_v45 = vadd.f32 %v8709_v18, %v3857_v23  ;;  %v4376_v58 = vadd.f32 %v8721_v11, %v3859_v48  ;;  %v4473_v53 = vmax.f32 %v4369_v3, 0.0  ;;  %v4474_v4 = vmax.f32 %v4370_v28, 0.0 }
 0x2f3   : > { %v5377_v35 = vmax.f32 %v5375_v43, %v5376_v26  ;;  %v4475_v9 = vmax.f32 %v4371_v37, 0.0  ;;  %v4476_v0 = vmax.f32 %v4372_v34, 0.0  ;;  %v4477_v6 = vmax.f32 %v4373_v42, 0.0 }
 0x2f4   : > { %v4478_v32 = vmax.f32 %v4374_v40, 0.0  ;;  %v4479_v30 = vmax.f32 %v4375_v45, 0.0  ;;  %v4480_v59 = vmax.f32 %v4376_v58, 0.0  ;;  %v4946_v1 = vcombine.low %v4472_v61, %v4473_v53 }
 0x2f5   : > { %v5420_v14 = vpack.c.bf16 %v5377_v35, %v5377_v35  ;;  %v4947_v60 = vcombine.low %v4474_v4, %v4475_v9  ;;  %v4968_v62 = vrot.slane %v4476_v0, %v7885_v52  ;;  %v3860_v39 = vcombine.high %v8860_v57, %v8860_v57 }
 0x2f6   : > { %v4954_v17 = vrot.slane %v4946_v1, %v7885_v52  ;;  %v4985_v12 = vcombine.low %v4477_v6, %v4478_v32  ;;  %v4986_v47 = vcombine.low %v4479_v30, %v4480_v59  ;;  %v3867_v22 = vrot.slane %v8860_v57, %v7885_v52 }
 0x2f7   : > { %v9132_v25 = vunpack.c.l.b16 %v5420_v14  ;;  %v4961_v16 = vrot.slane %v4947_v60, %v7885_v52  ;;  %v4983_v21 = vrot.slane %v4968_v62, %v7885_v52  ;;  %v3874_v61 = vrot.slane %v3860_v39, %v7885_v52 }
 0x2f8   : > { %v4995_v27 = vrot.slane %v4985_v12, %v7885_v52  ;;  %v5002_v7 = vrot.slane %v4986_v47, %v7885_v52  ;;  %v3875_v31 = vcombine.high %v3867_v22, %v3867_v22  ;;  %v3883_v23 = vrot.slane %v3867_v22, %v7885_v52 }
 0x2f9   : > { %v4969_v43 = vcombine.low %v4954_v17, %v4961_v16  ;;  %v3876_v33 = vcombine.high %v3874_v61, %v3874_v61  ;;  %v3890_v46 = vrot.slane %v3874_v61, %v7885_v52  ;;  %v3909_v57 = vcombine.high %v8872_v56, %v8872_v56 }
 0x2fa   : > { %v9143_v3 = vcombine.low %v4995_v27, %v5002_v7  ;;  %v3897_v48 = vrot.slane %v3875_v31, %v7885_v52  ;;  %v3905_v28 = vcombine.high %v3883_v23, %v3883_v23  ;;  %v4377_v37 = vadd.f32 %v8698_v44, %v3883_v23 }
 0x2fb   : > { %v4976_v42 = vrot.slane %v4969_v43, %v7885_v52  ;;  %v3904_v26 = vrot.slane %v3876_v33, %v7885_v52  ;;  %v3906_v34 = vcombine.high %v3890_v46, %v3890_v46  ;;  %v4381_v40 = vadd.f32 %v8695_v19, %v3890_v46 }
 0x2fc   : > { %v5025_v45 = vrot.slane %v9143_v3, %v7885_v52  ;;  %v3907_v58 = vcombine.high %v3897_v48, %v3897_v48  ;;  %v4378_v53 = vadd.f32 %v8704_v41, %v3897_v48  ;;  %v4379_v4 = vadd.f32 %v8713_v36, %v3905_v28 }
 0x2fd   : > { %v4984_v35 = vcombine.low %v4976_v42, %v4983_v21  ;;  %v3908_v9 = vcombine.high %v3904_v26, %v3904_v26  ;;  %v4382_v0 = vadd.f32 %v8701_v54, %v3904_v26  ;;  %v4383_v6 = vadd.f32 %v8709_v18, %v3906_v34 }
 0x2fe   : > { %v4380_v32 = vadd.f32 %v8725_v15, %v3907_v58  ;;  %v4481_v30 = vmax.f32 %v4377_v37, 0.0  ;;  %v4482_v59 = vmax.f32 %v4378_v53, 0.0  ;;  %v4483_v1 = vmax.f32 %v4379_v4, 0.0 }
 0x2ff   : > { %v5378_v14 = vsel %vm5353_vm6, %v4984_v35, -inf  ;;  %v4384_v60 = vadd.f32 %v8721_v11, %v3908_v9  ;;  %v4485_v62 = vmax.f32 %v4381_v40, 0.0  ;;  %v4486_v39 = vmax.f32 %v4382_v0, 0.0 }
 0x300   : > { %v5379_v17 = vmax.f32 %v4945_v49, %v5378_v14  ;;  %v4484_v12 = vmax.f32 %v4380_v32, 0.0  ;;  %v4487_v47 = vmax.f32 %v4383_v6, 0.0  ;;  %v4987_v22 = vcombine.low %v4481_v30, %v4482_v59 }
 0x301   : > { %v4488_v16 = vmax.f32 %v4384_v60, 0.0  ;;  %v5034_v21 = vcombine.low %v4485_v62, %v4486_v39  ;;  %v3916_v61 = vrot.slane %v8872_v56, %v7885_v52  ;;  %v3923_v27 = vrot.slane %v3909_v57, %v7885_v52 }
 0x302   : > { %v5380_v7 = vrot.slane %v5379_v17, 4  ;;  %v4988_v31 = vcombine.low %v4483_v1, %v4484_v12  ;;  %v5009_v23 = vrot.slane %v4987_v22, %v7885_v52  ;;  %v3958_v43 = vcombine.high %v8882_v63, %v8882_v63 }
 0x303   : > { %v5035_v33 = vcombine.low %v4487_v47, %v4488_v16  ;;  %v5042_v49 = vrot.slane %v5034_v21, %v7885_v52  ;;  %v3924_v46 = vcombine.high %v3916_v61, %v3916_v61  ;;  %v3925_v3 = vcombine.high %v3923_v27, %v3923_v27 }
 0x304   : > { %v5381_v48 = vmax.f32 %v5379_v17, %v5380_v7  ;;  %v5016_v28 = vrot.slane %v4988_v31, %v7885_v52  ;;  %v3932_v37 = vrot.slane %v3916_v61, %v7885_v52  ;;  %v3939_v56 = vrot.slane %v3923_v27, %v7885_v52 }
 0x305   : > { %v5049_v57 = vrot.slane %v5035_v33, %v7885_v52  ;;  %v3946_v42 = vrot.slane %v3924_v46, %v7885_v52  ;;  %v3953_v26 = vrot.slane %v3925_v3, %v7885_v52  ;;  %v3965_v34 = vrot.slane %v8882_v63, %v7885_v52 }
 0x306   : > { %v5382_v40 = vrot.slane %v5381_v48, 2  ;;  %v5018_v58 = vcombine.low %v5009_v23, %v5016_v28  ;;  %v3954_v53 = vcombine.high %v3932_v37, %v3932_v37  ;;  %v3955_v4 = vcombine.high %v3939_v56, %v3939_v56 }
 0x307   : > { %v5057_v35 = vcombine.low %v5042_v49, %v5049_v57  ;;  %v3956_v9 = vcombine.high %v3946_v42, %v3946_v42  ;;  %v3957_v0 = vcombine.high %v3953_v26, %v3953_v26  ;;  %v4385_v6 = vadd.f32 %v8698_v44, %v3932_v37 }
 0x308   : > { %v5383_v32 = vmax.f32 %v5381_v48, %v5382_v40  ;;  %v5032_v30 = vrot.slane %v5018_v58, %v7885_v52  ;;  %v4386_v59 = vadd.f32 %v8695_v19, %v3946_v42  ;;  %v4387_v1 = vadd.f32 %v8701_v54, %v3954_v53 }
 0x309   : > { %v4388_v14 = vadd.f32 %v8709_v18, %v3956_v9  ;;  %v4389_v63 = vadd.f32 %v8721_v11, %v3939_v56  ;;  %v4390_v60 = vadd.f32 %v8698_v44, %v3953_v26  ;;  %v4391_v62 = vadd.f32 %v8704_v41, %v3955_v4 }
 0x30a   : > { %v5384_v39 = vrot.slane %v5383_v32, 1  ;;  %v5033_v17 = vcombine.low %v5025_v45, %v5032_v30  ;;  %v4489_v12 = vmax.f32 %v4385_v6, 0.0  ;;  %v4490_v47 = vmax.f32 %v4386_v59, 0.0 }
 0x30b   : > { %v4491_v22 = vmax.f32 %v4387_v1, 0.0  ;;  %v4492_v16 = vmax.f32 %v4388_v14, 0.0  ;;  %v4493_v21 = vmax.f32 %v4389_v63, 0.0  ;;  %v4494_v61 = vmax.f32 %v4390_v60, 0.0 }
 0x30c   : > { %v9182_v27 = vmax.f32 %v5383_v32, %v5384_v39  ;;  %v4495_v7 = vmax.f32 %v4391_v62, 0.0  ;;  %v5056_v31 = vrot.slane %v4489_v12, %v7885_v52  ;;  %v5064_v23 = vrot.slane %v5057_v35, %v7885_v52 }
 0x30d   : > { %v5073_v33 = vcombine.low %v4490_v47, %v4491_v22  ;;  %v5074_v49 = vcombine.low %v4492_v16, %v4493_v21  ;;  %v3972_v46 = vrot.slane %v3958_v43, %v7885_v52  ;;  %v3973_v3 = vcombine.high %v3965_v34, %v3965_v34 }
 0x30e   : > { %v5421_v45 = vpack.c.bf16 %v9182_v27, %v9182_v27  ;;  %v5071_v48 = vrot.slane %v5056_v31, %v7885_v52  ;;  %v5075_v28 = vcombine.low %v4494_v61, %v4495_v7  ;;  %v3981_v37 = vrot.slane %v3965_v34, %v7885_v52 }
 0x30f   : > { %v5083_v56 = vrot.slane %v5073_v33, %v7885_v52  ;;  %v5090_v57 = vrot.slane %v5074_v49, %v7885_v52  ;;  %v3974_v42 = vcombine.high %v3972_v46, %v3972_v46  ;;  %v3988_v26 = vrot.slane %v3972_v46, %v7885_v52 }
 0x310   : > { %v5072_v40 = vcombine.low %v5064_v23, %v5071_v48  ;;  %v3995_v58 = vrot.slane %v3973_v3, %v7885_v52  ;;  %v4003_v43 = vcombine.high %v3981_v37, %v3981_v37  ;;  %v4392_v53 = vadd.f32 %v8713_v36, %v3957_v0 }
 0x311   : > { %v5105_v4 = vcombine.low %v5083_v56, %v5090_v57  ;;  %v4002_v35 = vrot.slane %v3974_v42, %v7885_v52  ;;  %v4004_v9 = vcombine.high %v3988_v26, %v3988_v26  ;;  %v4393_v6 = vadd.f32 %v8725_v15, %v3981_v37 }
 0x312   : > { %v5386_v34 = vsel %vm5353_vm6, %v5072_v40, -inf  ;;  %v4005_v32 = vcombine.high %v3995_v58, %v3995_v58  ;;  %v4394_v30 = vadd.f32 %v8695_v19, %v3995_v58  ;;  %v4395_v59 = vadd.f32 %v8701_v54, %v4003_v43 }
 0x313   : > { %v5113_v1 = vrot.slane %v5105_v4, %v7885_v52  ;;  %v5387_v14 = vmax.f32 %v5033_v17, %v5386_v34  ;;  %v4006_v63 = vcombine.high %v4002_v35, %v4002_v35  ;;  %v4397_v60 = vadd.f32 %v8721_v11, %v3988_v26 }
 0x314   : > { %v4396_v0 = vadd.f32 %v8709_v18, %v4005_v32  ;;  %v4398_v62 = vadd.f32 %v8698_v44, %v4002_v35  ;;  %v4399_v39 = vadd.f32 %v8695_v19, %v4004_v9  ;;  %v4496_v12 = vmax.f32 %v4392_v53, 0.0 }
 0x315   : > { %v5388_v47 = vrot.slane %v5387_v14, 4  ;;  %v4400_v22 = vadd.f32 %v8701_v54, %v4006_v63  ;;  %v4497_v16 = vmax.f32 %v4393_v6, 0.0  ;;  %v4498_v21 = vmax.f32 %v4394_v30, 0.0 }
 0x316   : > { %v4499_v61 = vmax.f32 %v4395_v59, 0.0  ;;  %v4500_v7 = vmax.f32 %v4396_v0, 0.0  ;;  %v4501_v31 = vmax.f32 %v4397_v60, 0.0  ;;  %v4502_v23 = vmax.f32 %v4398_v62, 0.0 }
 0x317   : > { %v5389_v17 = vmax.f32 %v5387_v14, %v5388_v47  ;;  %v4503_v33 = vmax.f32 %v4399_v39, 0.0  ;;  %v4504_v49 = vmax.f32 %v4400_v22, 0.0  ;;  %v5076_v46 = vcombine.low %v4496_v12, %v4497_v16 }
 0x318   : > { %v5097_v3 = vrot.slane %v5075_v28, %v7885_v52  ;;  %v5122_v48 = vcombine.low %v4498_v21, %v4499_v61  ;;  %v5123_v37 = vcombine.low %v4500_v7, %v4501_v31  ;;  %v5144_v56 = vrot.slane %v4502_v23, %v7885_v52 }
 0x319   : > { %v5390_v57 = vrot.slane %v5389_v17, 2  ;;  %v5104_v42 = vrot.slane %v5076_v46, %v7885_v52  ;;  %v9210_v26 = vcombine.low %v4503_v33, %v4504_v49  ;;  %v4007_v40 = vcombine.high %v8910_v5, %v8910_v5 }
 0x31a   : > { %v5130_v58 = vrot.slane %v5122_v48, %v7885_v52  ;;  %v5137_v43 = vrot.slane %v5123_v37, %v7885_v52  ;;  %v5159_v53 = vrot.slane %v5144_v56, %v7885_v52  ;;  %v4014_v28 = vrot.slane %v8910_v5, %v7885_v52 }
 0x31b   : > { %v5391_v4 = vmax.f32 %v5389_v17, %v5390_v57  ;;  %v5106_v35 = vcombine.low %v5097_v3, %v5104_v42  ;;  %v4021_v9 = vrot.slane %v4007_v40, %v7885_v52  ;;  %v5171_v6 = vrot.slane %v9210_v26, %v7885_v52 }
 0x31c   : > { %v5145_v34 = vcombine.low %v5130_v58, %v5137_v43  ;;  %v4022_v32 = vcombine.high %v4014_v28, %v4014_v28  ;;  %v4030_v30 = vrot.slane %v4014_v28, %v7885_v52  ;;  %v4056_v59 = vcombine.high %v8919_v55, %v8919_v55 }
 0x31d   : > { %v5392_v14 = vrot.slane %v5391_v4, 1  ;;  %v5120_v63 = vrot.slane %v5106_v35, %v7885_v52  ;;  %v4023_v60 = vcombine.high %v4021_v9, %v4021_v9  ;;  %v4037_v5 = vrot.slane %v4021_v9, %v7885_v52 }
 0x31e   : > { %v5152_v0 = vrot.slane %v5145_v34, %v7885_v52  ;;  %v4044_v62 = vrot.slane %v4022_v32, %v7885_v52  ;;  %v4052_v39 = vcombine.high %v4030_v30, %v4030_v30  ;;  %v4401_v12 = vadd.f32 %v8709_v18, %v4030_v30 }
 0x31f   : > { %v5393_v47 = vmax.f32 %v5391_v4, %v5392_v14  ;;  %v5121_v22 = vcombine.low %v5113_v1, %v5120_v63  ;;  %v4051_v16 = vrot.slane %v4023_v60, %v7885_v52  ;;  %v4053_v21 = vcombine.high %v4037_v5, %v4037_v5 }
 0x320   : > { %v5160_v61 = vcombine.low %v5152_v0, %v5159_v53  ;;  %v4054_v7 = vcombine.high %v4044_v62, %v4044_v62  ;;  %v4402_v31 = vadd.f32 %v8721_v11, %v4044_v62  ;;  %v4403_v23 = vadd.f32 %v8698_v44, %v4052_v39 }
 0x321   : > { %v5422_v17 = vpack.c.bf16 %v5393_v47, %v5393_v47  ;;  %v4055_v33 = vcombine.high %v4051_v16, %v4051_v16  ;;  %v4405_v49 = vadd.f32 %v8713_v36, %v4037_v5  ;;  %v4406_v46 = vadd.f32 %v8725_v15, %v4051_v16 }
 0x322   : > { %v5394_v3 = vsel %vm5353_vm6, %v5160_v61, -inf  ;;  %v4404_v48 = vadd.f32 %v8704_v41, %v4054_v7  ;;  %v4407_v1 = vadd.f32 %v8695_v19, %v4053_v21  ;;  %v4505_v37 = vmax.f32 %v4401_v12, 0.0 }
 0x323   : > { %v9238_v56 = vunpack.c.l.b16 %v5422_v17  ;;  %v5395_v57 = vmax.f32 %v5121_v22, %v5394_v3  ;;  %v4408_v42 = vadd.f32 %v8701_v54, %v4055_v33  ;;  %v4506_v26 = vmax.f32 %v4402_v31, 0.0 }
 0x324   : > { %v4507_v40 = vmax.f32 %v4403_v23, 0.0  ;;  %v4508_v58 = vmax.f32 %v4404_v48, 0.0  ;;  %v4509_v43 = vmax.f32 %v4405_v49, 0.0  ;;  %v4510_v53 = vmax.f32 %v4406_v46, 0.0 }
 0x325   : > { %v5396_v28 = vrot.slane %v5395_v57, 4  ;;  %v4511_v4 = vmax.f32 %v4407_v1, 0.0  ;;  %v4512_v35 = vmax.f32 %v4408_v42, 0.0  ;;  %v5162_v9 = vcombine.low %v4505_v37, %v4506_v26 }
 0x326   : > { %v5163_v34 = vcombine.low %v4507_v40, %v4508_v58  ;;  %v5164_v32 = vcombine.low %v4509_v43, %v4510_v53  ;;  %v4063_v30 = vrot.slane %v8919_v55, %v7885_v52  ;;  %v4070_v14 = vrot.slane %v4056_v59, %v7885_v52 }
 0x327   : > { %v5397_v63 = vmax.f32 %v5395_v57, %v5396_v28  ;;  %v5178_v60 = vrot.slane %v5162_v9, %v7885_v52  ;;  %v5210_v5 = vcombine.low %v4511_v4, %v4512_v35  ;;  %v4105_v0 = vcombine.high %v8940_v13, %v8940_v13 }
 0x328   : > { %v5185_v62 = vrot.slane %v5163_v34, %v7885_v52  ;;  %v5192_v39 = vrot.slane %v5164_v32, %v7885_v52  ;;  %v4071_v12 = vcombine.high %v4063_v30, %v4063_v30  ;;  %v4072_v47 = vcombine.high %v4070_v14, %v4070_v14 }
 0x329   : > { %v5398_v22 = vrot.slane %v5397_v63, 2  ;;  %v5193_v16 = vcombine.low %v5171_v6, %v5178_v60  ;;  %v4079_v21 = vrot.slane %v4063_v30, %v7885_v52  ;;  %v4086_v55 = vrot.slane %v4070_v14, %v7885_v52 }
 0x32a   : > { %v5194_v59 = vcombine.low %v5185_v62, %v5192_v39  ;;  %v4093_v61 = vrot.slane %v4071_v12, %v7885_v52  ;;  %v4100_v7 = vrot.slane %v4072_v47, %v7885_v52  ;;  %v5218_v31 = vrot.slane %v5210_v5, %v7885_v52 }
 0x32b   : > { %v9254_v23 = vmax.f32 %v5397_v63, %v5398_v22  ;;  %v5201_v17 = vrot.slane %v5193_v16, %v7885_v52  ;;  %v4101_v33 = vcombine.high %v4079_v21, %v4079_v21  ;;  %v4102_v49 = vcombine.high %v4086_v55, %v4086_v55 }
 0x32c   : > { %v5208_v46 = vrot.slane %v5194_v59, %v7885_v52  ;;  %v4103_v6 = vcombine.high %v4093_v61, %v4093_v61  ;;  %v4104_v3 = vcombine.high %v4100_v7, %v4100_v7  ;;  %v4409_v48 = vadd.f32 %v8709_v18, %v4079_v21 }
 0x32d   : > { %v4410_v1 = vadd.f32 %v8721_v11, %v4093_v61  ;;  %v4411_v37 = vadd.f32 %v8698_v44, %v4101_v33  ;;  %v4413_v57 = vadd.f32 %v8701_v54, %v4086_v55  ;;  %v4414_v42 = vadd.f32 %v8709_v18, %v4100_v7 }
 0x32e   : > { %v5209_v26 = vcombine.low %v5201_v17, %v5208_v46  ;;  %v4412_v40 = vadd.f32 %v8695_v19, %v4103_v6  ;;  %v4415_v58 = vadd.f32 %v8721_v11, %v4102_v49  ;;  %v4513_v43 = vmax.f32 %v4409_v48, 0.0 }
 0x32f   : > { %v4514_v53 = vmax.f32 %v4410_v1, 0.0  ;;  %v4515_v28 = vmax.f32 %v4411_v37, 0.0  ;;  %v4517_v4 = vmax.f32 %v4413_v57, 0.0  ;;  %v4518_v35 = vmax.f32 %v4414_v42, 0.0 }
 0x330   : > { %v4516_v9 = vmax.f32 %v4412_v40, 0.0  ;;  %v4519_v34 = vmax.f32 %v4415_v58, 0.0  ;;  %v4112_v32 = vrot.slane %v8940_v13, %v7885_v52  ;;  %v4119_v30 = vrot.slane %v4105_v0, %v7885_v52 }
 0x331   : > { %v5211_v14 = vcombine.low %v4513_v43, %v4514_v53  ;;  %v5232_v63 = vrot.slane %v4515_v28, %v7885_v52  ;;  %v4416_v60 = vadd.f32 %v8698_v44, %v4104_v3  ;;  %v9647_v5 = vrot.slane %v8818_v51, 1 }
 0x332   : > { %v5249_v39 = vcombine.low %v4516_v9, %v4517_v4  ;;  %v5250_v12 = vcombine.low %v4518_v35, %v4519_v34  ;;  %v4120_v47 = vcombine.high %v4112_v32, %v4112_v32  ;;  %v4121_v22 = vcombine.high %v4119_v30, %v4119_v30 }
 0x333   : > { %v2398_v62 = vmax.f32 %v8818_v51, %v9647_v5  ;;  %v5225_v16 = vrot.slane %v5211_v14, %v7885_v52  ;;  %v5247_v21 = vrot.slane %v5232_v63, %v7885_v52  ;;  %v4128_v13 = vrot.slane %v4112_v32, %v7885_v52 }
 0x334   : > { %v4135_v0 = vrot.slane %v4119_v30, %v7885_v52  ;;  %v5259_v55 = vrot.slane %v5249_v39, %v7885_v52  ;;  %v5266_v59 = vrot.slane %v5250_v12, %v7885_v52  ;;  %v4142_v61 = vrot.slane %v4120_v47, %v7885_v52 }
 0x335   : > { %v4149_v51 = vrot.slane %v4121_v22, %v7885_v52  ;;  %v5233_v7 = vcombine.low %v5218_v31, %v5225_v16  ;;  %v4150_v17 = vcombine.high %v4128_v13, %v4128_v13  ;;  %v4417_v49 = vadd.f32 %v8704_v41, %v4128_v13 }
 0x336   : > { %v4151_v33 = vcombine.high %v4135_v0, %v4135_v0  ;;  %v5281_v46 = vcombine.low %v5259_v55, %v5266_v59  ;;  %v4152_v6 = vcombine.high %v4142_v61, %v4142_v61  ;;  %v4418_v48 = vadd.f32 %v8713_v36, %v4142_v61 }
 0x337   : > { %v4153_v3 = vcombine.high %v4149_v51, %v4149_v51  ;;  %v5240_v1 = vrot.slane %v5233_v7, %v7885_v52  ;;  %v4419_v37 = vadd.f32 %v8725_v15, %v4150_v17  ;;  %v4421_v57 = vadd.f32 %v8701_v54, %v4135_v0 }
 0x338   : > { %v4422_v42 = vadd.f32 %v8709_v18, %v4149_v51  ;;  %v5289_v40 = vrot.slane %v5281_v46, %v7885_v52  ;;  %v4420_v31 = vadd.f32 %v8695_v19, %v4152_v6  ;;  %v4423_v58 = vadd.f32 %v8721_v11, %v4151_v33 }
 0x339   : > { %v4424_v41 = vadd.f32 %v8698_v44, %v4153_v3  ;;  %v5248_v43 = vcombine.low %v5240_v1, %v5247_v21  ;;  %v4520_v53 = vmax.f32 %v4416_v60, 0.0  ;;  %v4521_v28 = vmax.f32 %v4417_v49, 0.0 }
 0x33a   : > { %v4522_v36 = vmax.f32 %v4418_v48, 0.0  ;;  %v4523_v4 = vmax.f32 %v4419_v37, 0.0  ;;  %v4524_v35 = vmax.f32 %v4420_v31, 0.0  ;;  %v4525_v9 = vmax.f32 %v4421_v57, 0.0 }
 0x33b   : > { %v4526_v15 = vmax.f32 %v4422_v42, 0.0  ;;  %v5402_v54 = vsel %vm5353_vm6, %v5248_v43, -inf  ;;  %v4527_v34 = vmax.f32 %v4423_v58, 0.0  ;;  %v4528_v18 = vmax.f32 %v4424_v41, 0.0 }
 0x33c   : > { %v5251_v32 = vcombine.low %v4520_v53, %v4521_v28  ;;  %v5403_v30 = vmax.f32 %v5209_v26, %v5402_v54  ;;  %v5252_v14 = vcombine.low %v4522_v36, %v4523_v4  ;;  %v5298_v19 = vcombine.low %v4524_v35, %v4525_v9  ;;  %v7077_v4 = vld [vmem:[#allocation11] sm:$0xff]   ;;  %v9648_v9 = vld [vmem:[#allocation31_spill] sm:$0xff] }
 0x33d   : > { %v2406_v63 = vpack.c.bf16 %v2398_v62, %v2398_v62  ;;  %v5299_v44 = vcombine.low %v4526_v15, %v4527_v34  ;;  %v5320_v60 = vrot.slane %v4528_v18, %v7885_v52  ;;  %v5580_v13 = vsel %vm5462_vm8, %v9008_v29, %v8962_v24  ;;  %v9649_v15 = vld [vmem:[#allocation30_spill] sm:$0xff]  ;;  %v7078_v34 = vld [vmem:[#allocation11 + $0x8] sm:$0xff]  }
 0x33e   : > { %v5273_v11 = vrot.slane %v5251_v32, %v7885_v52  ;;  %v5404_v5 = vrot.slane %v5403_v30, 4  ;;  %v5280_v39 = vrot.slane %v5252_v14, %v7885_v52  ;;  %v5306_v12 = vrot.slane %v5298_v19, %v7885_v52  ;;  %v7079_v18 = vld [vmem:[#allocation11 + $0x10] sm:$0xff]   ;;  %v7080_v32 = vld [vmem:[#allocation11 + $0x18] sm:$0xff]   ;;  %v7082_v14 = vld [vmem:[#allocation11 + $0x28] sm:$0xff]  }
 0x33f   : > { %v5313_v47 = vrot.slane %v5299_v44, %v7885_v52  ;;  %v5335_v22 = vrot.slane %v5320_v60, %v7885_v52  ;;  %v5577_v16 = vunpack.c.l.b16 %v2406_v63  ;;  %v5400_v0 = vrot.slane %v9254_v23, 1  ;;  %v7083_v19 = vld [vmem:[#allocation11 + $0x30] sm:$0xff]   ;;  %v7084_v63 = vld [vmem:[#allocation11 + $0x38] sm:$0xff]   ;;  %v7086_v44 = vld [vmem:[#allocation11 + $0x48] sm:$0xff]  }
 0x340   : > { %v5405_v26 = vmax.f32 %v5403_v30, %v5404_v5  ;;  %v5282_v62 = vcombine.low %v5273_v11, %v5280_v39  ;;  %v5581_v61 = vsel %vm5464_vm9, %v9069_v10, %v5580_v13  ;;  %v7391_v51 = vmov 0   ;;  %v7081_v30 = vld [vmem:[#allocation11 + $0x20] sm:$0xff]   ;;  %v9653_v39 = vld [vmem:[#allocation34_spill] sm:$0xff]  ;;  %v9661_v13 = vld [vmem:[#allocation23_spill] sm:$0xff] }
 0x341   : > { %v5321_v21 = vcombine.low %v5306_v12, %v5313_v47  ;;  %6031 = vmatprep.subr.bf16.mxu0 %v7391_v51  ;;  %v5453_v7 = vunpack.c.l.b16 %v5421_v45  ;;  %v5582_v24 = vsel %vm5466_vm10, %v8729_v2, %v5581_v61  ;;  %v5401_v29 = vmax.f32 %v9254_v23, %v5400_v0  ;;  %v7085_v11 = vld [vmem:[#allocation11 + $0x40] sm:$0xff]  }
 0x342   : > { %v5406_v55 = vrot.slane %v5405_v26, 2  ;;  %v5296_v59 = vrot.slane %v5282_v62, %v7885_v52  ;;  %v5459_v33 = vsel %vm5458_vm5, %v9100_v38, %v9004_v50  ;;  %v5583_v46 = vsel %vm5468_vm11, %v8802_v8, %v5582_v24  ;;  %v9652_v5 = vld [vmem:[#allocation32_spill] sm:$0xff] }
 0x343   : > { %v5328_v17 = vrot.slane %v5321_v21, %v7885_v52  ;;  %v5461_v27 = vsel %vm5460_vm7, %v9132_v25, %v5459_v33  ;;  %v5584_v52 = vsel %vm5470_vm12, %v5577_v16, %v5583_v46  ;;  %v5423_v6 = vpack.c.bf16 %v5401_v29, %v5401_v29  ;;  %v9660_v21 = vld [vmem:[#allocation26_spill] sm:$0xff]  ;;  %v9665_v61 = vld [vmem:[#allocation20_spill] sm:$0xff] }
 0x344   : > { %v5407_v49 = vmax.f32 %v5405_v26, %v5406_v55  ;;  %v5297_v10 = vcombine.low %v5289_v40, %v5296_v59  ;;  %v5463_v2 = vsel %vm5462_vm8, %v5453_v7, %v5461_v27  ;;  %v5585_v3 = vpack.c.b16 %v5584_v52, %v5584_v52  ;;  %v9657_v26 = vld [vmem:[#allocation22_spill] sm:$0xff]  ;;  %v9664_v59 = vld [vmem:[#allocation33_spill] sm:$0xff]  ;;  %v9669_v24 = vld [vmem:[#allocation24_spill] sm:$0xff] }
 0x345   : > { %v5336_v45 = vcombine.low %v5328_v17, %v5335_v22  ;;  %v5465_v48 = vsel %vm5464_vm9, %v9238_v56, %v5463_v2  ;;  %v5455_v38 = vunpack.c.l.b16 %v5423_v6  ;;  %v9650_v54 = vcombine.high %v9648_v9, %v9649_v15  ;;  %v9656_v22 = vld [vmem:[#allocation25_spill] sm:$0xff] }
 0x346   : > { %v5408_v23 = vrot.slane %v5407_v49, 1  ;;  %6893 = vmatmul.mubr.bf16.vlgmr.msra.gmra.mrb[40].mxu1 %v5585_v3  ;;  %v9651_v60 = vcombine.low %v9648_v9, %v9649_v15  ;;  %v9654_v12 = vcombine.high %v9652_v5, %v9653_v39  ;;  %v9655_v47 = vcombine.low %v9652_v5, %v9653_v39  ;;  %v9668_v17 = vld [vmem:[#allocation29_spill] sm:$0xff]  ;;  %v7091_v3 = vld [vmem:[#allocation13 + $0x20] sm:$0xff]  }
 0x347   : > { %v5410_v50 = vsel %vm5353_vm6, %v5336_v45, -inf  ;;  %v5467_v37 = vsel %vm5466_vm10, %v5455_v38, %v5465_v48  ;;  %6912 = vmatprep.mubr.msk.bf16.mxu1 %vm7387_vm0, %v9590_v20  ;;  %v9658_v62 = vcombine.high %v9656_v22, %v9657_v26  ;;  %v9659_v16 = vcombine.low %v9656_v22, %v9657_v26  ;;  %v7089_v45 = vld [vmem:[#allocation13 + $0x10] sm:$0xff]   ;;  %v7090_v2 = vld [vmem:[#allocation13 + $0x18] sm:$0xff]  }
 0x348   : > { %v5411_v1 = vmax.f32 %v5297_v10, %v5410_v50  ;;  %v5409_v8 = vmax.f32 %v5407_v49, %v5408_v23  ;;  %v9662_v0 = vcombine.high %v9660_v21, %v9661_v13  ;;  %v9663_v55 = vcombine.low %v9660_v21, %v9661_v13  ;;  %v7087_v49 = vld [vmem:[#allocation13] sm:$0xff]   ;;  %v7088_v10 = vld [vmem:[#allocation13 + $0x8] sm:$0xff]   ;;  %v7093_v48 = vld [vmem:[#allocation13 + $0x30] sm:$0xff]  }
 0x349   : > { %v9667_v7 = vcombine.low %v9664_v59, %v9665_v61  ;;  %v9670_v29 = vcombine.high %v9668_v17, %v9669_v24  ;;  %v9671_v33 = vcombine.low %v9668_v17, %v9669_v24  ;;  %6897 = vmatpush3.bf16.msra.mxu1 %v7087_v49  ;;  %v7092_v23 = vld [vmem:[#allocation13 + $0x28] sm:$0xff]   ;;  %v7094_v38 = vld [vmem:[#allocation13 + $0x38] sm:$0xff]  }
 0x34a   : > { %v5412_v25 = vrot.slane %v5411_v1, 4  ;;  %v5424_v57 = vpack.c.bf16 %v5409_v8, %v5409_v8  ;;  %6898 = vmatprep.subr.bf16.mxu1 %v9590_v20 }
 0x34c   : > { %v5413_v42 = vmax.f32 %v5411_v1, %v5412_v25  ;;  %v5456_v40 = vunpack.c.l.b16 %v5424_v57  ;;  %v9393_v57 = vld [vmem:[%s9672_s13] ss:$0 sm:$0xff]  ;;  %s7392_s13 = smov [#allocation14]  }
 0x34d   : > { %6899 = vmatpush3.bf16.msra.mxu1 %v7088_v10  ;;  %s7297_s26 = sshll.u32 %s7392_s13, 4  ;;  %s7298_s26 = int_to_ptr.vmem [resolvable:$false] %s7297_s26 }
 0x34e   : > { %v5414_v31 = vrot.slane %v5413_v42, 2  ;;  %v5469_v58 = vsel %vm5468_vm11, %v5456_v40, %v5467_v37  ;;  %6900 = vmatprep.subr.bf16.mxu1 %v9590_v20  ;;  %s7299_s12 = scalar_lea.vmem %s7298_s26, 256  ;;  %p7300_p13 = scmp.lt.s32.totalorder %s9449_s11, %s7298_s26 }
 0x34f   : > { %p7301_p0 = scmp.lt.s32.totalorder %s7299_s12, %s7293_s1 }
 0x350   : > { %v5415_v41 = vmax.f32 %v5413_v42, %v5414_v31  ;;  %v9397_v42 = vcombine.high %v9393_v57, %v9393_v57 }
 0x351   : > { %6901 = vmatpush3.bf16.msra.mxu1 %v7089_v45  ;;  %p7302_p2 = por %p7301_p0, %p7300_p13 }
 0x352   : > { %v5416_v56 = vrot.slane %v5415_v41, 1  ;;  %6902 = vmatprep.subr.bf16.mxu1 %v9590_v20 }
 0x353   : > { %p7303_p8 = pnand %p7302_p2, %p7296_p1 }
 0x354   : > { %v5417_v43 = vmax.f32 %v5415_v41, %v5416_v56 }
 0x355   : > { %6903 = vmatpush3.bf16.msra.mxu1 %v7090_v2 }
 0x356   : > { %v5425_v53 = vpack.c.bf16 %v5417_v43, %v5417_v43  ;;  %6904 = vmatprep.subr.bf16.mxu1 %v9590_v20 }
 0x358   : > { %v5457_v28 = vunpack.c.l.b16 %v5425_v53 }
 0x359   : > { %6905 = vmatpush3.bf16.msra.mxu1 %v7091_v3 }
 0x35a   : > { %v5471_v36 = vsel %vm5470_vm12, %v5457_v28, %v5469_v58  ;;  %6906 = vmatprep.subr.bf16.mxu1 %v9590_v20 }
 0x35b   : > { %v5472_v35 = vpack.c.b16 %v5471_v36, %v5471_v36 }
 0x35d   : > { %6873 = vmatmul.mubr.bf16.vlgmr.msra.gmra.mrb[16].mxu0 %v5472_v35  ;;  %6907 = vmatpush3.bf16.msra.mxu1 %v7092_v23 }
 0x35e   : > { %6032 = vmatpush1.bf16.msra.mxu0 %v7077_v4  ;;  %6695 = vmatprep.mubr.msk.bf16.mxu0 %vm623_vm1, %v9650_v54 }
 0x35f   : > { %6033 = vmatprep.subr.bf16.mxu0 %v7391_v51  ;;  %6908 = vmatprep.subr.bf16.mxu1 %v9590_v20 }
 0x361   : > { %6909 = vmatpush3.bf16.msra.mxu1 %v7093_v48 }
 0x362   : > { %6034 = vmatpush1.bf16.msra.mxu0 %v7078_v34  ;;  %6910 = vmatprep.subr.bf16.mxu1 %v9590_v20 }
 0x363   : > { %6035 = vmatprep.subr.bf16.mxu0 %v7391_v51 }
 0x365   : > { %6911 = vmatpush3.bf16.msra.mxu1 %v7094_v38 }
 0x366   : > { %6036 = vmatpush1.bf16.msra.mxu0 %v7079_v18 }
 0x367   : > { %6037 = vmatprep.subr.bf16.mxu0 %v7391_v51 }
 0x36a   : > { %6038 = vmatpush1.bf16.msra.mxu0 %v7080_v32 }
 0x36b   : > { %6039 = vmatprep.subr.bf16.mxu0 %v7391_v51 }
 0x36e   : > { %6040 = vmatpush1.bf16.msra.mxu0 %v7081_v30 }
 0x36f   : > { %6041 = vmatprep.subr.bf16.mxu0 %v7391_v51 }
 0x372   : > { %6042 = vmatpush1.bf16.msra.mxu0 %v7082_v14 }
 0x373   : > { %6043 = vmatprep.subr.bf16.mxu0 %v7391_v51 }
 0x376   : > { %6044 = vmatpush1.bf16.msra.mxu0 %v7083_v19 }
 0x377   : > { %6045 = vmatprep.subr.bf16.mxu0 %v7391_v51 }
 0x37a   : > { %6046 = vmatpush1.bf16.msra.mxu0 %v7084_v63 }
 0x37b   : > { %6047 = vmatprep.subr.bf16.mxu0 %v7391_v51 }
 0x37e   : > { %6048 = vmatpush1.bf16.msra.mxu0 %v7085_v11 }
 0x37f   : > { %6049 = vmatprep.subr.bf16.mxu0 %v7391_v51  ;;  %v9666_v51 = vcombine.high %v9664_v59, %v9665_v61 }
 0x382   : > { %6050 = vmatpush1.bf16.msra.mxu0 %v7086_v44 }
 0x385   : > { %6064 = vmatmul.mubr.bf16.vlgmr.msra.gmra.mrb[20].mxu0 %v9651_v60 }
 0x386   : > { %6696 = vmatprep.mubr.msk.bf16.mxu0 %vm623_vm1, %v9654_v12 }
 0x38d   : > { %6072 = vmatmul.mubr.bf16.gmra.mrb[24].mxu0 %v9655_v47 }
 0x38e   : > { %6697 = vmatprep.mubr.msk.bf16.mxu0 %vm623_vm1, %v9658_v62 }
 0x395   : > { %6080 = vmatmul.mubr.bf16.gmra.mrb[28].mxu0 %v9659_v16 }
 0x396   : > { %6698 = vmatprep.mubr.msk.bf16.mxu0 %vm623_vm1, %v9662_v0 }
 0x39d   : > { %6088 = vmatmul.mubr.bf16.gmra.mrb[32].mxu0 %v9663_v55 }
 0x39e   : > { %6699 = vmatprep.mubr.msk.bf16.mxu0 %vm623_vm1, %v9666_v51 }
 0x3a5   : > { %6096 = vmatmul.mubr.bf16.gmra.mrb[36].mxu0 %v9667_v7 }
 0x3a6   : > { %6700 = vmatprep.mubr.msk.bf16.mxu0 %vm623_vm1, %v9670_v29 }
 0x3ad   : > { %6104 = vmatmul.mubr.bf16.gmra.mrb[40].mxu0 %v9671_v33 }
 0x419   : > { %v5669_v46 = vpop.f32.mrb[40].mxu1 }
 0x41a   : > { %v6894_v27 = vpop.f32.mrb[41].mxu1 }
 0x41b   : > { %v5672_v52 = vpop.f32.mrb[42].mxu1 }
 0x41c   : > { %v6895_v6 = vpop.f32.mrb[43].mxu1 }
 0x430   : > { %v5556_v50 = vpop.f32.mrb[16].mxu0 }
 0x431   : > { %v9387_v1 = vadd.f32 %v5669_v46, %v5556_v50  ;;  %v6874_v8 = vpop.f32.mrb[17].mxu0 }
 0x432   : > { %v5559_v37 = vpop.f32.mrb[18].mxu0 }
 0x433   : > { %v6875_v25 = vpop.f32.mrb[19].mxu0 }
 0x458   : > { %v6065_v40 = vpop.f32.mrb[20].mxu0 }
 0x459   : > { %v6124_v31 = vcombine.high %v6065_v40, %v6065_v40  ;;  %v6157_v58 = vadd.f32 %v9393_v57, %v6065_v40  ;;  %v6067_v41 = vpop.f32.mrb[21].mxu0 }
 0x45a   : > { %v6068_v56 = vpop.f32.mrb[22].mxu0 }
 0x45b   : > { %v6158_v20 = vadd.f32 %v9397_v42, %v6124_v31  ;;  %v6125_v43 = vcombine.high %v6068_v56, %v6068_v56  ;;  %v6159_v53 = vadd.f32 %v9393_v57, %v6068_v56  ;;  %v6070_v28 = vpop.f32.mrb[23].mxu0  ;;  %v6181_v36 = vmax.f32 %v6157_v58, 0.0 }
 0x45d   : > { %v6182_v4 = vmax.f32 %v6158_v20, 0.0  ;;  %v6183_v35 = vmax.f32 %v6159_v53, 0.0  ;;  %v6160_v9 = vadd.f32 %v9393_v57, %v6125_v43 }
 0x45f   : > { %v6221_v15 = vcombine.low %v6181_v36, %v6182_v4  ;;  %v6238_v54 = vsel %vm6237_vm13, %v6183_v35, -inf  ;;  %v6184_v19 = vmax.f32 %v6160_v9, 0.0 }
 0x460   : > { %v6073_v34 = vpop.f32.mrb[24].mxu0 }
 0x461   : > { %v6239_v18 = vmax.f32 %v6221_v15, %v6238_v54  ;;  %v6126_v32 = vcombine.high %v6073_v34, %v6073_v34  ;;  %v6161_v30 = vadd.f32 %v9397_v42, %v6073_v34  ;;  %v6075_v14 = vpop.f32.mrb[25].mxu0 }
 0x462   : > { %v6076_v63 = vpop.f32.mrb[26].mxu0 }
 0x463   : > { %v6240_v11 = vrot.slane %v6239_v18, 4  ;;  %v6162_v44 = vadd.f32 %v9393_v57, %v6126_v32  ;;  %v6185_v60 = vmax.f32 %v6161_v30, 0.0  ;;  %v6127_v5 = vcombine.high %v6076_v63, %v6076_v63  ;;  %v6078_v39 = vpop.f32.mrb[27].mxu0 }
 0x464   : > { %v6163_v62 = vadd.f32 %v9393_v57, %v6076_v63 }
 0x465   : > { %v6241_v12 = vmax.f32 %v6239_v18, %v6240_v11  ;;  %v6186_v47 = vmax.f32 %v6162_v44, 0.0  ;;  %v6222_v22 = vcombine.low %v6184_v19, %v6185_v60  ;;  %v6164_v26 = vadd.f32 %v9397_v42, %v6127_v5 }
 0x466   : > { %v6187_v24 = vmax.f32 %v6163_v62, 0.0 }
 0x467   : > { %v6242_v16 = vrot.slane %v6241_v12, 2  ;;  %v6246_v21 = vsel %vm6237_vm13, %v6186_v47, -inf  ;;  %v6188_v0 = vmax.f32 %v6164_v26, 0.0 }
 0x468   : > { %v6247_v13 = vmax.f32 %v6222_v22, %v6246_v21  ;;  %v6081_v55 = vpop.f32.mrb[28].mxu0 }
 0x469   : > { %v6243_v59 = vmax.f32 %v6241_v12, %v6242_v16  ;;  %v6128_v61 = vcombine.high %v6081_v55, %v6081_v55  ;;  %v6165_v51 = vadd.f32 %v9393_v57, %v6081_v55  ;;  %v6083_v7 = vpop.f32.mrb[29].mxu0  ;;  %v6223_v52 = vcombine.low %v6187_v24, %v6188_v0 }
 0x46a   : > { %v6248_v17 = vrot.slane %v6247_v13, 4  ;;  %v6084_v29 = vpop.f32.mrb[30].mxu0 }
 0x46b   : > { %v6166_v33 = vadd.f32 %v9393_v57, %v6128_v61  ;;  %v6189_v49 = vmax.f32 %v6165_v51, 0.0  ;;  %v6129_v10 = vcombine.high %v6084_v29, %v6084_v29  ;;  %v6086_v46 = vpop.f32.mrb[31].mxu0  ;;  %v6244_v27 = vrot.slane %v6243_v59, 1 }
 0x46c   : > { %v6249_v45 = vmax.f32 %v6247_v13, %v6248_v17  ;;  %v6167_v6 = vadd.f32 %v9397_v42, %v6084_v29 }
 0x46d   : > { %v6190_v2 = vmax.f32 %v6166_v33, 0.0  ;;  %v6254_v3 = vsel %vm6237_vm13, %v6189_v49, -inf  ;;  %v6168_v23 = vadd.f32 %v9393_v57, %v6129_v10  ;;  %v6245_v37 = vmax.f32 %v6243_v59, %v6244_v27 }
 0x46e   : > { %v6250_v48 = vrot.slane %v6249_v45, 2  ;;  %v6255_v50 = vmax.f32 %v6223_v52, %v6254_v3  ;;  %v6191_v38 = vmax.f32 %v6167_v6, 0.0 }
 0x46f   : > { %v6192_v8 = vmax.f32 %v6168_v23, 0.0  ;;  %v6302_v34 = vpack.c.bf16 %v6245_v37, %v6245_v37 }
 0x470   : > { %v6251_v25 = vmax.f32 %v6249_v45, %v6250_v48  ;;  %v6256_v40 = vrot.slane %v6255_v50, 4  ;;  %v6224_v31 = vcombine.low %v6190_v2, %v6191_v38  ;;  %v6089_v58 = vpop.f32.mrb[32].mxu0 }
 0x471   : > { %v6262_v41 = vsel %vm6237_vm13, %v6192_v8, -inf  ;;  %v6130_v56 = vcombine.high %v6089_v58, %v6089_v58  ;;  %v6169_v20 = vadd.f32 %v9393_v57, %v6089_v58  ;;  %v6091_v43 = vpop.f32.mrb[33].mxu0  ;;  %v6334_v47 = vunpack.c.l.b16 %v6302_v34 }
 0x472   : > { %v6252_v53 = vrot.slane %v6251_v25, 1  ;;  %v6257_v28 = vmax.f32 %v6255_v50, %v6256_v40  ;;  %v6263_v36 = vmax.f32 %v6224_v31, %v6262_v41  ;;  %v6092_v4 = vpop.f32.mrb[34].mxu0 }
 0x473   : > { %v6170_v35 = vadd.f32 %v9397_v42, %v6130_v56  ;;  %v6131_v9 = vcombine.high %v6092_v4, %v6092_v4  ;;  %v6171_v15 = vadd.f32 %v9393_v57, %v6092_v4  ;;  %v6094_v54 = vpop.f32.mrb[35].mxu0  ;;  %v6193_v14 = vmax.f32 %v6169_v20, 0.0 }
 0x474   : > { %v6253_v18 = vmax.f32 %v6251_v25, %v6252_v53  ;;  %v6258_v32 = vrot.slane %v6257_v28, 2  ;;  %v6264_v30 = vrot.slane %v6263_v36, 4 }
 0x475   : > { %v6194_v19 = vmax.f32 %v6170_v35, 0.0  ;;  %v6195_v63 = vmax.f32 %v6171_v15, 0.0  ;;  %v6172_v5 = vadd.f32 %v9393_v57, %v6131_v9 }
 0x476   : > { %v6303_v11 = vpack.c.bf16 %v6253_v18, %v6253_v18  ;;  %v6259_v44 = vmax.f32 %v6257_v28, %v6258_v32  ;;  %v6265_v60 = vmax.f32 %v6263_v36, %v6264_v30 }
 0x477   : > { %v6225_v39 = vcombine.low %v6193_v14, %v6194_v19  ;;  %v6270_v12 = vsel %vm6237_vm13, %v6195_v63, -inf  ;;  %v6196_v7 = vmax.f32 %v6172_v5, 0.0 }
 0x478   : > { %v6335_v22 = vunpack.c.l.b16 %v6303_v11  ;;  %v6260_v26 = vrot.slane %v6259_v44, 1  ;;  %v6266_v62 = vrot.slane %v6265_v60, 2  ;;  %v6097_v16 = vpop.f32.mrb[36].mxu0 }
 0x479   : > { %v6271_v21 = vmax.f32 %v6225_v39, %v6270_v12  ;;  %v6132_v13 = vcombine.high %v6097_v16, %v6097_v16  ;;  %v6173_v0 = vadd.f32 %v9397_v42, %v6097_v16  ;;  %v6099_v55 = vpop.f32.mrb[37].mxu0 }
 0x47a   : > { %v6342_v59 = vsel %vm5458_vm5, %v6335_v22, %v6334_v47  ;;  %v6261_v61 = vmax.f32 %v6259_v44, %v6260_v26  ;;  %v6267_v51 = vmax.f32 %v6265_v60, %v6266_v62  ;;  %v6100_v17 = vpop.f32.mrb[38].mxu0 }
 0x47b   : > { %v6272_v24 = vrot.slane %v6271_v21, 4  ;;  %v6174_v29 = vadd.f32 %v9393_v57, %v6132_v13  ;;  %v6197_v33 = vmax.f32 %v6173_v0, 0.0  ;;  %v6133_v49 = vcombine.high %v6100_v17, %v6100_v17  ;;  %v6102_v10 = vpop.f32.mrb[39].mxu0 }
 0x47c   : > { %v6304_v46 = vpack.c.bf16 %v6261_v61, %v6261_v61  ;;  %v6268_v27 = vrot.slane %v6267_v51, 1  ;;  %v6175_v48 = vadd.f32 %v9393_v57, %v6100_v17 }
 0x47d   : > { %v6273_v45 = vmax.f32 %v6271_v21, %v6272_v24  ;;  %v6198_v52 = vmax.f32 %v6174_v29, 0.0  ;;  %v6226_v6 = vcombine.low %v6196_v7, %v6197_v33  ;;  %v6176_v2 = vadd.f32 %v9397_v42, %v6133_v49 }
 0x47e   : > { %v6336_v3 = vunpack.c.l.b16 %v6304_v46  ;;  %v6269_v23 = vmax.f32 %v6267_v51, %v6268_v27  ;;  %v6199_v28 = vmax.f32 %v6175_v48, 0.0 }
 0x47f   : > { %v6274_v50 = vrot.slane %v6273_v45, 2  ;;  %v6278_v38 = vsel %vm6237_vm13, %v6198_v52, -inf  ;;  %v6200_v40 = vmax.f32 %v6176_v2, 0.0 }
 0x480   : > { %v6343_v8 = vsel %vm5460_vm7, %v6336_v3, %v6342_v59  ;;  %v6305_v37 = vpack.c.bf16 %v6269_v23, %v6269_v23  ;;  %v6279_v25 = vmax.f32 %v6226_v6, %v6278_v38  ;;  %v6105_v31 = vpop.f32.mrb[40].mxu0  ;;  %v6710_v38 = vld [vmem:[%s9673_s24] ss:$0 sm:$0xff] }
 0x481   : > { %v6275_v58 = vmax.f32 %v6273_v45, %v6274_v50  ;;  %v6134_v41 = vcombine.high %v6105_v31, %v6105_v31  ;;  %v6177_v56 = vadd.f32 %v9393_v57, %v6105_v31  ;;  %v6107_v20 = vpop.f32.mrb[41].mxu0  ;;  %v6227_v18 = vcombine.low %v6199_v28, %v6200_v40 }
 0x482   : > { %v6337_v43 = vunpack.c.l.b16 %v6305_v37  ;;  %v6280_v53 = vrot.slane %v6279_v25, 4  ;;  %v6108_v36 = vpop.f32.mrb[42].mxu0 }
 0x483   : > { %v6276_v4 = vrot.slane %v6275_v58, 1  ;;  %v6178_v35 = vadd.f32 %v9393_v57, %v6134_v41  ;;  %v6201_v9 = vmax.f32 %v6177_v56, 0.0  ;;  %v6135_v15 = vcombine.high %v6108_v36, %v6108_v36  ;;  %v6110_v54 = vpop.f32.mrb[43].mxu0 }
 0x484   : > { %v6281_v34 = vmax.f32 %v6279_v25, %v6280_v53  ;;  %v6179_v32 = vadd.f32 %v9397_v42, %v6108_v36  ;;  %v6344_v30 = vsel %vm5462_vm8, %v6337_v43, %v6343_v8 }
 0x485   : > { %v6277_v14 = vmax.f32 %v6275_v58, %v6276_v4  ;;  %v6202_v19 = vmax.f32 %v6178_v35, 0.0  ;;  %v6286_v63 = vsel %vm6237_vm13, %v6201_v9, -inf  ;;  %v6180_v11 = vadd.f32 %v9393_v57, %v6135_v15 }
 0x486   : > { %v6282_v44 = vrot.slane %v6281_v34, 2  ;;  %v6287_v60 = vmax.f32 %v6227_v18, %v6286_v63  ;;  %v6203_v5 = vmax.f32 %v6179_v32, 0.0 }
 0x487   : > { %v6306_v39 = vpack.c.bf16 %v6277_v14, %v6277_v14  ;;  %v6204_v12 = vmax.f32 %v6180_v11, 0.0 }
 0x488   : > { %v6283_v47 = vmax.f32 %v6281_v34, %v6282_v44  ;;  %v6288_v22 = vrot.slane %v6287_v60, 4  ;;  %v6228_v26 = vcombine.low %v6202_v19, %v6203_v5 }
 0x489   : > { %v6338_v62 = vunpack.c.l.b16 %v6306_v39  ;;  %v6294_v16 = vsel %vm6237_vm13, %v6204_v12, -inf }
 0x48a   : > { %v6284_v42 = vrot.slane %v6283_v47, 1  ;;  %v6289_v21 = vmax.f32 %v6287_v60, %v6288_v22  ;;  %v6295_v13 = vmax.f32 %v6228_v26, %v6294_v16 }
 0x48b   : > { %v6345_v0 = vsel %vm5464_vm9, %v6338_v62, %v6344_v30 }
 0x48c   : > { %v6285_v55 = vmax.f32 %v6283_v47, %v6284_v42  ;;  %v6290_v59 = vrot.slane %v6289_v21, 2  ;;  %v6296_v61 = vrot.slane %v6295_v13, 4 }
 0x48e   : > { %v6307_v57 = vpack.c.bf16 %v6285_v55, %v6285_v55  ;;  %v6291_v51 = vmax.f32 %v6289_v21, %v6290_v59  ;;  %v6297_v7 = vmax.f32 %v6295_v13, %v6296_v61 }
 0x490   : > { %v6339_v17 = vunpack.c.l.b16 %v6307_v57  ;;  %v6292_v24 = vrot.slane %v6291_v51, 1  ;;  %v6298_v29 = vrot.slane %v6297_v7, 2 }
 0x492   : > { %v6293_v33 = vmax.f32 %v6291_v51, %v6292_v24  ;;  %v6299_v49 = vmax.f32 %v6297_v7, %v6298_v29  ;;  %v6346_v10 = vsel %vm5466_vm10, %v6339_v17, %v6345_v0 }
 0x494   : > { %v6308_v46 = vpack.c.bf16 %v6293_v33, %v6293_v33  ;;  %v6300_v27 = vrot.slane %v6299_v49, 1 }
 0x496   : > { %v6340_v45 = vunpack.c.l.b16 %v6308_v46  ;;  %v6301_v52 = vmax.f32 %v6299_v49, %v6300_v27 }
 0x498   : > { %v6309_v6 = vpack.c.bf16 %v6301_v52, %v6301_v52  ;;  %v6347_v2 = vsel %vm5468_vm11, %v6340_v45, %v6346_v10 }
 0x49a   : > { %v6341_v3 = vunpack.c.l.b16 %v6309_v6 }
 0x49c   : > { %v6348_v23 = vsel %vm5470_vm12, %v6341_v3, %v6347_v2 }
 0x49d   : > { %v6349_v48 = vpack.c.b16 %v6348_v23, %v6348_v23 }
 0x49f   : > { %6913 = vmatmul.mubr.bf16.vlgmr.msra.gmra.mrb[44].mxu1 %v6349_v48 }
 0x572   : > { %v6433_v50 = vpop.f32.mrb[44].mxu1 }
 0x573   : > { %v6439_v8 = vadd.f32 %v6433_v50, %v9387_v1  ;;  %v6914_v37 = vpop.f32.mrb[45].mxu1 }
 0x574   : > { %v6436_v25 = vpop.f32.mrb[46].mxu1 }
 0x575   : > { %v6447_v40 = vadd.f32 %v6710_v38, %v6439_v8  ;;  %v6915_v31 = vpop.f32.mrb[47].mxu1 }
 0x577   : > { %6448 = vst [vmem:[%s492_s14] sm:$0xff] %v6447_v40 }
 0x578   : > { %7306 = shalt.err (!%p7303_p8)
}
 0x579   : > { %s7307_s28 = scalar_lea.hbm %s9447_s25, 128  ;;  %s7311_s30 = scalar_lea.hbm %s9674_s21, 256 }
 0x57a   : > { %p7308_p4 = scmp.ne.s32.totalorder %s9447_s25, %s7307_s28  ;;  %p7312_p3 = scmp.lt.u32.totalorder %s9447_s25, %s9674_s21 }
 0x57b   : > { %p7313_p5 = scmp.lt.u32.totalorder %s7311_s30, %s7307_s28  ;;  %p7315_p6 = scmp.lt.u32.totalorder %s7307_s28, %s9447_s25 }
 0x57c   : > { %p7309_p10 = pnand %p7308_p4, %p9675_p9 }
 0x57d   : > { %p7314_p7 = por %p7313_p5, %p7312_p3 }
 0x57e   : > { %p7310_p11 = pneg %p7309_p10 }
 0x57f   : > { %p7316_p12 = por %p7315_p6, %p7314_p7 }
 0x581   : > { %p7317_p1 = pnand %p7316_p12, %p7310_p11 }
 0x583   : > { %7320 = shalt.err (!%p7317_p1)
}
 0x584   : > { %6954 = dma.vmem_to_hbm [thread:$0]  (%p9675_p9), %s9449_s11, 128, %s9447_s25, %s6450_s23  }
 0x585 PF: > { %s6475_s29 = sand.u32 1, %s7359_s17   ;;  %p9676_p13 = scmp.ne.s32.totalorder %s9568_s15, 0 }
 0x586   : > { %p9677_p0 = scmp.ge.s32.totalorder %s7371_s20, 2  ;;  %s6476_s1 = scalar_lea.sflag [#allocation4], %s6475_s29 }
 0x588   : > { %p6980_p2 = pnand %p9677_p0, %p9676_p13 }
 0x58a   : > { %7354 = dma.done.wait (!%p6980_p2), %s6476_s1, 128  }
 0x58b   : > { %7356 = vsyncadd (!%p6980_p2), %s6476_s1, 4294967168  ;;  %p27_p8 = scmp.ge.s32.totalorder %s7647_s16, 4   ;;  %s9678_s17 = smov %s7363_s18 }
 0x58c   : > { %s9679_s18 = smov %s7367_s19  ;;  %s9680_s19 = smov %s7658_s10 }
 0x58d   : > { %s9681_s20 = smov %s7647_s16  ;;  %29 = sbr.rel (!%p27_p8) target bundleno = 13 (0xd), region = 133 }
 0x594   :  { %6481 = vsyncpa [#allocation3], 1 }
 0x595   :  { %6483 = vsyncpa [#allocation3 + $0x1], 1 }
 0x596   :  { %6484 = vsyncpa [#allocation6], 1 }
 0x597   :  { %6485 = vsyncpa [#allocation9], 1 }
 0x598   :  { %6486 = vsyncpa [#allocation12], 1 }
 0x599   :  { %6487 = vsyncpa [#allocation4], 1 }
 0x59a   :  { %6489 = vsyncpa [#allocation4 + $0x1], 1 }

</bundles_post_ra>
